<compile_context>
chip_gen: v5e
topology: v5e:2x2
jax: 0.10.0
libtpu: 0.0.40
codegen_flags: <defaults>
</compile_context>

<pallas_src>
import jax
import jax.numpy as jnp
from jax.experimental import pallas as pl
from jax.experimental.pallas import tpu as pltpu

LANES = 128


def _row_unroll(w8):
    # Output rows computed per inner iteration: amortizes the 49 per-tap weight
    # loads (keeps the vld slot below the VALU bound) while keeping the
    # accumulator working set small enough to live in vregs.
    return 2 if w8 <= 4 else 1


def ppeg_kernel(x_ref, w_ref, b_ref, o_ref, sh_ref):
    """Folded 49-tap depthwise stencil (7x7 + 5x5 + 3x3 + identity).

    x_ref : (Gb, Hk, Wk, L)         input tile, lane-dense (L = 128 planes)
    w_ref : (Gb, 49, 8, L)          folded weights, sublane-replicated
    b_ref : (Gb, 8, L)              folded bias, sublane-replicated
    o_ref : (Gb, Hk, W8, 8, L)      output tile
    sh_ref: (7*Gb, Hk+6, W8, 8, L)  scratch: per-dw column-shifted, row-padded frame
    """
    Gb, Hk, Wk, L = x_ref.shape
    assert Wk % 8 == 0
    W8 = Wk // 8
    Hp = Hk + 6
    RU = _row_unroll(W8)
    assert Hk % RU == 0
    f32 = jnp.float32
    bandw = Wk + 16

    # ---- zero the top/bottom padding rows ONCE per core-run (review #3).
    # The interior rows are rewritten every grid step, the border never is.
    # Grid axis uses "arbitrary" semantics, so one core owns this scratch.
    @pl.when(pl.program_id(0) == 0)
    def _zero_border():
        sh_ref[:, 0:3] = jnp.zeros((7 * Gb, 3, W8, 8, L), f32)
        sh_ref[:, 3 + Hk:Hp] = jnp.zeros((7 * Gb, 3, W8, 8, L), f32)

    zpad = jnp.zeros((8, L), f32)

    # ---- phase 1: build the 7 column-shifted bands (review #1).
    # The column shift is an XLU sublane roll of an aligned zero-framed band;
    # every load/store below starts at a multiple of 8 sublanes.
    @pl.loop(0, Gb)
    def _build(g):
        @pl.loop(0, Hk)
        def _row(h):
            row = x_ref[g, h].astype(f32)                       # (Wk, L)
            band = jnp.concatenate([zpad, row, zpad], axis=0)   # (Wk+16, L)
            for dw in range(7):
                if dw == 3:
                    shifted = band
                else:
                    shifted = pltpu.roll(band, (3 - dw) % bandw, axis=0)
                win = shifted[8:8 + Wk]                         # aligned vreg pick
                sh_ref[dw * Gb + g, 3 + h] = win.reshape(W8, 8, L)

    # ---- phase 2: 49-tap accumulation, RU output rows per iteration,
    # 2 independent accumulators per row (bias folded into one of them),
    # so the working set stays in vregs (review #2, #4, #10).
    @pl.loop(0, Gb)
    def _acc_g(g):
        bias = jnp.broadcast_to(b_ref[g], (W8, 8, L))           # hoisted out of row loop

        @pl.loop(0, Hk // RU)
        def _rows(r):
            i0 = r * RU
            accs = [[bias, jnp.zeros((W8, 8, L), f32)] for _ in range(RU)]
            for dh in range(7):
                for dw in range(7):
                    wt = w_ref[g, dh * 7 + dw]                  # (8, L), shared by RU rows
                    for u in range(RU):
                        tap = sh_ref[dw * Gb + g, i0 + u + dh]  # (W8, 8, L), aligned
                        accs[u][dw & 1] = accs[u][dw & 1] + tap * wt
            for u in range(RU):
                o_ref[g, i0 + u] = (accs[u][0] + accs[u][1]).astype(o_ref.dtype)


def _vmem_budget():
    # Generation-aware budget (review #7): stay well inside v7x's 64 MiB while
    # letting 128 MiB parts use bigger blocks.
    cap = 128 * 1024 * 1024
    try:
        cap = int(pltpu.get_tpu_info().vmem_capacity_bytes)
    except Exception:
        pass
    return max(4 * 1024 * 1024, min(cap // 4, 24 * 1024 * 1024))


def _pick_block_groups(G, Hk, Wk, vmem_budget):
    Hp = Hk + 6
    per_group = (
        2 * 2 * Hk * Wk * LANES * 4      # x + out blocks, double-buffered, f32
        + 7 * Hp * Wk * LANES * 4        # shifted-band scratch
        + 2 * 49 * 8 * LANES * 4         # weights (double-buffered)
        + 2 * 8 * LANES * 4              # bias
    )
    return int(max(1, min(G, vmem_budget // per_group)))


def ppeg_forward(x, H, W, w7, b7, w5, b5, w3, b3, *, block_groups=None):
    """PPEG forward. x: (B, N, C), N == H*W; depthwise weights as (kh, kw, C)."""
    B, N, C = x.shape
    assert N == H * W
    out_dtype = x.dtype

    # ---- fold 5x5 + 3x3 + identity + all biases into ONE 7x7 stencil (exact) ----
    w_comb = (w7.astype(jnp.float32)
              + jnp.pad(w5.astype(jnp.float32), ((1, 1), (1, 1), (0, 0)))
              + jnp.pad(w3.astype(jnp.float32), ((2, 2), (2, 2), (0, 0))))
    w_comb = w_comb.at[3, 3, :].add(1.0)                 # residual (identity) tap
    b_comb = (b7 + b5 + b3).astype(jnp.float32)

    # ---- spatial padding: W to a multiple of 8 (sublane tile), H to a multiple
    # of the row-unroll.  The extra zero rows/cols sit outside the true image,
    # so the 'same' zero-padded conv on the true region is unchanged.
    Wk = 8 * pl.cdiv(W, 8)
    RU = _row_unroll(Wk // 8)
    Hk = RU * pl.cdiv(H, RU)
    cnn = x.reshape(B, H, W, C)
    if (Hk, Wk) != (H, W):
        cnn = jnp.pad(cnn, ((0, 0), (0, Hk - H), (0, Wk - W), (0, 0)))

    # ---- plane packing: each (batch, channel) plane is an independent
    # depthwise channel; pack 128 planes per lane-group (handles C < 128 and
    # C >= 128 uniformly).
    P = B * C
    G = pl.cdiv(P, LANES)
    Ppad = G * LANES
    planes = cnn.transpose(0, 3, 1, 2).reshape(P, Hk, Wk)
    if Ppad != P:
        planes = jnp.pad(planes, ((0, Ppad - P), (0, 0), (0, 0)))
    xw = planes.reshape(G, LANES, Hk, Wk).transpose(0, 2, 3, 1)     # (G, Hk, Wk, 128)

    chan = jnp.arange(Ppad) % C                                     # plane -> channel
    wg = w_comb.reshape(49, C)[:, chan].reshape(49, G, LANES).transpose(1, 0, 2)
    wg = jnp.tile(wg[:, :, None, :], (1, 1, 8, 1))                  # (G, 49, 8, 128)
    bg = jnp.tile(b_comb[chan].reshape(G, 1, LANES), (1, 8, 1))     # (G, 8, 128)

    # ---- block-group selection: no divisor / >=2-steps constraint, pad the
    # group axis to a multiple of the block instead (review #7).
    if block_groups is None:
        Gb = _pick_block_groups(G, Hk, Wk, _vmem_budget())
    else:
        Gb = block_groups
    Gb = max(1, min(Gb, G))
    Gpad = Gb * pl.cdiv(G, Gb)
    if Gpad != G:
        xw = jnp.pad(xw, ((0, Gpad - G), (0, 0), (0, 0), (0, 0)))
        wg = jnp.pad(wg, ((0, Gpad - G), (0, 0), (0, 0), (0, 0)))
        bg = jnp.pad(bg, ((0, Gpad - G), (0, 0), (0, 0)))

    W8 = Wk // 8
    grid = (Gpad // Gb,)
    out = pl.pallas_call(
        ppeg_kernel,
        out_shape=jax.ShapeDtypeStruct((Gpad, Hk, W8, 8, LANES), out_dtype),
        grid_spec=pltpu.PrefetchScalarGridSpec(
            num_scalar_prefetch=0,
            grid=grid,
            in_specs=[
                pl.BlockSpec((Gb, Hk, Wk, LANES), lambda g: (g, 0, 0, 0)),
                pl.BlockSpec((Gb, 49, 8, LANES), lambda g: (g, 0, 0, 0)),
                pl.BlockSpec((Gb, 8, LANES), lambda g: (g, 0, 0)),
            ],
            out_specs=pl.BlockSpec((Gb, Hk, W8, 8, LANES),
                                   lambda g: (g, 0, 0, 0, 0)),
            scratch_shapes=[
                pltpu.VMEM((7 * Gb, Hk + 6, W8, 8, LANES), jnp.float32),
            ],
        ),
        compiler_params=pltpu.CompilerParams(
            # "arbitrary": a single core owns the persistent scratch, so the
            # zero-border-once guard at program_id==0 is valid on every chip.
            dimension_semantics=("arbitrary",),
            vmem_limit_bytes=48 * 1024 * 1024,
        ),
    )(xw, wg, bg)

    # ---- unpack: (Gpad, Hk, W8, 8, 128) -> (B, N, C) ----
    out = out.reshape(Gpad, Hk, Wk, LANES)[:G]
    out = out.transpose(0, 3, 1, 2).reshape(G * LANES, Hk, Wk)[:P]
    out = out[:, :H, :W].reshape(B, C, H, W).transpose(0, 2, 3, 1).reshape(B, N, C)
    # TODO(synk): fuse the plane pack/unpack transposes into producer/consumer
    # (2 extra HBM passes for small C), and optionally DMA x straight into the
    # shifted-band scratch with pltpu.make_async_copy (review item #5).
    return out


def _dwconv_ref(x_nhwc, w, b):
    """Reference depthwise conv (groups=C, stride 1, 'same' zero padding)."""
    kh, kw, C = w.shape
    out = jax.lax.conv_general_dilated(
        x_nhwc, w.reshape(kh, kw, 1, C), window_strides=(1, 1), padding="SAME",
        dimension_numbers=("NHWC", "HWIO", "NHWC"), feature_group_count=C)
    return out + b


def ppeg_reference(x, H, W, w7, b7, w5, b5, w3, b3):
    B, N, C = x.shape
    cnn = x.reshape(B, H, W, C)
    out = (_dwconv_ref(cnn, w7, b7) + cnn
           + _dwconv_ref(cnn, w5, b5) + _dwconv_ref(cnn, w3, b3))
    return out.reshape(B, N, C)


if __name__ == "__main__":
    # Small but representative: C=24 (multiple images packed per 128-lane
    # group), H=W=7 (exercises the W->8 / H->row-unroll padding), B=12 ->
    # 288 planes -> 3 lane groups; block_groups=2 pads the group axis and
    # gives a 2-step grid (exercises the zero-border-once path).
    B, C, H, W = 12, 24, 7, 7
    N = H * W

    key = jax.random.PRNGKey(0)
    kx, k1, k2, k3, k4, k5, k6 = jax.random.split(key, 7)
    x = jax.random.normal(kx, (B, N, C), jnp.float32)
    w7 = jax.random.normal(k1, (7, 7, C), jnp.float32) * 0.05
    b7 = jax.random.normal(k2, (C,), jnp.float32) * 0.05
    w5 = jax.random.normal(k3, (5, 5, C), jnp.float32) * 0.05
    b5 = jax.random.normal(k4, (C,), jnp.float32) * 0.05
    w3 = jax.random.normal(k5, (3, 3, C), jnp.float32) * 0.05
    b3 = jax.random.normal(k6, (C,), jnp.float32) * 0.05

    out = ppeg_forward(x, H, W, w7, b7, w5, b5, w3, b3, block_groups=2)
    out = jax.block_until_ready(out)

    ref = ppeg_reference(x, H, W, w7, b7, w5, b5, w3, b3)
    assert out.shape == (B, N, C)
    assert jnp.allclose(out, ref, atol=1e-4, rtol=1e-4), "mismatch vs reference"
    print("KERNEL_OK")
</pallas_src>

<mosaic_0001>
module attributes {stable_mosaic.version = 11 : i64} {
  func.func @ppeg_kernel(%arg0: i32, %arg1: memref<2x8x8x128xf32, #tpu.memory_space<vmem>>, %arg2: memref<2x49x8x128xf32, #tpu.memory_space<vmem>>, %arg3: memref<2x8x128xf32, #tpu.memory_space<vmem>>, %arg4: memref<2x8x1x8x128xf32, #tpu.memory_space<vmem>>, %arg5: memref<14x14x1x8x128xf32, #tpu.memory_space<vmem>>) attributes {dimension_semantics = [#tpu.dimension_semantics<arbitrary>], iteration_bounds = array<i64: 2>, scalar_prefetch = 0 : i64, scratch_operands = 1 : i64, tpu.core_type = #tpu.core_type<tc>, window_params = [{transform_indices = @transform_0, window_bounds = array<i64: 2, 8, 8, 128>}, {transform_indices = @transform_1, window_bounds = array<i64: 2, 49, 8, 128>}, {transform_indices = @transform_2, window_bounds = array<i64: 2, 8, 128>}, {transform_indices = @transform_3, window_bounds = array<i64: 2, 8, 1, 8, 128>}]} {
    %c0_i32 = arith.constant 0 : i32
    %0 = arith.cmpi eq, %arg0, %c0_i32 : i32
    %1 = arith.extui %0 : i1 to i32
    %c0_i32_0 = arith.constant 0 : i32
    %2 = arith.cmpi ne, %1, %c0_i32_0 : i32
    scf.if %2 {
      %cst_7 = arith.constant 0.000000e+00 : f32
      %6 = vector.broadcast %cst_7 : f32 to vector<14x3x1x8x128xf32>
      %c0 = arith.constant 0 : index
      %c0_8 = arith.constant 0 : index
      %c0_9 = arith.constant 0 : index
      %c0_10 = arith.constant 0 : index
      %c0_11 = arith.constant 0 : index
      %7 = vector.load %arg5[%c0, %c0_8, %c0_9, %c0_10, %c0_11] : memref<14x14x1x8x128xf32, #tpu.memory_space<vmem>>, vector<14x3x1x8x128xf32>
      tpu.vector_store %arg5[%c0, %c0_8, %c0_9, %c0_10, %c0_11], %6 {strides = array<i32>} : memref<14x14x1x8x128xf32, #tpu.memory_space<vmem>>, vector<14x3x1x8x128xf32>,
      %cst_12 = arith.constant 0.000000e+00 : f32
      %8 = vector.broadcast %cst_12 : f32 to vector<14x3x1x8x128xf32>
      %c0_13 = arith.constant 0 : index
      %c11 = arith.constant 11 : index
      %c0_14 = arith.constant 0 : index
      %c0_15 = arith.constant 0 : index
      %c0_16 = arith.constant 0 : index
      %9 = vector.load %arg5[%c0_13, %c11, %c0_14, %c0_15, %c0_16] : memref<14x14x1x8x128xf32, #tpu.memory_space<vmem>>, vector<14x3x1x8x128xf32>
      tpu.vector_store %arg5[%c0_13, %c11, %c0_14, %c0_15, %c0_16], %8 {strides = array<i32>} : memref<14x14x1x8x128xf32, #tpu.memory_space<vmem>>, vector<14x3x1x8x128xf32>,
    } else {
    }
    %cst = arith.constant 0.000000e+00 : f32
    %3 = vector.broadcast %cst : f32 to vector<8x128xf32>
    %c0_i32_1 = arith.constant 0 : i32
    %c2_i32 = arith.constant 2 : i32
    %4 = arith.addi %c0_i32_1, %c2_i32 : i32
    %c1_i32 = arith.constant 1 : i32
    scf.for %arg6 = %c0_i32_1 to %4 step %c1_i32  : i32 {
      %c1_i32_7 = arith.constant 1 : i32
      %6 = arith.muli %arg6, %c1_i32_7 : i32
      %c0_i32_8 = arith.constant 0 : i32
      %7 = arith.addi %c0_i32_8, %6 : i32
      %c0_i32_9 = arith.constant 0 : i32
      %c8_i32 = arith.constant 8 : i32
      %8 = arith.addi %c0_i32_9, %c8_i32 : i32
      %c1_i32_10 = arith.constant 1 : i32
      scf.for %arg7 = %c0_i32_9 to %8 step %c1_i32_10  : i32 {
        %c1_i32_12 = arith.constant 1 : i32
        %9 = arith.muli %arg7, %c1_i32_12 : i32
        %c0_i32_13 = arith.constant 0 : i32
        %10 = arith.addi %c0_i32_13, %9 : i32
        %11 = arith.index_cast %7 : i32 to index
        %12 = arith.index_cast %10 : i32 to index
        %c0 = arith.constant 0 : index
        %c0_14 = arith.constant 0 : index
        %13 = vector.load %arg1[%11, %12, %c0, %c0_14] : memref<2x8x8x128xf32, #tpu.memory_space<vmem>>, vector<1x1x8x128xf32>
        %14 = vector.shape_cast %13 : vector<1x1x8x128xf32> to vector<8x128xf32>
        %15 = tpu.concatenate %3, %14, %3 in 0 : vector<8x128xf32>, vector<8x128xf32>, vector<8x128xf32> -> vector<24x128xf32>
        %c3_i32 = arith.constant 3 : i32
        %16 = tpu.dynamic_rotate %15 by %c3_i32 dim 0 : vector<24x128xf32>, i32 -> vector<24x128xf32>
        %17 = vector.extract_strided_slice %16 {offsets = [8, 0], sizes = [8, 128], strides = [1, 1]} : vector<24x128xf32> to vector<8x128xf32>
        %18 = vector.shape_cast %17 : vector<8x128xf32> to vector<1x8x128xf32>
        %c0_i32_15 = arith.constant 0 : i32
        %19 = arith.addi %c0_i32_15, %7 : i32
        %c3_i32_16 = arith.constant 3 : i32
        %20 = arith.addi %c3_i32_16, %10 : i32
        %21 = arith.index_cast %19 : i32 to index
        %22 = arith.index_cast %20 : i32 to index
        %c0_17 = arith.constant 0 : index
        %c0_18 = arith.constant 0 : index
        %c0_19 = arith.constant 0 : index
        %23 = vector.load %arg5[%21, %22, %c0_17, %c0_18, %c0_19] : memref<14x14x1x8x128xf32, #tpu.memory_space<vmem>>, vector<1x1x1x8x128xf32>
        %24 = vector.shape_cast %23 : vector<1x1x1x8x128xf32> to vector<1x8x128xf32>
        %25 = vector.shape_cast %18 : vector<1x8x128xf32> to vector<1x1x1x8x128xf32>
        tpu.vector_store %arg5[%21, %22, %c0_17, %c0_18, %c0_19], %25 {strides = array<i32>} : memref<14x14x1x8x128xf32, #tpu.memory_space<vmem>>, vector<1x1x1x8x128xf32>,
        %c2_i32_20 = arith.constant 2 : i32
        %26 = tpu.dynamic_rotate %15 by %c2_i32_20 dim 0 : vector<24x128xf32>, i32 -> vector<24x128xf32>
        %27 = vector.extract_strided_slice %26 {offsets = [8, 0], sizes = [8, 128], strides = [1, 1]} : vector<24x128xf32> to vector<8x128xf32>
        %28 = vector.shape_cast %27 : vector<8x128xf32> to vector<1x8x128xf32>
        %c2_i32_21 = arith.constant 2 : i32
        %29 = arith.addi %c2_i32_21, %7 : i32
        %c3_i32_22 = arith.constant 3 : i32
        %30 = arith.addi %c3_i32_22, %10 : i32
        %31 = arith.index_cast %29 : i32 to index
        %32 = arith.index_cast %30 : i32 to index
        %c0_23 = arith.constant 0 : index
        %c0_24 = arith.constant 0 : index
        %c0_25 = arith.constant 0 : index
        %33 = vector.load %arg5[%31, %32, %c0_23, %c0_24, %c0_25] : memref<14x14x1x8x128xf32, #tpu.memory_space<vmem>>, vector<1x1x1x8x128xf32>
        %34 = vector.shape_cast %33 : vector<1x1x1x8x128xf32> to vector<1x8x128xf32>
        %35 = vector.shape_cast %28 : vector<1x8x128xf32> to vector<1x1x1x8x128xf32>
        tpu.vector_store %arg5[%31, %32, %c0_23, %c0_24, %c0_25], %35 {strides = array<i32>} : memref<14x14x1x8x128xf32, #tpu.memory_space<vmem>>, vector<1x1x1x8x128xf32>,
        %c1_i32_26 = arith.constant 1 : i32
        %36 = tpu.dynamic_rotate %15 by %c1_i32_26 dim 0 : vector<24x128xf32>, i32 -> vector<24x128xf32>
        %37 = vector.extract_strided_slice %36 {offsets = [8, 0], sizes = [8, 128], strides = [1, 1]} : vector<24x128xf32> to vector<8x128xf32>
        %38 = vector.shape_cast %37 : vector<8x128xf32> to vector<1x8x128xf32>
        %c4_i32 = arith.constant 4 : i32
        %39 = arith.addi %c4_i32, %7 : i32
        %c3_i32_27 = arith.constant 3 : i32
        %40 = arith.addi %c3_i32_27, %10 : i32
        %41 = arith.index_cast %39 : i32 to index
        %42 = arith.index_cast %40 : i32 to index
        %c0_28 = arith.constant 0 : index
        %c0_29 = arith.constant 0 : index
        %c0_30 = arith.constant 0 : index
        %43 = vector.load %arg5[%41, %42, %c0_28, %c0_29, %c0_30] : memref<14x14x1x8x128xf32, #tpu.memory_space<vmem>>, vector<1x1x1x8x128xf32>
        %44 = vector.shape_cast %43 : vector<1x1x1x8x128xf32> to vector<1x8x128xf32>
        %45 = vector.shape_cast %38 : vector<1x8x128xf32> to vector<1x1x1x8x128xf32>
        tpu.vector_store %arg5[%41, %42, %c0_28, %c0_29, %c0_30], %45 {strides = array<i32>} : memref<14x14x1x8x128xf32, #tpu.memory_space<vmem>>, vector<1x1x1x8x128xf32>,
        %46 = vector.extract_strided_slice %15 {offsets = [8, 0], sizes = [8, 128], strides = [1, 1]} : vector<24x128xf32> to vector<8x128xf32>
        %47 = vector.shape_cast %46 : vector<8x128xf32> to vector<1x8x128xf32>
        %c6_i32 = arith.constant 6 : i32
        %48 = arith.addi %c6_i32, %7 : i32
        %c3_i32_31 = arith.constant 3 : i32
        %49 = arith.addi %c3_i32_31, %10 : i32
        %50 = arith.index_cast %48 : i32 to index
        %51 = arith.index_cast %49 : i32 to index
        %c0_32 = arith.constant 0 : index
        %c0_33 = arith.constant 0 : index
        %c0_34 = arith.constant 0 : index
        %52 = vector.load %arg5[%50, %51, %c0_32, %c0_33, %c0_34] : memref<14x14x1x8x128xf32, #tpu.memory_space<vmem>>, vector<1x1x1x8x128xf32>
        %53 = vector.shape_cast %52 : vector<1x1x1x8x128xf32> to vector<1x8x128xf32>
        %54 = vector.shape_cast %47 : vector<1x8x128xf32> to vector<1x1x1x8x128xf32>
        tpu.vector_store %arg5[%50, %51, %c0_32, %c0_33, %c0_34], %54 {strides = array<i32>} : memref<14x14x1x8x128xf32, #tpu.memory_space<vmem>>, vector<1x1x1x8x128xf32>,
        %c23_i32 = arith.constant 23 : i32
        %55 = tpu.dynamic_rotate %15 by %c23_i32 dim 0 : vector<24x128xf32>, i32 -> vector<24x128xf32>
        %56 = vector.extract_strided_slice %55 {offsets = [8, 0], sizes = [8, 128], strides = [1, 1]} : vector<24x128xf32> to vector<8x128xf32>
        %57 = vector.shape_cast %56 : vector<8x128xf32> to vector<1x8x128xf32>
        %c8_i32_35 = arith.constant 8 : i32
        %58 = arith.addi %c8_i32_35, %7 : i32
        %c3_i32_36 = arith.constant 3 : i32
        %59 = arith.addi %c3_i32_36, %10 : i32
        %60 = arith.index_cast %58 : i32 to index
        %61 = arith.index_cast %59 : i32 to index
        %c0_37 = arith.constant 0 : index
        %c0_38 = arith.constant 0 : index
        %c0_39 = arith.constant 0 : index
        %62 = vector.load %arg5[%60, %61, %c0_37, %c0_38, %c0_39] : memref<14x14x1x8x128xf32, #tpu.memory_space<vmem>>, vector<1x1x1x8x128xf32>
        %63 = vector.shape_cast %62 : vector<1x1x1x8x128xf32> to vector<1x8x128xf32>
        %64 = vector.shape_cast %57 : vector<1x8x128xf32> to vector<1x1x1x8x128xf32>
        tpu.vector_store %arg5[%60, %61, %c0_37, %c0_38, %c0_39], %64 {strides = array<i32>} : memref<14x14x1x8x128xf32, #tpu.memory_space<vmem>>, vector<1x1x1x8x128xf32>,
        %c22_i32 = arith.constant 22 : i32
        %65 = tpu.dynamic_rotate %15 by %c22_i32 dim 0 : vector<24x128xf32>, i32 -> vector<24x128xf32>
        %66 = vector.extract_strided_slice %65 {offsets = [8, 0], sizes = [8, 128], strides = [1, 1]} : vector<24x128xf32> to vector<8x128xf32>
        %67 = vector.shape_cast %66 : vector<8x128xf32> to vector<1x8x128xf32>
        %c10_i32 = arith.constant 10 : i32
        %68 = arith.addi %c10_i32, %7 : i32
        %c3_i32_40 = arith.constant 3 : i32
        %69 = arith.addi %c3_i32_40, %10 : i32
        %70 = arith.index_cast %68 : i32 to index
        %71 = arith.index_cast %69 : i32 to index
        %c0_41 = arith.constant 0 : index
        %c0_42 = arith.constant 0 : index
        %c0_43 = arith.constant 0 : index
        %72 = vector.load %arg5[%70, %71, %c0_41, %c0_42, %c0_43] : memref<14x14x1x8x128xf32, #tpu.memory_space<vmem>>, vector<1x1x1x8x128xf32>
        %73 = vector.shape_cast %72 : vector<1x1x1x8x128xf32> to vector<1x8x128xf32>
        %74 = vector.shape_cast %67 : vector<1x8x128xf32> to vector<1x1x1x8x128xf32>
        tpu.vector_store %arg5[%70, %71, %c0_41, %c0_42, %c0_43], %74 {strides = array<i32>} : memref<14x14x1x8x128xf32, #tpu.memory_space<vmem>>, vector<1x1x1x8x128xf32>,
        %c21_i32 = arith.constant 21 : i32
        %75 = tpu.dynamic_rotate %15 by %c21_i32 dim 0 : vector<24x128xf32>, i32 -> vector<24x128xf32>
        %76 = vector.extract_strided_slice %75 {offsets = [8, 0], sizes = [8, 128], strides = [1, 1]} : vector<24x128xf32> to vector<8x128xf32>
        %77 = vector.shape_cast %76 : vector<8x128xf32> to vector<1x8x128xf32>
        %c12_i32 = arith.constant 12 : i32
        %78 = arith.addi %c12_i32, %7 : i32
        %c3_i32_44 = arith.constant 3 : i32
        %79 = arith.addi %c3_i32_44, %10 : i32
        %80 = arith.index_cast %78 : i32 to index
        %81 = arith.index_cast %79 : i32 to index
        %c0_45 = arith.constant 0 : index
        %c0_46 = arith.constant 0 : index
        %c0_47 = arith.constant 0 : index
        %82 = vector.load %arg5[%80, %81, %c0_45, %c0_46, %c0_47] : memref<14x14x1x8x128xf32, #tpu.memory_space<vmem>>, vector<1x1x1x8x128xf32>
        %83 = vector.shape_cast %82 : vector<1x1x1x8x128xf32> to vector<1x8x128xf32>
        %84 = vector.shape_cast %77 : vector<1x8x128xf32> to vector<1x1x1x8x128xf32>
        tpu.vector_store %arg5[%80, %81, %c0_45, %c0_46, %c0_47], %84 {strides = array<i32>} : memref<14x14x1x8x128xf32, #tpu.memory_space<vmem>>, vector<1x1x1x8x128xf32>,
      }
      %c8_i32_11 = arith.constant 8 : i32
    }
    %c2_i32_2 = arith.constant 2 : i32
    %c0_i32_3 = arith.constant 0 : i32
    %c2_i32_4 = arith.constant 2 : i32
    %5 = arith.addi %c0_i32_3, %c2_i32_4 : i32
    %c1_i32_5 = arith.constant 1 : i32
    scf.for %arg6 = %c0_i32_3 to %5 step %c1_i32_5  : i32 {
      %c1_i32_7 = arith.constant 1 : i32
      %6 = arith.muli %arg6, %c1_i32_7 : i32
      %c0_i32_8 = arith.constant 0 : i32
      %7 = arith.addi %c0_i32_8, %6 : i32
      %8 = arith.index_cast %7 : i32 to index
      %c0 = arith.constant 0 : index
      %c0_9 = arith.constant 0 : index
      %9 = vector.load %arg3[%8, %c0, %c0_9] : memref<2x8x128xf32, #tpu.memory_space<vmem>>, vector<1x8x128xf32>
      %10 = vector.shape_cast %9 : vector<1x8x128xf32> to vector<8x128xf32>
      %11 = vector.shape_cast %10 : vector<8x128xf32> to vector<1x8x128xf32>
      %c0_i32_10 = arith.constant 0 : i32
      %c4_i32 = arith.constant 4 : i32
      %12 = arith.addi %c0_i32_10, %c4_i32 : i32
      %c1_i32_11 = arith.constant 1 : i32
      scf.for %arg7 = %c0_i32_10 to %12 step %c1_i32_11  : i32 {
        %c1_i32_13 = arith.constant 1 : i32
        %13 = arith.muli %arg7, %c1_i32_13 : i32
        %c0_i32_14 = arith.constant 0 : i32
        %14 = arith.addi %c0_i32_14, %13 : i32
        %c2_i32_15 = arith.constant 2 : i32
        %15 = arith.muli %14, %c2_i32_15 : i32
        %cst_16 = arith.constant 0.000000e+00 : f32
        %16 = vector.broadcast %cst_16 : f32 to vector<1x8x128xf32>
        %cst_17 = arith.constant 0.000000e+00 : f32
        %17 = vector.broadcast %cst_17 : f32 to vector<1x8x128xf32>
        %18 = arith.index_cast %7 : i32 to index
        %c0_18 = arith.constant 0 : index
        %c0_19 = arith.constant 0 : index
        %c0_20 = arith.constant 0 : index
        %19 = vector.load %arg2[%18, %c0_18, %c0_19, %c0_20] : memref<2x49x8x128xf32, #tpu.memory_space<vmem>>, vector<1x1x8x128xf32>
        %20 = vector.shape_cast %19 : vector<1x1x8x128xf32> to vector<8x128xf32>
        %c0_i32_21 = arith.constant 0 : i32
        %21 = arith.addi %c0_i32_21, %7 : i32
        %c0_i32_22 = arith.constant 0 : i32
        %22 = arith.addi %15, %c0_i32_22 : i32
        %c0_i32_23 = arith.constant 0 : i32
        %23 = arith.addi %22, %c0_i32_23 : i32
        %24 = arith.index_cast %21 : i32 to index
        %25 = arith.index_cast %23 : i32 to index
        %c0_24 = arith.constant 0 : index
        %c0_25 = arith.constant 0 : index
        %c0_26 = arith.constant 0 : index
        %26 = vector.load %arg5[%24, %25, %c0_24, %c0_25, %c0_26] : memref<14x14x1x8x128xf32, #tpu.memory_space<vmem>>, vector<1x1x1x8x128xf32>
        %27 = vector.shape_cast %26 : vector<1x1x1x8x128xf32> to vector<1x8x128xf32>
        %28 = vector.shape_cast %20 : vector<8x128xf32> to vector<1x8x128xf32>
        %29 = arith.mulf %27, %28 : vector<1x8x128xf32>
        %30 = arith.addf %11, %29 : vector<1x8x128xf32>
        %c0_i32_27 = arith.constant 0 : i32
        %31 = arith.addi %c0_i32_27, %7 : i32
        %c1_i32_28 = arith.constant 1 : i32
        %32 = arith.addi %15, %c1_i32_28 : i32
        %c0_i32_29 = arith.constant 0 : i32
        %33 = arith.addi %32, %c0_i32_29 : i32
        %34 = arith.index_cast %31 : i32 to index
        %35 = arith.index_cast %33 : i32 to index
        %c0_30 = arith.constant 0 : index
        %c0_31 = arith.constant 0 : index
        %c0_32 = arith.constant 0 : index
        %36 = vector.load %arg5[%34, %35, %c0_30, %c0_31, %c0_32] : memref<14x14x1x8x128xf32, #tpu.memory_space<vmem>>, vector<1x1x1x8x128xf32>
        %37 = vector.shape_cast %36 : vector<1x1x1x8x128xf32> to vector<1x8x128xf32>
        %38 = vector.shape_cast %20 : vector<8x128xf32> to vector<1x8x128xf32>
        %39 = arith.mulf %37, %38 : vector<1x8x128xf32>
        %40 = arith.addf %11, %39 : vector<1x8x128xf32>
        %41 = arith.index_cast %7 : i32 to index
        %c1 = arith.constant 1 : index
        %c0_33 = arith.constant 0 : index
        %c0_34 = arith.constant 0 : index
        %42 = vector.load %arg2[%41, %c1, %c0_33, %c0_34] : memref<2x49x8x128xf32, #tpu.memory_space<vmem>>, vector<1x1x8x128xf32>
        %43 = vector.shape_cast %42 : vector<1x1x8x128xf32> to vector<8x128xf32>
        %c2_i32_35 = arith.constant 2 : i32
        %44 = arith.addi %c2_i32_35, %7 : i32
        %c0_i32_36 = arith.constant 0 : i32
        %45 = arith.addi %15, %c0_i32_36 : i32
        %c0_i32_37 = arith.constant 0 : i32
        %46 = arith.addi %45, %c0_i32_37 : i32
        %47 = arith.index_cast %44 : i32 to index
        %48 = arith.index_cast %46 : i32 to index
        %c0_38 = arith.constant 0 : index
        %c0_39 = arith.constant 0 : index
        %c0_40 = arith.constant 0 : index
        %49 = vector.load %arg5[%47, %48, %c0_38, %c0_39, %c0_40] : memref<14x14x1x8x128xf32, #tpu.memory_space<vmem>>, vector<1x1x1x8x128xf32>
        %50 = vector.shape_cast %49 : vector<1x1x1x8x128xf32> to vector<1x8x128xf32>
        %51 = vector.shape_cast %43 : vector<8x128xf32> to vector<1x8x128xf32>
        %52 = arith.mulf %50, %51 : vector<1x8x128xf32>
        %53 = arith.addf %16, %52 : vector<1x8x128xf32>
        %c2_i32_41 = arith.constant 2 : i32
        %54 = arith.addi %c2_i32_41, %7 : i32
        %c1_i32_42 = arith.constant 1 : i32
        %55 = arith.addi %15, %c1_i32_42 : i32
        %c0_i32_43 = arith.constant 0 : i32
        %56 = arith.addi %55, %c0_i32_43 : i32
        %57 = arith.index_cast %54 : i32 to index
        %58 = arith.index_cast %56 : i32 to index
        %c0_44 = arith.constant 0 : index
        %c0_45 = arith.constant 0 : index
        %c0_46 = arith.constant 0 : index
        %59 = vector.load %arg5[%57, %58, %c0_44, %c0_45, %c0_46] : memref<14x14x1x8x128xf32, #tpu.memory_space<vmem>>, vector<1x1x1x8x128xf32>
        %60 = vector.shape_cast %59 : vector<1x1x1x8x128xf32> to vector<1x8x128xf32>
        %61 = vector.shape_cast %43 : vector<8x128xf32> to vector<1x8x128xf32>
        %62 = arith.mulf %60, %61 : vector<1x8x128xf32>
        %63 = arith.addf %17, %62 : vector<1x8x128xf32>
        %64 = arith.index_cast %7 : i32 to index
        %c2 = arith.constant 2 : index
        %c0_47 = arith.constant 0 : index
        %c0_48 = arith.constant 0 : index
        %65 = vector.load %arg2[%64, %c2, %c0_47, %c0_48] : memref<2x49x8x128xf32, #tpu.memory_space<vmem>>, vector<1x1x8x128xf32>
        %66 = vector.shape_cast %65 : vector<1x1x8x128xf32> to vector<8x128xf32>
        %c4_i32_49 = arith.constant 4 : i32
        %67 = arith.addi %c4_i32_49, %7 : i32
        %c0_i32_50 = arith.constant 0 : i32
        %68 = arith.addi %15, %c0_i32_50 : i32
        %c0_i32_51 = arith.constant 0 : i32
        %69 = arith.addi %68, %c0_i32_51 : i32
        %70 = arith.index_cast %67 : i32 to index
        %71 = arith.index_cast %69 : i32 to index
        %c0_52 = arith.constant 0 : index
        %c0_53 = arith.constant 0 : index
        %c0_54 = arith.constant 0 : index
        %72 = vector.load %arg5[%70, %71, %c0_52, %c0_53, %c0_54] : memref<14x14x1x8x128xf32, #tpu.memory_space<vmem>>, vector<1x1x1x8x128xf32>
        %73 = vector.shape_cast %72 : vector<1x1x1x8x128xf32> to vector<1x8x128xf32>
        %74 = vector.shape_cast %66 : vector<8x128xf32> to vector<1x8x128xf32>
        %75 = arith.mulf %73, %74 : vector<1x8x128xf32>
        %76 = arith.addf %30, %75 : vector<1x8x128xf32>
        %c4_i32_55 = arith.constant 4 : i32
        %77 = arith.addi %c4_i32_55, %7 : i32
        %c1_i32_56 = arith.constant 1 : i32
        %78 = arith.addi %15, %c1_i32_56 : i32
        %c0_i32_57 = arith.constant 0 : i32
        %79 = arith.addi %78, %c0_i32_57 : i32
        %80 = arith.index_cast %77 : i32 to index
        %81 = arith.index_cast %79 : i32 to index
        %c0_58 = arith.constant 0 : index
        %c0_59 = arith.constant 0 : index
        %c0_60 = arith.constant 0 : index
        %82 = vector.load %arg5[%80, %81, %c0_58, %c0_59, %c0_60] : memref<14x14x1x8x128xf32, #tpu.memory_space<vmem>>, vector<1x1x1x8x128xf32>
        %83 = vector.shape_cast %82 : vector<1x1x1x8x128xf32> to vector<1x8x128xf32>
        %84 = vector.shape_cast %66 : vector<8x128xf32> to vector<1x8x128xf32>
        %85 = arith.mulf %83, %84 : vector<1x8x128xf32>
        %86 = arith.addf %40, %85 : vector<1x8x128xf32>
        %87 = arith.index_cast %7 : i32 to index
        %c3 = arith.constant 3 : index
        %c0_61 = arith.constant 0 : index
        %c0_62 = arith.constant 0 : index
        %88 = vector.load %arg2[%87, %c3, %c0_61, %c0_62] : memref<2x49x8x128xf32, #tpu.memory_space<vmem>>, vector<1x1x8x128xf32>
        %89 = vector.shape_cast %88 : vector<1x1x8x128xf32> to vector<8x128xf32>
        %c6_i32 = arith.constant 6 : i32
        %90 = arith.addi %c6_i32, %7 : i32
        %c0_i32_63 = arith.constant 0 : i32
        %91 = arith.addi %15, %c0_i32_63 : i32
        %c0_i32_64 = arith.constant 0 : i32
        %92 = arith.addi %91, %c0_i32_64 : i32
        %93 = arith.index_cast %90 : i32 to index
        %94 = arith.index_cast %92 : i32 to index
        %c0_65 = arith.constant 0 : index
        %c0_66 = arith.constant 0 : index
        %c0_67 = arith.constant 0 : index
        %95 = vector.load %arg5[%93, %94, %c0_65, %c0_66, %c0_67] : memref<14x14x1x8x128xf32, #tpu.memory_space<vmem>>, vector<1x1x1x8x128xf32>
        %96 = vector.shape_cast %95 : vector<1x1x1x8x128xf32> to vector<1x8x128xf32>
        %97 = vector.shape_cast %89 : vector<8x128xf32> to vector<1x8x128xf32>
        %98 = arith.mulf %96, %97 : vector<1x8x128xf32>
        %99 = arith.addf %53, %98 : vector<1x8x128xf32>
        %c6_i32_68 = arith.constant 6 : i32
        %100 = arith.addi %c6_i32_68, %7 : i32
        %c1_i32_69 = arith.constant 1 : i32
        %101 = arith.addi %15, %c1_i32_69 : i32
        %c0_i32_70 = arith.constant 0 : i32
        %102 = arith.addi %101, %c0_i32_70 : i32
        %103 = arith.index_cast %100 : i32 to index
        %104 = arith.index_cast %102 : i32 to index
        %c0_71 = arith.constant 0 : index
        %c0_72 = arith.constant 0 : index
        %c0_73 = arith.constant 0 : index
        %105 = vector.load %arg5[%103, %104, %c0_71, %c0_72, %c0_73] : memref<14x14x1x8x128xf32, #tpu.memory_space<vmem>>, vector<1x1x1x8x128xf32>
        %106 = vector.shape_cast %105 : vector<1x1x1x8x128xf32> to vector<1x8x128xf32>
        %107 = vector.shape_cast %89 : vector<8x128xf32> to vector<1x8x128xf32>
        %108 = arith.mulf %106, %107 : vector<1x8x128xf32>
        %109 = arith.addf %63, %108 : vector<1x8x128xf32>
        %110 = arith.index_cast %7 : i32 to index
        %c4 = arith.constant 4 : index
        %c0_74 = arith.constant 0 : index
        %c0_75 = arith.constant 0 : index
        %111 = vector.load %arg2[%110, %c4, %c0_74, %c0_75] : memref<2x49x8x128xf32, #tpu.memory_space<vmem>>, vector<1x1x8x128xf32>
        %112 = vector.shape_cast %111 : vector<1x1x8x128xf32> to vector<8x128xf32>
        %c8_i32 = arith.constant 8 : i32
        %113 = arith.addi %c8_i32, %7 : i32
        %c0_i32_76 = arith.constant 0 : i32
        %114 = arith.addi %15, %c0_i32_76 : i32
        %c0_i32_77 = arith.constant 0 : i32
        %115 = arith.addi %114, %c0_i32_77 : i32
        %116 = arith.index_cast %113 : i32 to index
        %117 = arith.index_cast %115 : i32 to index
        %c0_78 = arith.constant 0 : index
        %c0_79 = arith.constant 0 : index
        %c0_80 = arith.constant 0 : index
        %118 = vector.load %arg5[%116, %117, %c0_78, %c0_79, %c0_80] : memref<14x14x1x8x128xf32, #tpu.memory_space<vmem>>, vector<1x1x1x8x128xf32>
        %119 = vector.shape_cast %118 : vector<1x1x1x8x128xf32> to vector<1x8x128xf32>
        %120 = vector.shape_cast %112 : vector<8x128xf32> to vector<1x8x128xf32>
        %121 = arith.mulf %119, %120 : vector<1x8x128xf32>
        %122 = arith.addf %76, %121 : vector<1x8x128xf32>
        %c8_i32_81 = arith.constant 8 : i32
        %123 = arith.addi %c8_i32_81, %7 : i32
        %c1_i32_82 = arith.constant 1 : i32
        %124 = arith.addi %15, %c1_i32_82 : i32
        %c0_i32_83 = arith.constant 0 : i32
        %125 = arith.addi %124, %c0_i32_83 : i32
        %126 = arith.index_cast %123 : i32 to index
        %127 = arith.index_cast %125 : i32 to index
        %c0_84 = arith.constant 0 : index
        %c0_85 = arith.constant 0 : index
        %c0_86 = arith.constant 0 : index
        %128 = vector.load %arg5[%126, %127, %c0_84, %c0_85, %c0_86] : memref<14x14x1x8x128xf32, #tpu.memory_space<vmem>>, vector<1x1x1x8x128xf32>
        %129 = vector.shape_cast %128 : vector<1x1x1x8x128xf32> to vector<1x8x128xf32>
        %130 = vector.shape_cast %112 : vector<8x128xf32> to vector<1x8x128xf32>
        %131 = arith.mulf %129, %130 : vector<1x8x128xf32>
        %132 = arith.addf %86, %131 : vector<1x8x128xf32>
        %133 = arith.index_cast %7 : i32 to index
        %c5 = arith.constant 5 : index
        %c0_87 = arith.constant 0 : index
        %c0_88 = arith.constant 0 : index
        %134 = vector.load %arg2[%133, %c5, %c0_87, %c0_88] : memref<2x49x8x128xf32, #tpu.memory_space<vmem>>, vector<1x1x8x128xf32>
        %135 = vector.shape_cast %134 : vector<1x1x8x128xf32> to vector<8x128xf32>
        %c10_i32 = arith.constant 10 : i32
        %136 = arith.addi %c10_i32, %7 : i32
        %c0_i32_89 = arith.constant 0 : i32
        %137 = arith.addi %15, %c0_i32_89 : i32
        %c0_i32_90 = arith.constant 0 : i32
        %138 = arith.addi %137, %c0_i32_90 : i32
        %139 = arith.index_cast %136 : i32 to index
        %140 = arith.index_cast %138 : i32 to index
        %c0_91 = arith.constant 0 : index
        %c0_92 = arith.constant 0 : index
        %c0_93 = arith.constant 0 : index
        %141 = vector.load %arg5[%139, %140, %c0_91, %c0_92, %c0_93] : memref<14x14x1x8x128xf32, #tpu.memory_space<vmem>>, vector<1x1x1x8x128xf32>
        %142 = vector.shape_cast %141 : vector<1x1x1x8x128xf32> to vector<1x8x128xf32>
        %143 = vector.shape_cast %135 : vector<8x128xf32> to vector<1x8x128xf32>
        %144 = arith.mulf %142, %143 : vector<1x8x128xf32>
        %145 = arith.addf %99, %144 : vector<1x8x128xf32>
        %c10_i32_94 = arith.constant 10 : i32
        %146 = arith.addi %c10_i32_94, %7 : i32
        %c1_i32_95 = arith.constant 1 : i32
        %147 = arith.addi %15, %c1_i32_95 : i32
        %c0_i32_96 = arith.constant 0 : i32
        %148 = arith.addi %147, %c0_i32_96 : i32
        %149 = arith.index_cast %146 : i32 to index
        %150 = arith.index_cast %148 : i32 to index
        %c0_97 = arith.constant 0 : index
        %c0_98 = arith.constant 0 : index
        %c0_99 = arith.constant 0 : index
        %151 = vector.load %arg5[%149, %150, %c0_97, %c0_98, %c0_99] : memref<14x14x1x8x128xf32, #tpu.memory_space<vmem>>, vector<1x1x1x8x128xf32>
        %152 = vector.shape_cast %151 : vector<1x1x1x8x128xf32> to vector<1x8x128xf32>
        %153 = vector.shape_cast %135 : vector<8x128xf32> to vector<1x8x128xf32>
        %154 = arith.mulf %152, %153 : vector<1x8x128xf32>
        %155 = arith.addf %109, %154 : vector<1x8x128xf32>
        %156 = arith.index_cast %7 : i32 to index
        %c6 = arith.constant 6 : index
        %c0_100 = arith.constant 0 : index
        %c0_101 = arith.constant 0 : index
        %157 = vector.load %arg2[%156, %c6, %c0_100, %c0_101] : memref<2x49x8x128xf32, #tpu.memory_space<vmem>>, vector<1x1x8x128xf32>
        %158 = vector.shape_cast %157 : vector<1x1x8x128xf32> to vector<8x128xf32>
        %c12_i32 = arith.constant 12 : i32
        %159 = arith.addi %c12_i32, %7 : i32
        %c0_i32_102 = arith.constant 0 : i32
        %160 = arith.addi %15, %c0_i32_102 : i32
        %c0_i32_103 = arith.constant 0 : i32
        %161 = arith.addi %160, %c0_i32_103 : i32
        %162 = arith.index_cast %159 : i32 to index
        %163 = arith.index_cast %161 : i32 to index
        %c0_104 = arith.constant 0 : index
        %c0_105 = arith.constant 0 : index
        %c0_106 = arith.constant 0 : index
        %164 = vector.load %arg5[%162, %163, %c0_104, %c0_105, %c0_106] : memref<14x14x1x8x128xf32, #tpu.memory_space<vmem>>, vector<1x1x1x8x128xf32>
        %165 = vector.shape_cast %164 : vector<1x1x1x8x128xf32> to vector<1x8x128xf32>
        %166 = vector.shape_cast %158 : vector<8x128xf32> to vector<1x8x128xf32>
        %167 = arith.mulf %165, %166 : vector<1x8x128xf32>
        %168 = arith.addf %122, %167 : vector<1x8x128xf32>
        %c12_i32_107 = arith.constant 12 : i32
        %169 = arith.addi %c12_i32_107, %7 : i32
        %c1_i32_108 = arith.constant 1 : i32
        %170 = arith.addi %15, %c1_i32_108 : i32
        %c0_i32_109 = arith.constant 0 : i32
        %171 = arith.addi %170, %c0_i32_109 : i32
        %172 = arith.index_cast %169 : i32 to index
        %173 = arith.index_cast %171 : i32 to index
        %c0_110 = arith.constant 0 : index
        %c0_111 = arith.constant 0 : index
        %c0_112 = arith.constant 0 : index
        %174 = vector.load %arg5[%172, %173, %c0_110, %c0_111, %c0_112] : memref<14x14x1x8x128xf32, #tpu.memory_space<vmem>>, vector<1x1x1x8x128xf32>
        %175 = vector.shape_cast %174 : vector<1x1x1x8x128xf32> to vector<1x8x128xf32>
        %176 = vector.shape_cast %158 : vector<8x128xf32> to vector<1x8x128xf32>
        %177 = arith.mulf %175, %176 : vector<1x8x128xf32>
        %178 = arith.addf %132, %177 : vector<1x8x128xf32>
        %179 = arith.index_cast %7 : i32 to index
        %c7 = arith.constant 7 : index
        %c0_113 = arith.constant 0 : index
        %c0_114 = arith.constant 0 : index
        %180 = vector.load %arg2[%179, %c7, %c0_113, %c0_114] : memref<2x49x8x128xf32, #tpu.memory_space<vmem>>, vector<1x1x8x128xf32>
        %181 = vector.shape_cast %180 : vector<1x1x8x128xf32> to vector<8x128xf32>
        %c0_i32_115 = arith.constant 0 : i32
        %182 = arith.addi %c0_i32_115, %7 : i32
        %c0_i32_116 = arith.constant 0 : i32
        %183 = arith.addi %15, %c0_i32_116 : i32
        %c1_i32_117 = arith.constant 1 : i32
        %184 = arith.addi %183, %c1_i32_117 : i32
        %185 = arith.index_cast %182 : i32 to index
        %186 = arith.index_cast %184 : i32 to index
        %c0_118 = arith.constant 0 : index
        %c0_119 = arith.constant 0 : index
        %c0_120 = arith.constant 0 : index
        %187 = vector.load %arg5[%185, %186, %c0_118, %c0_119, %c0_120] : memref<14x14x1x8x128xf32, #tpu.memory_space<vmem>>, vector<1x1x1x8x128xf32>
        %188 = vector.shape_cast %187 : vector<1x1x1x8x128xf32> to vector<1x8x128xf32>
        %189 = vector.shape_cast %181 : vector<8x128xf32> to vector<1x8x128xf32>
        %190 = arith.mulf %188, %189 : vector<1x8x128xf32>
        %191 = arith.addf %168, %190 : vector<1x8x128xf32>
        %c0_i32_121 = arith.constant 0 : i32
        %192 = arith.addi %c0_i32_121, %7 : i32
        %c1_i32_122 = arith.constant 1 : i32
        %193 = arith.addi %15, %c1_i32_122 : i32
        %c1_i32_123 = arith.constant 1 : i32
        %194 = arith.addi %193, %c1_i32_123 : i32
        %195 = arith.index_cast %192 : i32 to index
        %196 = arith.index_cast %194 : i32 to index
        %c0_124 = arith.constant 0 : index
        %c0_125 = arith.constant 0 : index
        %c0_126 = arith.constant 0 : index
        %197 = vector.load %arg5[%195, %196, %c0_124, %c0_125, %c0_126] : memref<14x14x1x8x128xf32, #tpu.memory_space<vmem>>, vector<1x1x1x8x128xf32>
        %198 = vector.shape_cast %197 : vector<1x1x1x8x128xf32> to vector<1x8x128xf32>
        %199 = vector.shape_cast %181 : vector<8x128xf32> to vector<1x8x128xf32>
        %200 = arith.mulf %198, %199 : vector<1x8x128xf32>
        %201 = arith.addf %178, %200 : vector<1x8x128xf32>
        %202 = arith.index_cast %7 : i32 to index
        %c8 = arith.constant 8 : index
        %c0_127 = arith.constant 0 : index
        %c0_128 = arith.constant 0 : index
        %203 = vector.load %arg2[%202, %c8, %c0_127, %c0_128] : memref<2x49x8x128xf32, #tpu.memory_space<vmem>>, vector<1x1x8x128xf32>
        %204 = vector.shape_cast %203 : vector<1x1x8x128xf32> to vector<8x128xf32>
        %c2_i32_129 = arith.constant 2 : i32
        %205 = arith.addi %c2_i32_129, %7 : i32
        %c0_i32_130 = arith.constant 0 : i32
        %206 = arith.addi %15, %c0_i32_130 : i32
        %c1_i32_131 = arith.constant 1 : i32
        %207 = arith.addi %206, %c1_i32_131 : i32
        %208 = arith.index_cast %205 : i32 to index
        %209 = arith.index_cast %207 : i32 to index
        %c0_132 = arith.constant 0 : index
        %c0_133 = arith.constant 0 : index
        %c0_134 = arith.constant 0 : index
        %210 = vector.load %arg5[%208, %209, %c0_132, %c0_133, %c0_134] : memref<14x14x1x8x128xf32, #tpu.memory_space<vmem>>, vector<1x1x1x8x128xf32>
        %211 = vector.shape_cast %210 : vector<1x1x1x8x128xf32> to vector<1x8x128xf32>
        %212 = vector.shape_cast %204 : vector<8x128xf32> to vector<1x8x128xf32>
        %213 = arith.mulf %211, %212 : vector<1x8x128xf32>
        %214 = arith.addf %145, %213 : vector<1x8x128xf32>
        %c2_i32_135 = arith.constant 2 : i32
        %215 = arith.addi %c2_i32_135, %7 : i32
        %c1_i32_136 = arith.constant 1 : i32
        %216 = arith.addi %15, %c1_i32_136 : i32
        %c1_i32_137 = arith.constant 1 : i32
        %217 = arith.addi %216, %c1_i32_137 : i32
        %218 = arith.index_cast %215 : i32 to index
        %219 = arith.index_cast %217 : i32 to index
        %c0_138 = arith.constant 0 : index
        %c0_139 = arith.constant 0 : index
        %c0_140 = arith.constant 0 : index
        %220 = vector.load %arg5[%218, %219, %c0_138, %c0_139, %c0_140] : memref<14x14x1x8x128xf32, #tpu.memory_space<vmem>>, vector<1x1x1x8x128xf32>
        %221 = vector.shape_cast %220 : vector<1x1x1x8x128xf32> to vector<1x8x128xf32>
        %222 = vector.shape_cast %204 : vector<8x128xf32> to vector<1x8x128xf32>
        %223 = arith.mulf %221, %222 : vector<1x8x128xf32>
        %224 = arith.addf %155, %223 : vector<1x8x128xf32>
        %225 = arith.index_cast %7 : i32 to index
        %c9 = arith.constant 9 : index
        %c0_141 = arith.constant 0 : index
        %c0_142 = arith.constant 0 : index
        %226 = vector.load %arg2[%225, %c9, %c0_141, %c0_142] : memref<2x49x8x128xf32, #tpu.memory_space<vmem>>, vector<1x1x8x128xf32>
        %227 = vector.shape_cast %226 : vector<1x1x8x128xf32> to vector<8x128xf32>
        %c4_i32_143 = arith.constant 4 : i32
        %228 = arith.addi %c4_i32_143, %7 : i32
        %c0_i32_144 = arith.constant 0 : i32
        %229 = arith.addi %15, %c0_i32_144 : i32
        %c1_i32_145 = arith.constant 1 : i32
        %230 = arith.addi %229, %c1_i32_145 : i32
        %231 = arith.index_cast %228 : i32 to index
        %232 = arith.index_cast %230 : i32 to index
        %c0_146 = arith.constant 0 : index
        %c0_147 = arith.constant 0 : index
        %c0_148 = arith.constant 0 : index
        %233 = vector.load %arg5[%231, %232, %c0_146, %c0_147, %c0_148] : memref<14x14x1x8x128xf32, #tpu.memory_space<vmem>>, vector<1x1x1x8x128xf32>
        %234 = vector.shape_cast %233 : vector<1x1x1x8x128xf32> to vector<1x8x128xf32>
        %235 = vector.shape_cast %227 : vector<8x128xf32> to vector<1x8x128xf32>
        %236 = arith.mulf %234, %235 : vector<1x8x128xf32>
        %237 = arith.addf %191, %236 : vector<1x8x128xf32>
        %c4_i32_149 = arith.constant 4 : i32
        %238 = arith.addi %c4_i32_149, %7 : i32
        %c1_i32_150 = arith.constant 1 : i32
        %239 = arith.addi %15, %c1_i32_150 : i32
        %c1_i32_151 = arith.constant 1 : i32
        %240 = arith.addi %239, %c1_i32_151 : i32
        %241 = arith.index_cast %238 : i32 to index
        %242 = arith.index_cast %240 : i32 to index
        %c0_152 = arith.constant 0 : index
        %c0_153 = arith.constant 0 : index
        %c0_154 = arith.constant 0 : index
        %243 = vector.load %arg5[%241, %242, %c0_152, %c0_153, %c0_154] : memref<14x14x1x8x128xf32, #tpu.memory_space<vmem>>, vector<1x1x1x8x128xf32>
        %244 = vector.shape_cast %243 : vector<1x1x1x8x128xf32> to vector<1x8x128xf32>
        %245 = vector.shape_cast %227 : vector<8x128xf32> to vector<1x8x128xf32>
        %246 = arith.mulf %244, %245 : vector<1x8x128xf32>
        %247 = arith.addf %201, %246 : vector<1x8x128xf32>
        %248 = arith.index_cast %7 : i32 to index
        %c10 = arith.constant 10 : index
        %c0_155 = arith.constant 0 : index
        %c0_156 = arith.constant 0 : index
        %249 = vector.load %arg2[%248, %c10, %c0_155, %c0_156] : memref<2x49x8x128xf32, #tpu.memory_space<vmem>>, vector<1x1x8x128xf32>
        %250 = vector.shape_cast %249 : vector<1x1x8x128xf32> to vector<8x128xf32>
        %c6_i32_157 = arith.constant 6 : i32
        %251 = arith.addi %c6_i32_157, %7 : i32
        %c0_i32_158 = arith.constant 0 : i32
        %252 = arith.addi %15, %c0_i32_158 : i32
        %c1_i32_159 = arith.constant 1 : i32
        %253 = arith.addi %252, %c1_i32_159 : i32
        %254 = arith.index_cast %251 : i32 to index
        %255 = arith.index_cast %253 : i32 to index
        %c0_160 = arith.constant 0 : index
        %c0_161 = arith.constant 0 : index
        %c0_162 = arith.constant 0 : index
        %256 = vector.load %arg5[%254, %255, %c0_160, %c0_161, %c0_162] : memref<14x14x1x8x128xf32, #tpu.memory_space<vmem>>, vector<1x1x1x8x128xf32>
        %257 = vector.shape_cast %256 : vector<1x1x1x8x128xf32> to vector<1x8x128xf32>
        %258 = vector.shape_cast %250 : vector<8x128xf32> to vector<1x8x128xf32>
        %259 = arith.mulf %257, %258 : vector<1x8x128xf32>
        %260 = arith.addf %214, %259 : vector<1x8x128xf32>
        %c6_i32_163 = arith.constant 6 : i32
        %261 = arith.addi %c6_i32_163, %7 : i32
        %c1_i32_164 = arith.constant 1 : i32
        %262 = arith.addi %15, %c1_i32_164 : i32
        %c1_i32_165 = arith.constant 1 : i32
        %263 = arith.addi %262, %c1_i32_165 : i32
        %264 = arith.index_cast %261 : i32 to index
        %265 = arith.index_cast %263 : i32 to index
        %c0_166 = arith.constant 0 : index
        %c0_167 = arith.constant 0 : index
        %c0_168 = arith.constant 0 : index
        %266 = vector.load %arg5[%264, %265, %c0_166, %c0_167, %c0_168] : memref<14x14x1x8x128xf32, #tpu.memory_space<vmem>>, vector<1x1x1x8x128xf32>
        %267 = vector.shape_cast %266 : vector<1x1x1x8x128xf32> to vector<1x8x128xf32>
        %268 = vector.shape_cast %250 : vector<8x128xf32> to vector<1x8x128xf32>
        %269 = arith.mulf %267, %268 : vector<1x8x128xf32>
        %270 = arith.addf %224, %269 : vector<1x8x128xf32>
        %271 = arith.index_cast %7 : i32 to index
        %c11 = arith.constant 11 : index
        %c0_169 = arith.constant 0 : index
        %c0_170 = arith.constant 0 : index
        %272 = vector.load %arg2[%271, %c11, %c0_169, %c0_170] : memref<2x49x8x128xf32, #tpu.memory_space<vmem>>, vector<1x1x8x128xf32>
        %273 = vector.shape_cast %272 : vector<1x1x8x128xf32> to vector<8x128xf32>
        %c8_i32_171 = arith.constant 8 : i32
        %274 = arith.addi %c8_i32_171, %7 : i32
        %c0_i32_172 = arith.constant 0 : i32
        %275 = arith.addi %15, %c0_i32_172 : i32
        %c1_i32_173 = arith.constant 1 : i32
        %276 = arith.addi %275, %c1_i32_173 : i32
        %277 = arith.index_cast %274 : i32 to index
        %278 = arith.index_cast %276 : i32 to index
        %c0_174 = arith.constant 0 : index
        %c0_175 = arith.constant 0 : index
        %c0_176 = arith.constant 0 : index
        %279 = vector.load %arg5[%277, %278, %c0_174, %c0_175, %c0_176] : memref<14x14x1x8x128xf32, #tpu.memory_space<vmem>>, vector<1x1x1x8x128xf32>
        %280 = vector.shape_cast %279 : vector<1x1x1x8x128xf32> to vector<1x8x128xf32>
        %281 = vector.shape_cast %273 : vector<8x128xf32> to vector<1x8x128xf32>
        %282 = arith.mulf %280, %281 : vector<1x8x128xf32>
        %283 = arith.addf %237, %282 : vector<1x8x128xf32>
        %c8_i32_177 = arith.constant 8 : i32
        %284 = arith.addi %c8_i32_177, %7 : i32
        %c1_i32_178 = arith.constant 1 : i32
        %285 = arith.addi %15, %c1_i32_178 : i32
        %c1_i32_179 = arith.constant 1 : i32
        %286 = arith.addi %285, %c1_i32_179 : i32
        %287 = arith.index_cast %284 : i32 to index
        %288 = arith.index_cast %286 : i32 to index
        %c0_180 = arith.constant 0 : index
        %c0_181 = arith.constant 0 : index
        %c0_182 = arith.constant 0 : index
        %289 = vector.load %arg5[%287, %288, %c0_180, %c0_181, %c0_182] : memref<14x14x1x8x128xf32, #tpu.memory_space<vmem>>, vector<1x1x1x8x128xf32>
        %290 = vector.shape_cast %289 : vector<1x1x1x8x128xf32> to vector<1x8x128xf32>
        %291 = vector.shape_cast %273 : vector<8x128xf32> to vector<1x8x128xf32>
        %292 = arith.mulf %290, %291 : vector<1x8x128xf32>
        %293 = arith.addf %247, %292 : vector<1x8x128xf32>
        %294 = arith.index_cast %7 : i32 to index
        %c12 = arith.constant 12 : index
        %c0_183 = arith.constant 0 : index
        %c0_184 = arith.constant 0 : index
        %295 = vector.load %arg2[%294, %c12, %c0_183, %c0_184] : memref<2x49x8x128xf32, #tpu.memory_space<vmem>>, vector<1x1x8x128xf32>
        %296 = vector.shape_cast %295 : vector<1x1x8x128xf32> to vector<8x128xf32>
        %c10_i32_185 = arith.constant 10 : i32
        %297 = arith.addi %c10_i32_185, %7 : i32
        %c0_i32_186 = arith.constant 0 : i32
        %298 = arith.addi %15, %c0_i32_186 : i32
        %c1_i32_187 = arith.constant 1 : i32
        %299 = arith.addi %298, %c1_i32_187 : i32
        %300 = arith.index_cast %297 : i32 to index
        %301 = arith.index_cast %299 : i32 to index
        %c0_188 = arith.constant 0 : index
        %c0_189 = arith.constant 0 : index
        %c0_190 = arith.constant 0 : index
        %302 = vector.load %arg5[%300, %301, %c0_188, %c0_189, %c0_190] : memref<14x14x1x8x128xf32, #tpu.memory_space<vmem>>, vector<1x1x1x8x128xf32>
        %303 = vector.shape_cast %302 : vector<1x1x1x8x128xf32> to vector<1x8x128xf32>
        %304 = vector.shape_cast %296 : vector<8x128xf32> to vector<1x8x128xf32>
        %305 = arith.mulf %303, %304 : vector<1x8x128xf32>
        %306 = arith.addf %260, %305 : vector<1x8x128xf32>
        %c10_i32_191 = arith.constant 10 : i32
        %307 = arith.addi %c10_i32_191, %7 : i32
        %c1_i32_192 = arith.constant 1 : i32
        %308 = arith.addi %15, %c1_i32_192 : i32
        %c1_i32_193 = arith.constant 1 : i32
        %309 = arith.addi %308, %c1_i32_193 : i32
        %310 = arith.index_cast %307 : i32 to index
        %311 = arith.index_cast %309 : i32 to index
        %c0_194 = arith.constant 0 : index
        %c0_195 = arith.constant 0 : index
        %c0_196 = arith.constant 0 : index
        %312 = vector.load %arg5[%310, %311, %c0_194, %c0_195, %c0_196] : memref<14x14x1x8x128xf32, #tpu.memory_space<vmem>>, vector<1x1x1x8x128xf32>
        %313 = vector.shape_cast %312 : vector<1x1x1x8x128xf32> to vector<1x8x128xf32>
        %314 = vector.shape_cast %296 : vector<8x128xf32> to vector<1x8x128xf32>
        %315 = arith.mulf %313, %314 : vector<1x8x128xf32>
        %316 = arith.addf %270, %315 : vector<1x8x128xf32>
        %317 = arith.index_cast %7 : i32 to index
        %c13 = arith.constant 13 : index
        %c0_197 = arith.constant 0 : index
        %c0_198 = arith.constant 0 : index
        %318 = vector.load %arg2[%317, %c13, %c0_197, %c0_198] : memref<2x49x8x128xf32, #tpu.memory_space<vmem>>, vector<1x1x8x128xf32>
        %319 = vector.shape_cast %318 : vector<1x1x8x128xf32> to vector<8x128xf32>
        %c12_i32_199 = arith.constant 12 : i32
        %320 = arith.addi %c12_i32_199, %7 : i32
        %c0_i32_200 = arith.constant 0 : i32
        %321 = arith.addi %15, %c0_i32_200 : i32
        %c1_i32_201 = arith.constant 1 : i32
        %322 = arith.addi %321, %c1_i32_201 : i32
        %323 = arith.index_cast %320 : i32 to index
        %324 = arith.index_cast %322 : i32 to index
        %c0_202 = arith.constant 0 : index
        %c0_203 = arith.constant 0 : index
        %c0_204 = arith.constant 0 : index
        %325 = vector.load %arg5[%323, %324, %c0_202, %c0_203, %c0_204] : memref<14x14x1x8x128xf32, #tpu.memory_space<vmem>>, vector<1x1x1x8x128xf32>
        %326 = vector.shape_cast %325 : vector<1x1x1x8x128xf32> to vector<1x8x128xf32>
        %327 = vector.shape_cast %319 : vector<8x128xf32> to vector<1x8x128xf32>
        %328 = arith.mulf %326, %327 : vector<1x8x128xf32>
        %329 = arith.addf %283, %328 : vector<1x8x128xf32>
        %c12_i32_205 = arith.constant 12 : i32
        %330 = arith.addi %c12_i32_205, %7 : i32
        %c1_i32_206 = arith.constant 1 : i32
        %331 = arith.addi %15, %c1_i32_206 : i32
        %c1_i32_207 = arith.constant 1 : i32
        %332 = arith.addi %331, %c1_i32_207 : i32
        %333 = arith.index_cast %330 : i32 to index
        %334 = arith.index_cast %332 : i32 to index
        %c0_208 = arith.constant 0 : index
        %c0_209 = arith.constant 0 : index
        %c0_210 = arith.constant 0 : index
        %335 = vector.load %arg5[%333, %334, %c0_208, %c0_209, %c0_210] : memref<14x14x1x8x128xf32, #tpu.memory_space<vmem>>, vector<1x1x1x8x128xf32>
        %336 = vector.shape_cast %335 : vector<1x1x1x8x128xf32> to vector<1x8x128xf32>
        %337 = vector.shape_cast %319 : vector<8x128xf32> to vector<1x8x128xf32>
        %338 = arith.mulf %336, %337 : vector<1x8x128xf32>
        %339 = arith.addf %293, %338 : vector<1x8x128xf32>
        %340 = arith.index_cast %7 : i32 to index
        %c14 = arith.constant 14 : index
        %c0_211 = arith.constant 0 : index
        %c0_212 = arith.constant 0 : index
        %341 = vector.load %arg2[%340, %c14, %c0_211, %c0_212] : memref<2x49x8x128xf32, #tpu.memory_space<vmem>>, vector<1x1x8x128xf32>
        %342 = vector.shape_cast %341 : vector<1x1x8x128xf32> to vector<8x128xf32>
        %c0_i32_213 = arith.constant 0 : i32
        %343 = arith.addi %c0_i32_213, %7 : i32
        %c0_i32_214 = arith.constant 0 : i32
        %344 = arith.addi %15, %c0_i32_214 : i32
        %c2_i32_215 = arith.constant 2 : i32
        %345 = arith.addi %344, %c2_i32_215 : i32
        %346 = arith.index_cast %343 : i32 to index
        %347 = arith.index_cast %345 : i32 to index
        %c0_216 = arith.constant 0 : index
        %c0_217 = arith.constant 0 : index
        %c0_218 = arith.constant 0 : index
        %348 = vector.load %arg5[%346, %347, %c0_216, %c0_217, %c0_218] : memref<14x14x1x8x128xf32, #tpu.memory_space<vmem>>, vector<1x1x1x8x128xf32>
        %349 = vector.shape_cast %348 : vector<1x1x1x8x128xf32> to vector<1x8x128xf32>
        %350 = vector.shape_cast %342 : vector<8x128xf32> to vector<1x8x128xf32>
        %351 = arith.mulf %349, %350 : vector<1x8x128xf32>
        %352 = arith.addf %329, %351 : vector<1x8x128xf32>
        %c0_i32_219 = arith.constant 0 : i32
        %353 = arith.addi %c0_i32_219, %7 : i32
        %c1_i32_220 = arith.constant 1 : i32
        %354 = arith.addi %15, %c1_i32_220 : i32
        %c2_i32_221 = arith.constant 2 : i32
        %355 = arith.addi %354, %c2_i32_221 : i32
        %356 = arith.index_cast %353 : i32 to index
        %357 = arith.index_cast %355 : i32 to index
        %c0_222 = arith.constant 0 : index
        %c0_223 = arith.constant 0 : index
        %c0_224 = arith.constant 0 : index
        %358 = vector.load %arg5[%356, %357, %c0_222, %c0_223, %c0_224] : memref<14x14x1x8x128xf32, #tpu.memory_space<vmem>>, vector<1x1x1x8x128xf32>
        %359 = vector.shape_cast %358 : vector<1x1x1x8x128xf32> to vector<1x8x128xf32>
        %360 = vector.shape_cast %342 : vector<8x128xf32> to vector<1x8x128xf32>
        %361 = arith.mulf %359, %360 : vector<1x8x128xf32>
        %362 = arith.addf %339, %361 : vector<1x8x128xf32>
        %363 = arith.index_cast %7 : i32 to index
        %c15 = arith.constant 15 : index
        %c0_225 = arith.constant 0 : index
        %c0_226 = arith.constant 0 : index
        %364 = vector.load %arg2[%363, %c15, %c0_225, %c0_226] : memref<2x49x8x128xf32, #tpu.memory_space<vmem>>, vector<1x1x8x128xf32>
        %365 = vector.shape_cast %364 : vector<1x1x8x128xf32> to vector<8x128xf32>
        %c2_i32_227 = arith.constant 2 : i32
        %366 = arith.addi %c2_i32_227, %7 : i32
        %c0_i32_228 = arith.constant 0 : i32
        %367 = arith.addi %15, %c0_i32_228 : i32
        %c2_i32_229 = arith.constant 2 : i32
        %368 = arith.addi %367, %c2_i32_229 : i32
        %369 = arith.index_cast %366 : i32 to index
        %370 = arith.index_cast %368 : i32 to index
        %c0_230 = arith.constant 0 : index
        %c0_231 = arith.constant 0 : index
        %c0_232 = arith.constant 0 : index
        %371 = vector.load %arg5[%369, %370, %c0_230, %c0_231, %c0_232] : memref<14x14x1x8x128xf32, #tpu.memory_space<vmem>>, vector<1x1x1x8x128xf32>
        %372 = vector.shape_cast %371 : vector<1x1x1x8x128xf32> to vector<1x8x128xf32>
        %373 = vector.shape_cast %365 : vector<8x128xf32> to vector<1x8x128xf32>
        %374 = arith.mulf %372, %373 : vector<1x8x128xf32>
        %375 = arith.addf %306, %374 : vector<1x8x128xf32>
        %c2_i32_233 = arith.constant 2 : i32
        %376 = arith.addi %c2_i32_233, %7 : i32
        %c1_i32_234 = arith.constant 1 : i32
        %377 = arith.addi %15, %c1_i32_234 : i32
        %c2_i32_235 = arith.constant 2 : i32
        %378 = arith.addi %377, %c2_i32_235 : i32
        %379 = arith.index_cast %376 : i32 to index
        %380 = arith.index_cast %378 : i32 to index
        %c0_236 = arith.constant 0 : index
        %c0_237 = arith.constant 0 : index
        %c0_238 = arith.constant 0 : index
        %381 = vector.load %arg5[%379, %380, %c0_236, %c0_237, %c0_238] : memref<14x14x1x8x128xf32, #tpu.memory_space<vmem>>, vector<1x1x1x8x128xf32>
        %382 = vector.shape_cast %381 : vector<1x1x1x8x128xf32> to vector<1x8x128xf32>
        %383 = vector.shape_cast %365 : vector<8x128xf32> to vector<1x8x128xf32>
        %384 = arith.mulf %382, %383 : vector<1x8x128xf32>
        %385 = arith.addf %316, %384 : vector<1x8x128xf32>
        %386 = arith.index_cast %7 : i32 to index
        %c16 = arith.constant 16 : index
        %c0_239 = arith.constant 0 : index
        %c0_240 = arith.constant 0 : index
        %387 = vector.load %arg2[%386, %c16, %c0_239, %c0_240] : memref<2x49x8x128xf32, #tpu.memory_space<vmem>>, vector<1x1x8x128xf32>
        %388 = vector.shape_cast %387 : vector<1x1x8x128xf32> to vector<8x128xf32>
        %c4_i32_241 = arith.constant 4 : i32
        %389 = arith.addi %c4_i32_241, %7 : i32
        %c0_i32_242 = arith.constant 0 : i32
        %390 = arith.addi %15, %c0_i32_242 : i32
        %c2_i32_243 = arith.constant 2 : i32
        %391 = arith.addi %390, %c2_i32_243 : i32
        %392 = arith.index_cast %389 : i32 to index
        %393 = arith.index_cast %391 : i32 to index
        %c0_244 = arith.constant 0 : index
        %c0_245 = arith.constant 0 : index
        %c0_246 = arith.constant 0 : index
        %394 = vector.load %arg5[%392, %393, %c0_244, %c0_245, %c0_246] : memref<14x14x1x8x128xf32, #tpu.memory_space<vmem>>, vector<1x1x1x8x128xf32>
        %395 = vector.shape_cast %394 : vector<1x1x1x8x128xf32> to vector<1x8x128xf32>
        %396 = vector.shape_cast %388 : vector<8x128xf32> to vector<1x8x128xf32>
        %397 = arith.mulf %395, %396 : vector<1x8x128xf32>
        %398 = arith.addf %352, %397 : vector<1x8x128xf32>
        %c4_i32_247 = arith.constant 4 : i32
        %399 = arith.addi %c4_i32_247, %7 : i32
        %c1_i32_248 = arith.constant 1 : i32
        %400 = arith.addi %15, %c1_i32_248 : i32
        %c2_i32_249 = arith.constant 2 : i32
        %401 = arith.addi %400, %c2_i32_249 : i32
        %402 = arith.index_cast %399 : i32 to index
        %403 = arith.index_cast %401 : i32 to index
        %c0_250 = arith.constant 0 : index
        %c0_251 = arith.constant 0 : index
        %c0_252 = arith.constant 0 : index
        %404 = vector.load %arg5[%402, %403, %c0_250, %c0_251, %c0_252] : memref<14x14x1x8x128xf32, #tpu.memory_space<vmem>>, vector<1x1x1x8x128xf32>
        %405 = vector.shape_cast %404 : vector<1x1x1x8x128xf32> to vector<1x8x128xf32>
        %406 = vector.shape_cast %388 : vector<8x128xf32> to vector<1x8x128xf32>
        %407 = arith.mulf %405, %406 : vector<1x8x128xf32>
        %408 = arith.addf %362, %407 : vector<1x8x128xf32>
        %409 = arith.index_cast %7 : i32 to index
        %c17 = arith.constant 17 : index
        %c0_253 = arith.constant 0 : index
        %c0_254 = arith.constant 0 : index
        %410 = vector.load %arg2[%409, %c17, %c0_253, %c0_254] : memref<2x49x8x128xf32, #tpu.memory_space<vmem>>, vector<1x1x8x128xf32>
        %411 = vector.shape_cast %410 : vector<1x1x8x128xf32> to vector<8x128xf32>
        %c6_i32_255 = arith.constant 6 : i32
        %412 = arith.addi %c6_i32_255, %7 : i32
        %c0_i32_256 = arith.constant 0 : i32
        %413 = arith.addi %15, %c0_i32_256 : i32
        %c2_i32_257 = arith.constant 2 : i32
        %414 = arith.addi %413, %c2_i32_257 : i32
        %415 = arith.index_cast %412 : i32 to index
        %416 = arith.index_cast %414 : i32 to index
        %c0_258 = arith.constant 0 : index
        %c0_259 = arith.constant 0 : index
        %c0_260 = arith.constant 0 : index
        %417 = vector.load %arg5[%415, %416, %c0_258, %c0_259, %c0_260] : memref<14x14x1x8x128xf32, #tpu.memory_space<vmem>>, vector<1x1x1x8x128xf32>
        %418 = vector.shape_cast %417 : vector<1x1x1x8x128xf32> to vector<1x8x128xf32>
        %419 = vector.shape_cast %411 : vector<8x128xf32> to vector<1x8x128xf32>
        %420 = arith.mulf %418, %419 : vector<1x8x128xf32>
        %421 = arith.addf %375, %420 : vector<1x8x128xf32>
        %c6_i32_261 = arith.constant 6 : i32
        %422 = arith.addi %c6_i32_261, %7 : i32
        %c1_i32_262 = arith.constant 1 : i32
        %423 = arith.addi %15, %c1_i32_262 : i32
        %c2_i32_263 = arith.constant 2 : i32
        %424 = arith.addi %423, %c2_i32_263 : i32
        %425 = arith.index_cast %422 : i32 to index
        %426 = arith.index_cast %424 : i32 to index
        %c0_264 = arith.constant 0 : index
        %c0_265 = arith.constant 0 : index
        %c0_266 = arith.constant 0 : index
        %427 = vector.load %arg5[%425, %426, %c0_264, %c0_265, %c0_266] : memref<14x14x1x8x128xf32, #tpu.memory_space<vmem>>, vector<1x1x1x8x128xf32>
        %428 = vector.shape_cast %427 : vector<1x1x1x8x128xf32> to vector<1x8x128xf32>
        %429 = vector.shape_cast %411 : vector<8x128xf32> to vector<1x8x128xf32>
        %430 = arith.mulf %428, %429 : vector<1x8x128xf32>
        %431 = arith.addf %385, %430 : vector<1x8x128xf32>
        %432 = arith.index_cast %7 : i32 to index
        %c18 = arith.constant 18 : index
        %c0_267 = arith.constant 0 : index
        %c0_268 = arith.constant 0 : index
        %433 = vector.load %arg2[%432, %c18, %c0_267, %c0_268] : memref<2x49x8x128xf32, #tpu.memory_space<vmem>>, vector<1x1x8x128xf32>
        %434 = vector.shape_cast %433 : vector<1x1x8x128xf32> to vector<8x128xf32>
        %c8_i32_269 = arith.constant 8 : i32
        %435 = arith.addi %c8_i32_269, %7 : i32
        %c0_i32_270 = arith.constant 0 : i32
        %436 = arith.addi %15, %c0_i32_270 : i32
        %c2_i32_271 = arith.constant 2 : i32
        %437 = arith.addi %436, %c2_i32_271 : i32
        %438 = arith.index_cast %435 : i32 to index
        %439 = arith.index_cast %437 : i32 to index
        %c0_272 = arith.constant 0 : index
        %c0_273 = arith.constant 0 : index
        %c0_274 = arith.constant 0 : index
        %440 = vector.load %arg5[%438, %439, %c0_272, %c0_273, %c0_274] : memref<14x14x1x8x128xf32, #tpu.memory_space<vmem>>, vector<1x1x1x8x128xf32>
        %441 = vector.shape_cast %440 : vector<1x1x1x8x128xf32> to vector<1x8x128xf32>
        %442 = vector.shape_cast %434 : vector<8x128xf32> to vector<1x8x128xf32>
        %443 = arith.mulf %441, %442 : vector<1x8x128xf32>
        %444 = arith.addf %398, %443 : vector<1x8x128xf32>
        %c8_i32_275 = arith.constant 8 : i32
        %445 = arith.addi %c8_i32_275, %7 : i32
        %c1_i32_276 = arith.constant 1 : i32
        %446 = arith.addi %15, %c1_i32_276 : i32
        %c2_i32_277 = arith.constant 2 : i32
        %447 = arith.addi %446, %c2_i32_277 : i32
        %448 = arith.index_cast %445 : i32 to index
        %449 = arith.index_cast %447 : i32 to index
        %c0_278 = arith.constant 0 : index
        %c0_279 = arith.constant 0 : index
        %c0_280 = arith.constant 0 : index
        %450 = vector.load %arg5[%448, %449, %c0_278, %c0_279, %c0_280] : memref<14x14x1x8x128xf32, #tpu.memory_space<vmem>>, vector<1x1x1x8x128xf32>
        %451 = vector.shape_cast %450 : vector<1x1x1x8x128xf32> to vector<1x8x128xf32>
        %452 = vector.shape_cast %434 : vector<8x128xf32> to vector<1x8x128xf32>
        %453 = arith.mulf %451, %452 : vector<1x8x128xf32>
        %454 = arith.addf %408, %453 : vector<1x8x128xf32>
        %455 = arith.index_cast %7 : i32 to index
        %c19 = arith.constant 19 : index
        %c0_281 = arith.constant 0 : index
        %c0_282 = arith.constant 0 : index
        %456 = vector.load %arg2[%455, %c19, %c0_281, %c0_282] : memref<2x49x8x128xf32, #tpu.memory_space<vmem>>, vector<1x1x8x128xf32>
        %457 = vector.shape_cast %456 : vector<1x1x8x128xf32> to vector<8x128xf32>
        %c10_i32_283 = arith.constant 10 : i32
        %458 = arith.addi %c10_i32_283, %7 : i32
        %c0_i32_284 = arith.constant 0 : i32
        %459 = arith.addi %15, %c0_i32_284 : i32
        %c2_i32_285 = arith.constant 2 : i32
        %460 = arith.addi %459, %c2_i32_285 : i32
        %461 = arith.index_cast %458 : i32 to index
        %462 = arith.index_cast %460 : i32 to index
        %c0_286 = arith.constant 0 : index
        %c0_287 = arith.constant 0 : index
        %c0_288 = arith.constant 0 : index
        %463 = vector.load %arg5[%461, %462, %c0_286, %c0_287, %c0_288] : memref<14x14x1x8x128xf32, #tpu.memory_space<vmem>>, vector<1x1x1x8x128xf32>
        %464 = vector.shape_cast %463 : vector<1x1x1x8x128xf32> to vector<1x8x128xf32>
        %465 = vector.shape_cast %457 : vector<8x128xf32> to vector<1x8x128xf32>
        %466 = arith.mulf %464, %465 : vector<1x8x128xf32>
        %467 = arith.addf %421, %466 : vector<1x8x128xf32>
        %c10_i32_289 = arith.constant 10 : i32
        %468 = arith.addi %c10_i32_289, %7 : i32
        %c1_i32_290 = arith.constant 1 : i32
        %469 = arith.addi %15, %c1_i32_290 : i32
        %c2_i32_291 = arith.constant 2 : i32
        %470 = arith.addi %469, %c2_i32_291 : i32
        %471 = arith.index_cast %468 : i32 to index
        %472 = arith.index_cast %470 : i32 to index
        %c0_292 = arith.constant 0 : index
        %c0_293 = arith.constant 0 : index
        %c0_294 = arith.constant 0 : index
        %473 = vector.load %arg5[%471, %472, %c0_292, %c0_293, %c0_294] : memref<14x14x1x8x128xf32, #tpu.memory_space<vmem>>, vector<1x1x1x8x128xf32>
        %474 = vector.shape_cast %473 : vector<1x1x1x8x128xf32> to vector<1x8x128xf32>
        %475 = vector.shape_cast %457 : vector<8x128xf32> to vector<1x8x128xf32>
        %476 = arith.mulf %474, %475 : vector<1x8x128xf32>
        %477 = arith.addf %431, %476 : vector<1x8x128xf32>
        %478 = arith.index_cast %7 : i32 to index
        %c20 = arith.constant 20 : index
        %c0_295 = arith.constant 0 : index
        %c0_296 = arith.constant 0 : index
        %479 = vector.load %arg2[%478, %c20, %c0_295, %c0_296] : memref<2x49x8x128xf32, #tpu.memory_space<vmem>>, vector<1x1x8x128xf32>
        %480 = vector.shape_cast %479 : vector<1x1x8x128xf32> to vector<8x128xf32>
        %c12_i32_297 = arith.constant 12 : i32
        %481 = arith.addi %c12_i32_297, %7 : i32
        %c0_i32_298 = arith.constant 0 : i32
        %482 = arith.addi %15, %c0_i32_298 : i32
        %c2_i32_299 = arith.constant 2 : i32
        %483 = arith.addi %482, %c2_i32_299 : i32
        %484 = arith.index_cast %481 : i32 to index
        %485 = arith.index_cast %483 : i32 to index
        %c0_300 = arith.constant 0 : index
        %c0_301 = arith.constant 0 : index
        %c0_302 = arith.constant 0 : index
        %486 = vector.load %arg5[%484, %485, %c0_300, %c0_301, %c0_302] : memref<14x14x1x8x128xf32, #tpu.memory_space<vmem>>, vector<1x1x1x8x128xf32>
        %487 = vector.shape_cast %486 : vector<1x1x1x8x128xf32> to vector<1x8x128xf32>
        %488 = vector.shape_cast %480 : vector<8x128xf32> to vector<1x8x128xf32>
        %489 = arith.mulf %487, %488 : vector<1x8x128xf32>
        %490 = arith.addf %444, %489 : vector<1x8x128xf32>
        %c12_i32_303 = arith.constant 12 : i32
        %491 = arith.addi %c12_i32_303, %7 : i32
        %c1_i32_304 = arith.constant 1 : i32
        %492 = arith.addi %15, %c1_i32_304 : i32
        %c2_i32_305 = arith.constant 2 : i32
        %493 = arith.addi %492, %c2_i32_305 : i32
        %494 = arith.index_cast %491 : i32 to index
        %495 = arith.index_cast %493 : i32 to index
        %c0_306 = arith.constant 0 : index
        %c0_307 = arith.constant 0 : index
        %c0_308 = arith.constant 0 : index
        %496 = vector.load %arg5[%494, %495, %c0_306, %c0_307, %c0_308] : memref<14x14x1x8x128xf32, #tpu.memory_space<vmem>>, vector<1x1x1x8x128xf32>
        %497 = vector.shape_cast %496 : vector<1x1x1x8x128xf32> to vector<1x8x128xf32>
        %498 = vector.shape_cast %480 : vector<8x128xf32> to vector<1x8x128xf32>
        %499 = arith.mulf %497, %498 : vector<1x8x128xf32>
        %500 = arith.addf %454, %499 : vector<1x8x128xf32>
        %501 = arith.index_cast %7 : i32 to index
        %c21 = arith.constant 21 : index
        %c0_309 = arith.constant 0 : index
        %c0_310 = arith.constant 0 : index
        %502 = vector.load %arg2[%501, %c21, %c0_309, %c0_310] : memref<2x49x8x128xf32, #tpu.memory_space<vmem>>, vector<1x1x8x128xf32>
        %503 = vector.shape_cast %502 : vector<1x1x8x128xf32> to vector<8x128xf32>
        %c0_i32_311 = arith.constant 0 : i32
        %504 = arith.addi %c0_i32_311, %7 : i32
        %c0_i32_312 = arith.constant 0 : i32
        %505 = arith.addi %15, %c0_i32_312 : i32
        %c3_i32 = arith.constant 3 : i32
        %506 = arith.addi %505, %c3_i32 : i32
        %507 = arith.index_cast %504 : i32 to index
        %508 = arith.index_cast %506 : i32 to index
        %c0_313 = arith.constant 0 : index
        %c0_314 = arith.constant 0 : index
        %c0_315 = arith.constant 0 : index
        %509 = vector.load %arg5[%507, %508, %c0_313, %c0_314, %c0_315] : memref<14x14x1x8x128xf32, #tpu.memory_space<vmem>>, vector<1x1x1x8x128xf32>
        %510 = vector.shape_cast %509 : vector<1x1x1x8x128xf32> to vector<1x8x128xf32>
        %511 = vector.shape_cast %503 : vector<8x128xf32> to vector<1x8x128xf32>
        %512 = arith.mulf %510, %511 : vector<1x8x128xf32>
        %513 = arith.addf %490, %512 : vector<1x8x128xf32>
        %c0_i32_316 = arith.constant 0 : i32
        %514 = arith.addi %c0_i32_316, %7 : i32
        %c1_i32_317 = arith.constant 1 : i32
        %515 = arith.addi %15, %c1_i32_317 : i32
        %c3_i32_318 = arith.constant 3 : i32
        %516 = arith.addi %515, %c3_i32_318 : i32
        %517 = arith.index_cast %514 : i32 to index
        %518 = arith.index_cast %516 : i32 to index
        %c0_319 = arith.constant 0 : index
        %c0_320 = arith.constant 0 : index
        %c0_321 = arith.constant 0 : index
        %519 = vector.load %arg5[%517, %518, %c0_319, %c0_320, %c0_321] : memref<14x14x1x8x128xf32, #tpu.memory_space<vmem>>, vector<1x1x1x8x128xf32>
        %520 = vector.shape_cast %519 : vector<1x1x1x8x128xf32> to vector<1x8x128xf32>
        %521 = vector.shape_cast %503 : vector<8x128xf32> to vector<1x8x128xf32>
        %522 = arith.mulf %520, %521 : vector<1x8x128xf32>
        %523 = arith.addf %500, %522 : vector<1x8x128xf32>
        %524 = arith.index_cast %7 : i32 to index
        %c22 = arith.constant 22 : index
        %c0_322 = arith.constant 0 : index
        %c0_323 = arith.constant 0 : index
        %525 = vector.load %arg2[%524, %c22, %c0_322, %c0_323] : memref<2x49x8x128xf32, #tpu.memory_space<vmem>>, vector<1x1x8x128xf32>
        %526 = vector.shape_cast %525 : vector<1x1x8x128xf32> to vector<8x128xf32>
        %c2_i32_324 = arith.constant 2 : i32
        %527 = arith.addi %c2_i32_324, %7 : i32
        %c0_i32_325 = arith.constant 0 : i32
        %528 = arith.addi %15, %c0_i32_325 : i32
        %c3_i32_326 = arith.constant 3 : i32
        %529 = arith.addi %528, %c3_i32_326 : i32
        %530 = arith.index_cast %527 : i32 to index
        %531 = arith.index_cast %529 : i32 to index
        %c0_327 = arith.constant 0 : index
        %c0_328 = arith.constant 0 : index
        %c0_329 = arith.constant 0 : index
        %532 = vector.load %arg5[%530, %531, %c0_327, %c0_328, %c0_329] : memref<14x14x1x8x128xf32, #tpu.memory_space<vmem>>, vector<1x1x1x8x128xf32>
        %533 = vector.shape_cast %532 : vector<1x1x1x8x128xf32> to vector<1x8x128xf32>
        %534 = vector.shape_cast %526 : vector<8x128xf32> to vector<1x8x128xf32>
        %535 = arith.mulf %533, %534 : vector<1x8x128xf32>
        %536 = arith.addf %467, %535 : vector<1x8x128xf32>
        %c2_i32_330 = arith.constant 2 : i32
        %537 = arith.addi %c2_i32_330, %7 : i32
        %c1_i32_331 = arith.constant 1 : i32
        %538 = arith.addi %15, %c1_i32_331 : i32
        %c3_i32_332 = arith.constant 3 : i32
        %539 = arith.addi %538, %c3_i32_332 : i32
        %540 = arith.index_cast %537 : i32 to index
        %541 = arith.index_cast %539 : i32 to index
        %c0_333 = arith.constant 0 : index
        %c0_334 = arith.constant 0 : index
        %c0_335 = arith.constant 0 : index
        %542 = vector.load %arg5[%540, %541, %c0_333, %c0_334, %c0_335] : memref<14x14x1x8x128xf32, #tpu.memory_space<vmem>>, vector<1x1x1x8x128xf32>
        %543 = vector.shape_cast %542 : vector<1x1x1x8x128xf32> to vector<1x8x128xf32>
        %544 = vector.shape_cast %526 : vector<8x128xf32> to vector<1x8x128xf32>
        %545 = arith.mulf %543, %544 : vector<1x8x128xf32>
        %546 = arith.addf %477, %545 : vector<1x8x128xf32>
        %547 = arith.index_cast %7 : i32 to index
        %c23 = arith.constant 23 : index
        %c0_336 = arith.constant 0 : index
        %c0_337 = arith.constant 0 : index
        %548 = vector.load %arg2[%547, %c23, %c0_336, %c0_337] : memref<2x49x8x128xf32, #tpu.memory_space<vmem>>, vector<1x1x8x128xf32>
        %549 = vector.shape_cast %548 : vector<1x1x8x128xf32> to vector<8x128xf32>
        %c4_i32_338 = arith.constant 4 : i32
        %550 = arith.addi %c4_i32_338, %7 : i32
        %c0_i32_339 = arith.constant 0 : i32
        %551 = arith.addi %15, %c0_i32_339 : i32
        %c3_i32_340 = arith.constant 3 : i32
        %552 = arith.addi %551, %c3_i32_340 : i32
        %553 = arith.index_cast %550 : i32 to index
        %554 = arith.index_cast %552 : i32 to index
        %c0_341 = arith.constant 0 : index
        %c0_342 = arith.constant 0 : index
        %c0_343 = arith.constant 0 : index
        %555 = vector.load %arg5[%553, %554, %c0_341, %c0_342, %c0_343] : memref<14x14x1x8x128xf32, #tpu.memory_space<vmem>>, vector<1x1x1x8x128xf32>
        %556 = vector.shape_cast %555 : vector<1x1x1x8x128xf32> to vector<1x8x128xf32>
        %557 = vector.shape_cast %549 : vector<8x128xf32> to vector<1x8x128xf32>
        %558 = arith.mulf %556, %557 : vector<1x8x128xf32>
        %559 = arith.addf %513, %558 : vector<1x8x128xf32>
        %c4_i32_344 = arith.constant 4 : i32
        %560 = arith.addi %c4_i32_344, %7 : i32
        %c1_i32_345 = arith.constant 1 : i32
        %561 = arith.addi %15, %c1_i32_345 : i32
        %c3_i32_346 = arith.constant 3 : i32
        %562 = arith.addi %561, %c3_i32_346 : i32
        %563 = arith.index_cast %560 : i32 to index
        %564 = arith.index_cast %562 : i32 to index
        %c0_347 = arith.constant 0 : index
        %c0_348 = arith.constant 0 : index
        %c0_349 = arith.constant 0 : index
        %565 = vector.load %arg5[%563, %564, %c0_347, %c0_348, %c0_349] : memref<14x14x1x8x128xf32, #tpu.memory_space<vmem>>, vector<1x1x1x8x128xf32>
        %566 = vector.shape_cast %565 : vector<1x1x1x8x128xf32> to vector<1x8x128xf32>
        %567 = vector.shape_cast %549 : vector<8x128xf32> to vector<1x8x128xf32>
        %568 = arith.mulf %566, %567 : vector<1x8x128xf32>
        %569 = arith.addf %523, %568 : vector<1x8x128xf32>
        %570 = arith.index_cast %7 : i32 to index
        %c24 = arith.constant 24 : index
        %c0_350 = arith.constant 0 : index
        %c0_351 = arith.constant 0 : index
        %571 = vector.load %arg2[%570, %c24, %c0_350, %c0_351] : memref<2x49x8x128xf32, #tpu.memory_space<vmem>>, vector<1x1x8x128xf32>
        %572 = vector.shape_cast %571 : vector<1x1x8x128xf32> to vector<8x128xf32>
        %c6_i32_352 = arith.constant 6 : i32
        %573 = arith.addi %c6_i32_352, %7 : i32
        %c0_i32_353 = arith.constant 0 : i32
        %574 = arith.addi %15, %c0_i32_353 : i32
        %c3_i32_354 = arith.constant 3 : i32
        %575 = arith.addi %574, %c3_i32_354 : i32
        %576 = arith.index_cast %573 : i32 to index
        %577 = arith.index_cast %575 : i32 to index
        %c0_355 = arith.constant 0 : index
        %c0_356 = arith.constant 0 : index
        %c0_357 = arith.constant 0 : index
        %578 = vector.load %arg5[%576, %577, %c0_355, %c0_356, %c0_357] : memref<14x14x1x8x128xf32, #tpu.memory_space<vmem>>, vector<1x1x1x8x128xf32>
        %579 = vector.shape_cast %578 : vector<1x1x1x8x128xf32> to vector<1x8x128xf32>
        %580 = vector.shape_cast %572 : vector<8x128xf32> to vector<1x8x128xf32>
        %581 = arith.mulf %579, %580 : vector<1x8x128xf32>
        %582 = arith.addf %536, %581 : vector<1x8x128xf32>
        %c6_i32_358 = arith.constant 6 : i32
        %583 = arith.addi %c6_i32_358, %7 : i32
        %c1_i32_359 = arith.constant 1 : i32
        %584 = arith.addi %15, %c1_i32_359 : i32
        %c3_i32_360 = arith.constant 3 : i32
        %585 = arith.addi %584, %c3_i32_360 : i32
        %586 = arith.index_cast %583 : i32 to index
        %587 = arith.index_cast %585 : i32 to index
        %c0_361 = arith.constant 0 : index
        %c0_362 = arith.constant 0 : index
        %c0_363 = arith.constant 0 : index
        %588 = vector.load %arg5[%586, %587, %c0_361, %c0_362, %c0_363] : memref<14x14x1x8x128xf32, #tpu.memory_space<vmem>>, vector<1x1x1x8x128xf32>
        %589 = vector.shape_cast %588 : vector<1x1x1x8x128xf32> to vector<1x8x128xf32>
        %590 = vector.shape_cast %572 : vector<8x128xf32> to vector<1x8x128xf32>
        %591 = arith.mulf %589, %590 : vector<1x8x128xf32>
        %592 = arith.addf %546, %591 : vector<1x8x128xf32>
        %593 = arith.index_cast %7 : i32 to index
        %c25 = arith.constant 25 : index
        %c0_364 = arith.constant 0 : index
        %c0_365 = arith.constant 0 : index
        %594 = vector.load %arg2[%593, %c25, %c0_364, %c0_365] : memref<2x49x8x128xf32, #tpu.memory_space<vmem>>, vector<1x1x8x128xf32>
        %595 = vector.shape_cast %594 : vector<1x1x8x128xf32> to vector<8x128xf32>
        %c8_i32_366 = arith.constant 8 : i32
        %596 = arith.addi %c8_i32_366, %7 : i32
        %c0_i32_367 = arith.constant 0 : i32
        %597 = arith.addi %15, %c0_i32_367 : i32
        %c3_i32_368 = arith.constant 3 : i32
        %598 = arith.addi %597, %c3_i32_368 : i32
        %599 = arith.index_cast %596 : i32 to index
        %600 = arith.index_cast %598 : i32 to index
        %c0_369 = arith.constant 0 : index
        %c0_370 = arith.constant 0 : index
        %c0_371 = arith.constant 0 : index
        %601 = vector.load %arg5[%599, %600, %c0_369, %c0_370, %c0_371] : memref<14x14x1x8x128xf32, #tpu.memory_space<vmem>>, vector<1x1x1x8x128xf32>
        %602 = vector.shape_cast %601 : vector<1x1x1x8x128xf32> to vector<1x8x128xf32>
        %603 = vector.shape_cast %595 : vector<8x128xf32> to vector<1x8x128xf32>
        %604 = arith.mulf %602, %603 : vector<1x8x128xf32>
        %605 = arith.addf %559, %604 : vector<1x8x128xf32>
        %c8_i32_372 = arith.constant 8 : i32
        %606 = arith.addi %c8_i32_372, %7 : i32
        %c1_i32_373 = arith.constant 1 : i32
        %607 = arith.addi %15, %c1_i32_373 : i32
        %c3_i32_374 = arith.constant 3 : i32
        %608 = arith.addi %607, %c3_i32_374 : i32
        %609 = arith.index_cast %606 : i32 to index
        %610 = arith.index_cast %608 : i32 to index
        %c0_375 = arith.constant 0 : index
        %c0_376 = arith.constant 0 : index
        %c0_377 = arith.constant 0 : index
        %611 = vector.load %arg5[%609, %610, %c0_375, %c0_376, %c0_377] : memref<14x14x1x8x128xf32, #tpu.memory_space<vmem>>, vector<1x1x1x8x128xf32>
        %612 = vector.shape_cast %611 : vector<1x1x1x8x128xf32> to vector<1x8x128xf32>
        %613 = vector.shape_cast %595 : vector<8x128xf32> to vector<1x8x128xf32>
        %614 = arith.mulf %612, %613 : vector<1x8x128xf32>
        %615 = arith.addf %569, %614 : vector<1x8x128xf32>
        %616 = arith.index_cast %7 : i32 to index
        %c26 = arith.constant 26 : index
        %c0_378 = arith.constant 0 : index
        %c0_379 = arith.constant 0 : index
        %617 = vector.load %arg2[%616, %c26, %c0_378, %c0_379] : memref<2x49x8x128xf32, #tpu.memory_space<vmem>>, vector<1x1x8x128xf32>
        %618 = vector.shape_cast %617 : vector<1x1x8x128xf32> to vector<8x128xf32>
        %c10_i32_380 = arith.constant 10 : i32
        %619 = arith.addi %c10_i32_380, %7 : i32
        %c0_i32_381 = arith.constant 0 : i32
        %620 = arith.addi %15, %c0_i32_381 : i32
        %c3_i32_382 = arith.constant 3 : i32
        %621 = arith.addi %620, %c3_i32_382 : i32
        %622 = arith.index_cast %619 : i32 to index
        %623 = arith.index_cast %621 : i32 to index
        %c0_383 = arith.constant 0 : index
        %c0_384 = arith.constant 0 : index
        %c0_385 = arith.constant 0 : index
        %624 = vector.load %arg5[%622, %623, %c0_383, %c0_384, %c0_385] : memref<14x14x1x8x128xf32, #tpu.memory_space<vmem>>, vector<1x1x1x8x128xf32>
        %625 = vector.shape_cast %624 : vector<1x1x1x8x128xf32> to vector<1x8x128xf32>
        %626 = vector.shape_cast %618 : vector<8x128xf32> to vector<1x8x128xf32>
        %627 = arith.mulf %625, %626 : vector<1x8x128xf32>
        %628 = arith.addf %582, %627 : vector<1x8x128xf32>
        %c10_i32_386 = arith.constant 10 : i32
        %629 = arith.addi %c10_i32_386, %7 : i32
        %c1_i32_387 = arith.constant 1 : i32
        %630 = arith.addi %15, %c1_i32_387 : i32
        %c3_i32_388 = arith.constant 3 : i32
        %631 = arith.addi %630, %c3_i32_388 : i32
        %632 = arith.index_cast %629 : i32 to index
        %633 = arith.index_cast %631 : i32 to index
        %c0_389 = arith.constant 0 : index
        %c0_390 = arith.constant 0 : index
        %c0_391 = arith.constant 0 : index
        %634 = vector.load %arg5[%632, %633, %c0_389, %c0_390, %c0_391] : memref<14x14x1x8x128xf32, #tpu.memory_space<vmem>>, vector<1x1x1x8x128xf32>
        %635 = vector.shape_cast %634 : vector<1x1x1x8x128xf32> to vector<1x8x128xf32>
        %636 = vector.shape_cast %618 : vector<8x128xf32> to vector<1x8x128xf32>
        %637 = arith.mulf %635, %636 : vector<1x8x128xf32>
        %638 = arith.addf %592, %637 : vector<1x8x128xf32>
        %639 = arith.index_cast %7 : i32 to index
        %c27 = arith.constant 27 : index
        %c0_392 = arith.constant 0 : index
        %c0_393 = arith.constant 0 : index
        %640 = vector.load %arg2[%639, %c27, %c0_392, %c0_393] : memref<2x49x8x128xf32, #tpu.memory_space<vmem>>, vector<1x1x8x128xf32>
        %641 = vector.shape_cast %640 : vector<1x1x8x128xf32> to vector<8x128xf32>
        %c12_i32_394 = arith.constant 12 : i32
        %642 = arith.addi %c12_i32_394, %7 : i32
        %c0_i32_395 = arith.constant 0 : i32
        %643 = arith.addi %15, %c0_i32_395 : i32
        %c3_i32_396 = arith.constant 3 : i32
        %644 = arith.addi %643, %c3_i32_396 : i32
        %645 = arith.index_cast %642 : i32 to index
        %646 = arith.index_cast %644 : i32 to index
        %c0_397 = arith.constant 0 : index
        %c0_398 = arith.constant 0 : index
        %c0_399 = arith.constant 0 : index
        %647 = vector.load %arg5[%645, %646, %c0_397, %c0_398, %c0_399] : memref<14x14x1x8x128xf32, #tpu.memory_space<vmem>>, vector<1x1x1x8x128xf32>
        %648 = vector.shape_cast %647 : vector<1x1x1x8x128xf32> to vector<1x8x128xf32>
        %649 = vector.shape_cast %641 : vector<8x128xf32> to vector<1x8x128xf32>
        %650 = arith.mulf %648, %649 : vector<1x8x128xf32>
        %651 = arith.addf %605, %650 : vector<1x8x128xf32>
        %c12_i32_400 = arith.constant 12 : i32
        %652 = arith.addi %c12_i32_400, %7 : i32
        %c1_i32_401 = arith.constant 1 : i32
        %653 = arith.addi %15, %c1_i32_401 : i32
        %c3_i32_402 = arith.constant 3 : i32
        %654 = arith.addi %653, %c3_i32_402 : i32
        %655 = arith.index_cast %652 : i32 to index
        %656 = arith.index_cast %654 : i32 to index
        %c0_403 = arith.constant 0 : index
        %c0_404 = arith.constant 0 : index
        %c0_405 = arith.constant 0 : index
        %657 = vector.load %arg5[%655, %656, %c0_403, %c0_404, %c0_405] : memref<14x14x1x8x128xf32, #tpu.memory_space<vmem>>, vector<1x1x1x8x128xf32>
        %658 = vector.shape_cast %657 : vector<1x1x1x8x128xf32> to vector<1x8x128xf32>
        %659 = vector.shape_cast %641 : vector<8x128xf32> to vector<1x8x128xf32>
        %660 = arith.mulf %658, %659 : vector<1x8x128xf32>
        %661 = arith.addf %615, %660 : vector<1x8x128xf32>
        %662 = arith.index_cast %7 : i32 to index
        %c28 = arith.constant 28 : index
        %c0_406 = arith.constant 0 : index
        %c0_407 = arith.constant 0 : index
        %663 = vector.load %arg2[%662, %c28, %c0_406, %c0_407] : memref<2x49x8x128xf32, #tpu.memory_space<vmem>>, vector<1x1x8x128xf32>
        %664 = vector.shape_cast %663 : vector<1x1x8x128xf32> to vector<8x128xf32>
        %c0_i32_408 = arith.constant 0 : i32
        %665 = arith.addi %c0_i32_408, %7 : i32
        %c0_i32_409 = arith.constant 0 : i32
        %666 = arith.addi %15, %c0_i32_409 : i32
        %c4_i32_410 = arith.constant 4 : i32
        %667 = arith.addi %666, %c4_i32_410 : i32
        %668 = arith.index_cast %665 : i32 to index
        %669 = arith.index_cast %667 : i32 to index
        %c0_411 = arith.constant 0 : index
        %c0_412 = arith.constant 0 : index
        %c0_413 = arith.constant 0 : index
        %670 = vector.load %arg5[%668, %669, %c0_411, %c0_412, %c0_413] : memref<14x14x1x8x128xf32, #tpu.memory_space<vmem>>, vector<1x1x1x8x128xf32>
        %671 = vector.shape_cast %670 : vector<1x1x1x8x128xf32> to vector<1x8x128xf32>
        %672 = vector.shape_cast %664 : vector<8x128xf32> to vector<1x8x128xf32>
        %673 = arith.mulf %671, %672 : vector<1x8x128xf32>
        %674 = arith.addf %651, %673 : vector<1x8x128xf32>
        %c0_i32_414 = arith.constant 0 : i32
        %675 = arith.addi %c0_i32_414, %7 : i32
        %c1_i32_415 = arith.constant 1 : i32
        %676 = arith.addi %15, %c1_i32_415 : i32
        %c4_i32_416 = arith.constant 4 : i32
        %677 = arith.addi %676, %c4_i32_416 : i32
        %678 = arith.index_cast %675 : i32 to index
        %679 = arith.index_cast %677 : i32 to index
        %c0_417 = arith.constant 0 : index
        %c0_418 = arith.constant 0 : index
        %c0_419 = arith.constant 0 : index
        %680 = vector.load %arg5[%678, %679, %c0_417, %c0_418, %c0_419] : memref<14x14x1x8x128xf32, #tpu.memory_space<vmem>>, vector<1x1x1x8x128xf32>
        %681 = vector.shape_cast %680 : vector<1x1x1x8x128xf32> to vector<1x8x128xf32>
        %682 = vector.shape_cast %664 : vector<8x128xf32> to vector<1x8x128xf32>
        %683 = arith.mulf %681, %682 : vector<1x8x128xf32>
        %684 = arith.addf %661, %683 : vector<1x8x128xf32>
        %685 = arith.index_cast %7 : i32 to index
        %c29 = arith.constant 29 : index
        %c0_420 = arith.constant 0 : index
        %c0_421 = arith.constant 0 : index
        %686 = vector.load %arg2[%685, %c29, %c0_420, %c0_421] : memref<2x49x8x128xf32, #tpu.memory_space<vmem>>, vector<1x1x8x128xf32>
        %687 = vector.shape_cast %686 : vector<1x1x8x128xf32> to vector<8x128xf32>
        %c2_i32_422 = arith.constant 2 : i32
        %688 = arith.addi %c2_i32_422, %7 : i32
        %c0_i32_423 = arith.constant 0 : i32
        %689 = arith.addi %15, %c0_i32_423 : i32
        %c4_i32_424 = arith.constant 4 : i32
        %690 = arith.addi %689, %c4_i32_424 : i32
        %691 = arith.index_cast %688 : i32 to index
        %692 = arith.index_cast %690 : i32 to index
        %c0_425 = arith.constant 0 : index
        %c0_426 = arith.constant 0 : index
        %c0_427 = arith.constant 0 : index
        %693 = vector.load %arg5[%691, %692, %c0_425, %c0_426, %c0_427] : memref<14x14x1x8x128xf32, #tpu.memory_space<vmem>>, vector<1x1x1x8x128xf32>
        %694 = vector.shape_cast %693 : vector<1x1x1x8x128xf32> to vector<1x8x128xf32>
        %695 = vector.shape_cast %687 : vector<8x128xf32> to vector<1x8x128xf32>
        %696 = arith.mulf %694, %695 : vector<1x8x128xf32>
        %697 = arith.addf %628, %696 : vector<1x8x128xf32>
        %c2_i32_428 = arith.constant 2 : i32
        %698 = arith.addi %c2_i32_428, %7 : i32
        %c1_i32_429 = arith.constant 1 : i32
        %699 = arith.addi %15, %c1_i32_429 : i32
        %c4_i32_430 = arith.constant 4 : i32
        %700 = arith.addi %699, %c4_i32_430 : i32
        %701 = arith.index_cast %698 : i32 to index
        %702 = arith.index_cast %700 : i32 to index
        %c0_431 = arith.constant 0 : index
        %c0_432 = arith.constant 0 : index
        %c0_433 = arith.constant 0 : index
        %703 = vector.load %arg5[%701, %702, %c0_431, %c0_432, %c0_433] : memref<14x14x1x8x128xf32, #tpu.memory_space<vmem>>, vector<1x1x1x8x128xf32>
        %704 = vector.shape_cast %703 : vector<1x1x1x8x128xf32> to vector<1x8x128xf32>
        %705 = vector.shape_cast %687 : vector<8x128xf32> to vector<1x8x128xf32>
        %706 = arith.mulf %704, %705 : vector<1x8x128xf32>
        %707 = arith.addf %638, %706 : vector<1x8x128xf32>
        %708 = arith.index_cast %7 : i32 to index
        %c30 = arith.constant 30 : index
        %c0_434 = arith.constant 0 : index
        %c0_435 = arith.constant 0 : index
        %709 = vector.load %arg2[%708, %c30, %c0_434, %c0_435] : memref<2x49x8x128xf32, #tpu.memory_space<vmem>>, vector<1x1x8x128xf32>
        %710 = vector.shape_cast %709 : vector<1x1x8x128xf32> to vector<8x128xf32>
        %c4_i32_436 = arith.constant 4 : i32
        %711 = arith.addi %c4_i32_436, %7 : i32
        %c0_i32_437 = arith.constant 0 : i32
        %712 = arith.addi %15, %c0_i32_437 : i32
        %c4_i32_438 = arith.constant 4 : i32
        %713 = arith.addi %712, %c4_i32_438 : i32
        %714 = arith.index_cast %711 : i32 to index
        %715 = arith.index_cast %713 : i32 to index
        %c0_439 = arith.constant 0 : index
        %c0_440 = arith.constant 0 : index
        %c0_441 = arith.constant 0 : index
        %716 = vector.load %arg5[%714, %715, %c0_439, %c0_440, %c0_441] : memref<14x14x1x8x128xf32, #tpu.memory_space<vmem>>, vector<1x1x1x8x128xf32>
        %717 = vector.shape_cast %716 : vector<1x1x1x8x128xf32> to vector<1x8x128xf32>
        %718 = vector.shape_cast %710 : vector<8x128xf32> to vector<1x8x128xf32>
        %719 = arith.mulf %717, %718 : vector<1x8x128xf32>
        %720 = arith.addf %674, %719 : vector<1x8x128xf32>
        %c4_i32_442 = arith.constant 4 : i32
        %721 = arith.addi %c4_i32_442, %7 : i32
        %c1_i32_443 = arith.constant 1 : i32
        %722 = arith.addi %15, %c1_i32_443 : i32
        %c4_i32_444 = arith.constant 4 : i32
        %723 = arith.addi %722, %c4_i32_444 : i32
        %724 = arith.index_cast %721 : i32 to index
        %725 = arith.index_cast %723 : i32 to index
        %c0_445 = arith.constant 0 : index
        %c0_446 = arith.constant 0 : index
        %c0_447 = arith.constant 0 : index
        %726 = vector.load %arg5[%724, %725, %c0_445, %c0_446, %c0_447] : memref<14x14x1x8x128xf32, #tpu.memory_space<vmem>>, vector<1x1x1x8x128xf32>
        %727 = vector.shape_cast %726 : vector<1x1x1x8x128xf32> to vector<1x8x128xf32>
        %728 = vector.shape_cast %710 : vector<8x128xf32> to vector<1x8x128xf32>
        %729 = arith.mulf %727, %728 : vector<1x8x128xf32>
        %730 = arith.addf %684, %729 : vector<1x8x128xf32>
        %731 = arith.index_cast %7 : i32 to index
        %c31 = arith.constant 31 : index
        %c0_448 = arith.constant 0 : index
        %c0_449 = arith.constant 0 : index
        %732 = vector.load %arg2[%731, %c31, %c0_448, %c0_449] : memref<2x49x8x128xf32, #tpu.memory_space<vmem>>, vector<1x1x8x128xf32>
        %733 = vector.shape_cast %732 : vector<1x1x8x128xf32> to vector<8x128xf32>
        %c6_i32_450 = arith.constant 6 : i32
        %734 = arith.addi %c6_i32_450, %7 : i32
        %c0_i32_451 = arith.constant 0 : i32
        %735 = arith.addi %15, %c0_i32_451 : i32
        %c4_i32_452 = arith.constant 4 : i32
        %736 = arith.addi %735, %c4_i32_452 : i32
        %737 = arith.index_cast %734 : i32 to index
        %738 = arith.index_cast %736 : i32 to index
        %c0_453 = arith.constant 0 : index
        %c0_454 = arith.constant 0 : index
        %c0_455 = arith.constant 0 : index
        %739 = vector.load %arg5[%737, %738, %c0_453, %c0_454, %c0_455] : memref<14x14x1x8x128xf32, #tpu.memory_space<vmem>>, vector<1x1x1x8x128xf32>
        %740 = vector.shape_cast %739 : vector<1x1x1x8x128xf32> to vector<1x8x128xf32>
        %741 = vector.shape_cast %733 : vector<8x128xf32> to vector<1x8x128xf32>
        %742 = arith.mulf %740, %741 : vector<1x8x128xf32>
        %743 = arith.addf %697, %742 : vector<1x8x128xf32>
        %c6_i32_456 = arith.constant 6 : i32
        %744 = arith.addi %c6_i32_456, %7 : i32
        %c1_i32_457 = arith.constant 1 : i32
        %745 = arith.addi %15, %c1_i32_457 : i32
        %c4_i32_458 = arith.constant 4 : i32
        %746 = arith.addi %745, %c4_i32_458 : i32
        %747 = arith.index_cast %744 : i32 to index
        %748 = arith.index_cast %746 : i32 to index
        %c0_459 = arith.constant 0 : index
        %c0_460 = arith.constant 0 : index
        %c0_461 = arith.constant 0 : index
        %749 = vector.load %arg5[%747, %748, %c0_459, %c0_460, %c0_461] : memref<14x14x1x8x128xf32, #tpu.memory_space<vmem>>, vector<1x1x1x8x128xf32>
        %750 = vector.shape_cast %749 : vector<1x1x1x8x128xf32> to vector<1x8x128xf32>
        %751 = vector.shape_cast %733 : vector<8x128xf32> to vector<1x8x128xf32>
        %752 = arith.mulf %750, %751 : vector<1x8x128xf32>
        %753 = arith.addf %707, %752 : vector<1x8x128xf32>
        %754 = arith.index_cast %7 : i32 to index
        %c32 = arith.constant 32 : index
        %c0_462 = arith.constant 0 : index
        %c0_463 = arith.constant 0 : index
        %755 = vector.load %arg2[%754, %c32, %c0_462, %c0_463] : memref<2x49x8x128xf32, #tpu.memory_space<vmem>>, vector<1x1x8x128xf32>
        %756 = vector.shape_cast %755 : vector<1x1x8x128xf32> to vector<8x128xf32>
        %c8_i32_464 = arith.constant 8 : i32
        %757 = arith.addi %c8_i32_464, %7 : i32
        %c0_i32_465 = arith.constant 0 : i32
        %758 = arith.addi %15, %c0_i32_465 : i32
        %c4_i32_466 = arith.constant 4 : i32
        %759 = arith.addi %758, %c4_i32_466 : i32
        %760 = arith.index_cast %757 : i32 to index
        %761 = arith.index_cast %759 : i32 to index
        %c0_467 = arith.constant 0 : index
        %c0_468 = arith.constant 0 : index
        %c0_469 = arith.constant 0 : index
        %762 = vector.load %arg5[%760, %761, %c0_467, %c0_468, %c0_469] : memref<14x14x1x8x128xf32, #tpu.memory_space<vmem>>, vector<1x1x1x8x128xf32>
        %763 = vector.shape_cast %762 : vector<1x1x1x8x128xf32> to vector<1x8x128xf32>
        %764 = vector.shape_cast %756 : vector<8x128xf32> to vector<1x8x128xf32>
        %765 = arith.mulf %763, %764 : vector<1x8x128xf32>
        %766 = arith.addf %720, %765 : vector<1x8x128xf32>
        %c8_i32_470 = arith.constant 8 : i32
        %767 = arith.addi %c8_i32_470, %7 : i32
        %c1_i32_471 = arith.constant 1 : i32
        %768 = arith.addi %15, %c1_i32_471 : i32
        %c4_i32_472 = arith.constant 4 : i32
        %769 = arith.addi %768, %c4_i32_472 : i32
        %770 = arith.index_cast %767 : i32 to index
        %771 = arith.index_cast %769 : i32 to index
        %c0_473 = arith.constant 0 : index
        %c0_474 = arith.constant 0 : index
        %c0_475 = arith.constant 0 : index
        %772 = vector.load %arg5[%770, %771, %c0_473, %c0_474, %c0_475] : memref<14x14x1x8x128xf32, #tpu.memory_space<vmem>>, vector<1x1x1x8x128xf32>
        %773 = vector.shape_cast %772 : vector<1x1x1x8x128xf32> to vector<1x8x128xf32>
        %774 = vector.shape_cast %756 : vector<8x128xf32> to vector<1x8x128xf32>
        %775 = arith.mulf %773, %774 : vector<1x8x128xf32>
        %776 = arith.addf %730, %775 : vector<1x8x128xf32>
        %777 = arith.index_cast %7 : i32 to index
        %c33 = arith.constant 33 : index
        %c0_476 = arith.constant 0 : index
        %c0_477 = arith.constant 0 : index
        %778 = vector.load %arg2[%777, %c33, %c0_476, %c0_477] : memref<2x49x8x128xf32, #tpu.memory_space<vmem>>, vector<1x1x8x128xf32>
        %779 = vector.shape_cast %778 : vector<1x1x8x128xf32> to vector<8x128xf32>
        %c10_i32_478 = arith.constant 10 : i32
        %780 = arith.addi %c10_i32_478, %7 : i32
        %c0_i32_479 = arith.constant 0 : i32
        %781 = arith.addi %15, %c0_i32_479 : i32
        %c4_i32_480 = arith.constant 4 : i32
        %782 = arith.addi %781, %c4_i32_480 : i32
        %783 = arith.index_cast %780 : i32 to index
        %784 = arith.index_cast %782 : i32 to index
        %c0_481 = arith.constant 0 : index
        %c0_482 = arith.constant 0 : index
        %c0_483 = arith.constant 0 : index
        %785 = vector.load %arg5[%783, %784, %c0_481, %c0_482, %c0_483] : memref<14x14x1x8x128xf32, #tpu.memory_space<vmem>>, vector<1x1x1x8x128xf32>
        %786 = vector.shape_cast %785 : vector<1x1x1x8x128xf32> to vector<1x8x128xf32>
        %787 = vector.shape_cast %779 : vector<8x128xf32> to vector<1x8x128xf32>
        %788 = arith.mulf %786, %787 : vector<1x8x128xf32>
        %789 = arith.addf %743, %788 : vector<1x8x128xf32>
        %c10_i32_484 = arith.constant 10 : i32
        %790 = arith.addi %c10_i32_484, %7 : i32
        %c1_i32_485 = arith.constant 1 : i32
        %791 = arith.addi %15, %c1_i32_485 : i32
        %c4_i32_486 = arith.constant 4 : i32
        %792 = arith.addi %791, %c4_i32_486 : i32
        %793 = arith.index_cast %790 : i32 to index
        %794 = arith.index_cast %792 : i32 to index
        %c0_487 = arith.constant 0 : index
        %c0_488 = arith.constant 0 : index
        %c0_489 = arith.constant 0 : index
        %795 = vector.load %arg5[%793, %794, %c0_487, %c0_488, %c0_489] : memref<14x14x1x8x128xf32, #tpu.memory_space<vmem>>, vector<1x1x1x8x128xf32>
        %796 = vector.shape_cast %795 : vector<1x1x1x8x128xf32> to vector<1x8x128xf32>
        %797 = vector.shape_cast %779 : vector<8x128xf32> to vector<1x8x128xf32>
        %798 = arith.mulf %796, %797 : vector<1x8x128xf32>
        %799 = arith.addf %753, %798 : vector<1x8x128xf32>
        %800 = arith.index_cast %7 : i32 to index
        %c34 = arith.constant 34 : index
        %c0_490 = arith.constant 0 : index
        %c0_491 = arith.constant 0 : index
        %801 = vector.load %arg2[%800, %c34, %c0_490, %c0_491] : memref<2x49x8x128xf32, #tpu.memory_space<vmem>>, vector<1x1x8x128xf32>
        %802 = vector.shape_cast %801 : vector<1x1x8x128xf32> to vector<8x128xf32>
        %c12_i32_492 = arith.constant 12 : i32
        %803 = arith.addi %c12_i32_492, %7 : i32
        %c0_i32_493 = arith.constant 0 : i32
        %804 = arith.addi %15, %c0_i32_493 : i32
        %c4_i32_494 = arith.constant 4 : i32
        %805 = arith.addi %804, %c4_i32_494 : i32
        %806 = arith.index_cast %803 : i32 to index
        %807 = arith.index_cast %805 : i32 to index
        %c0_495 = arith.constant 0 : index
        %c0_496 = arith.constant 0 : index
        %c0_497 = arith.constant 0 : index
        %808 = vector.load %arg5[%806, %807, %c0_495, %c0_496, %c0_497] : memref<14x14x1x8x128xf32, #tpu.memory_space<vmem>>, vector<1x1x1x8x128xf32>
        %809 = vector.shape_cast %808 : vector<1x1x1x8x128xf32> to vector<1x8x128xf32>
        %810 = vector.shape_cast %802 : vector<8x128xf32> to vector<1x8x128xf32>
        %811 = arith.mulf %809, %810 : vector<1x8x128xf32>
        %812 = arith.addf %766, %811 : vector<1x8x128xf32>
        %c12_i32_498 = arith.constant 12 : i32
        %813 = arith.addi %c12_i32_498, %7 : i32
        %c1_i32_499 = arith.constant 1 : i32
        %814 = arith.addi %15, %c1_i32_499 : i32
        %c4_i32_500 = arith.constant 4 : i32
        %815 = arith.addi %814, %c4_i32_500 : i32
        %816 = arith.index_cast %813 : i32 to index
        %817 = arith.index_cast %815 : i32 to index
        %c0_501 = arith.constant 0 : index
        %c0_502 = arith.constant 0 : index
        %c0_503 = arith.constant 0 : index
        %818 = vector.load %arg5[%816, %817, %c0_501, %c0_502, %c0_503] : memref<14x14x1x8x128xf32, #tpu.memory_space<vmem>>, vector<1x1x1x8x128xf32>
        %819 = vector.shape_cast %818 : vector<1x1x1x8x128xf32> to vector<1x8x128xf32>
        %820 = vector.shape_cast %802 : vector<8x128xf32> to vector<1x8x128xf32>
        %821 = arith.mulf %819, %820 : vector<1x8x128xf32>
        %822 = arith.addf %776, %821 : vector<1x8x128xf32>
        %823 = arith.index_cast %7 : i32 to index
        %c35 = arith.constant 35 : index
        %c0_504 = arith.constant 0 : index
        %c0_505 = arith.constant 0 : index
        %824 = vector.load %arg2[%823, %c35, %c0_504, %c0_505] : memref<2x49x8x128xf32, #tpu.memory_space<vmem>>, vector<1x1x8x128xf32>
        %825 = vector.shape_cast %824 : vector<1x1x8x128xf32> to vector<8x128xf32>
        %c0_i32_506 = arith.constant 0 : i32
        %826 = arith.addi %c0_i32_506, %7 : i32
        %c0_i32_507 = arith.constant 0 : i32
        %827 = arith.addi %15, %c0_i32_507 : i32
        %c5_i32 = arith.constant 5 : i32
        %828 = arith.addi %827, %c5_i32 : i32
        %829 = arith.index_cast %826 : i32 to index
        %830 = arith.index_cast %828 : i32 to index
        %c0_508 = arith.constant 0 : index
        %c0_509 = arith.constant 0 : index
        %c0_510 = arith.constant 0 : index
        %831 = vector.load %arg5[%829, %830, %c0_508, %c0_509, %c0_510] : memref<14x14x1x8x128xf32, #tpu.memory_space<vmem>>, vector<1x1x1x8x128xf32>
        %832 = vector.shape_cast %831 : vector<1x1x1x8x128xf32> to vector<1x8x128xf32>
        %833 = vector.shape_cast %825 : vector<8x128xf32> to vector<1x8x128xf32>
        %834 = arith.mulf %832, %833 : vector<1x8x128xf32>
        %835 = arith.addf %812, %834 : vector<1x8x128xf32>
        %c0_i32_511 = arith.constant 0 : i32
        %836 = arith.addi %c0_i32_511, %7 : i32
        %c1_i32_512 = arith.constant 1 : i32
        %837 = arith.addi %15, %c1_i32_512 : i32
        %c5_i32_513 = arith.constant 5 : i32
        %838 = arith.addi %837, %c5_i32_513 : i32
        %839 = arith.index_cast %836 : i32 to index
        %840 = arith.index_cast %838 : i32 to index
        %c0_514 = arith.constant 0 : index
        %c0_515 = arith.constant 0 : index
        %c0_516 = arith.constant 0 : index
        %841 = vector.load %arg5[%839, %840, %c0_514, %c0_515, %c0_516] : memref<14x14x1x8x128xf32, #tpu.memory_space<vmem>>, vector<1x1x1x8x128xf32>
        %842 = vector.shape_cast %841 : vector<1x1x1x8x128xf32> to vector<1x8x128xf32>
        %843 = vector.shape_cast %825 : vector<8x128xf32> to vector<1x8x128xf32>
        %844 = arith.mulf %842, %843 : vector<1x8x128xf32>
        %845 = arith.addf %822, %844 : vector<1x8x128xf32>
        %846 = arith.index_cast %7 : i32 to index
        %c36 = arith.constant 36 : index
        %c0_517 = arith.constant 0 : index
        %c0_518 = arith.constant 0 : index
        %847 = vector.load %arg2[%846, %c36, %c0_517, %c0_518] : memref<2x49x8x128xf32, #tpu.memory_space<vmem>>, vector<1x1x8x128xf32>
        %848 = vector.shape_cast %847 : vector<1x1x8x128xf32> to vector<8x128xf32>
        %c2_i32_519 = arith.constant 2 : i32
        %849 = arith.addi %c2_i32_519, %7 : i32
        %c0_i32_520 = arith.constant 0 : i32
        %850 = arith.addi %15, %c0_i32_520 : i32
        %c5_i32_521 = arith.constant 5 : i32
        %851 = arith.addi %850, %c5_i32_521 : i32
        %852 = arith.index_cast %849 : i32 to index
        %853 = arith.index_cast %851 : i32 to index
        %c0_522 = arith.constant 0 : index
        %c0_523 = arith.constant 0 : index
        %c0_524 = arith.constant 0 : index
        %854 = vector.load %arg5[%852, %853, %c0_522, %c0_523, %c0_524] : memref<14x14x1x8x128xf32, #tpu.memory_space<vmem>>, vector<1x1x1x8x128xf32>
        %855 = vector.shape_cast %854 : vector<1x1x1x8x128xf32> to vector<1x8x128xf32>
        %856 = vector.shape_cast %848 : vector<8x128xf32> to vector<1x8x128xf32>
        %857 = arith.mulf %855, %856 : vector<1x8x128xf32>
        %858 = arith.addf %789, %857 : vector<1x8x128xf32>
        %c2_i32_525 = arith.constant 2 : i32
        %859 = arith.addi %c2_i32_525, %7 : i32
        %c1_i32_526 = arith.constant 1 : i32
        %860 = arith.addi %15, %c1_i32_526 : i32
        %c5_i32_527 = arith.constant 5 : i32
        %861 = arith.addi %860, %c5_i32_527 : i32
        %862 = arith.index_cast %859 : i32 to index
        %863 = arith.index_cast %861 : i32 to index
        %c0_528 = arith.constant 0 : index
        %c0_529 = arith.constant 0 : index
        %c0_530 = arith.constant 0 : index
        %864 = vector.load %arg5[%862, %863, %c0_528, %c0_529, %c0_530] : memref<14x14x1x8x128xf32, #tpu.memory_space<vmem>>, vector<1x1x1x8x128xf32>
        %865 = vector.shape_cast %864 : vector<1x1x1x8x128xf32> to vector<1x8x128xf32>
        %866 = vector.shape_cast %848 : vector<8x128xf32> to vector<1x8x128xf32>
        %867 = arith.mulf %865, %866 : vector<1x8x128xf32>
        %868 = arith.addf %799, %867 : vector<1x8x128xf32>
        %869 = arith.index_cast %7 : i32 to index
        %c37 = arith.constant 37 : index
        %c0_531 = arith.constant 0 : index
        %c0_532 = arith.constant 0 : index
        %870 = vector.load %arg2[%869, %c37, %c0_531, %c0_532] : memref<2x49x8x128xf32, #tpu.memory_space<vmem>>, vector<1x1x8x128xf32>
        %871 = vector.shape_cast %870 : vector<1x1x8x128xf32> to vector<8x128xf32>
        %c4_i32_533 = arith.constant 4 : i32
        %872 = arith.addi %c4_i32_533, %7 : i32
        %c0_i32_534 = arith.constant 0 : i32
        %873 = arith.addi %15, %c0_i32_534 : i32
        %c5_i32_535 = arith.constant 5 : i32
        %874 = arith.addi %873, %c5_i32_535 : i32
        %875 = arith.index_cast %872 : i32 to index
        %876 = arith.index_cast %874 : i32 to index
        %c0_536 = arith.constant 0 : index
        %c0_537 = arith.constant 0 : index
        %c0_538 = arith.constant 0 : index
        %877 = vector.load %arg5[%875, %876, %c0_536, %c0_537, %c0_538] : memref<14x14x1x8x128xf32, #tpu.memory_space<vmem>>, vector<1x1x1x8x128xf32>
        %878 = vector.shape_cast %877 : vector<1x1x1x8x128xf32> to vector<1x8x128xf32>
        %879 = vector.shape_cast %871 : vector<8x128xf32> to vector<1x8x128xf32>
        %880 = arith.mulf %878, %879 : vector<1x8x128xf32>
        %881 = arith.addf %835, %880 : vector<1x8x128xf32>
        %c4_i32_539 = arith.constant 4 : i32
        %882 = arith.addi %c4_i32_539, %7 : i32
        %c1_i32_540 = arith.constant 1 : i32
        %883 = arith.addi %15, %c1_i32_540 : i32
        %c5_i32_541 = arith.constant 5 : i32
        %884 = arith.addi %883, %c5_i32_541 : i32
        %885 = arith.index_cast %882 : i32 to index
        %886 = arith.index_cast %884 : i32 to index
        %c0_542 = arith.constant 0 : index
        %c0_543 = arith.constant 0 : index
        %c0_544 = arith.constant 0 : index
        %887 = vector.load %arg5[%885, %886, %c0_542, %c0_543, %c0_544] : memref<14x14x1x8x128xf32, #tpu.memory_space<vmem>>, vector<1x1x1x8x128xf32>
        %888 = vector.shape_cast %887 : vector<1x1x1x8x128xf32> to vector<1x8x128xf32>
        %889 = vector.shape_cast %871 : vector<8x128xf32> to vector<1x8x128xf32>
        %890 = arith.mulf %888, %889 : vector<1x8x128xf32>
        %891 = arith.addf %845, %890 : vector<1x8x128xf32>
        %892 = arith.index_cast %7 : i32 to index
        %c38 = arith.constant 38 : index
        %c0_545 = arith.constant 0 : index
        %c0_546 = arith.constant 0 : index
        %893 = vector.load %arg2[%892, %c38, %c0_545, %c0_546] : memref<2x49x8x128xf32, #tpu.memory_space<vmem>>, vector<1x1x8x128xf32>
        %894 = vector.shape_cast %893 : vector<1x1x8x128xf32> to vector<8x128xf32>
        %c6_i32_547 = arith.constant 6 : i32
        %895 = arith.addi %c6_i32_547, %7 : i32
        %c0_i32_548 = arith.constant 0 : i32
        %896 = arith.addi %15, %c0_i32_548 : i32
        %c5_i32_549 = arith.constant 5 : i32
        %897 = arith.addi %896, %c5_i32_549 : i32
        %898 = arith.index_cast %895 : i32 to index
        %899 = arith.index_cast %897 : i32 to index
        %c0_550 = arith.constant 0 : index
        %c0_551 = arith.constant 0 : index
        %c0_552 = arith.constant 0 : index
        %900 = vector.load %arg5[%898, %899, %c0_550, %c0_551, %c0_552] : memref<14x14x1x8x128xf32, #tpu.memory_space<vmem>>, vector<1x1x1x8x128xf32>
        %901 = vector.shape_cast %900 : vector<1x1x1x8x128xf32> to vector<1x8x128xf32>
        %902 = vector.shape_cast %894 : vector<8x128xf32> to vector<1x8x128xf32>
        %903 = arith.mulf %901, %902 : vector<1x8x128xf32>
        %904 = arith.addf %858, %903 : vector<1x8x128xf32>
        %c6_i32_553 = arith.constant 6 : i32
        %905 = arith.addi %c6_i32_553, %7 : i32
        %c1_i32_554 = arith.constant 1 : i32
        %906 = arith.addi %15, %c1_i32_554 : i32
        %c5_i32_555 = arith.constant 5 : i32
        %907 = arith.addi %906, %c5_i32_555 : i32
        %908 = arith.index_cast %905 : i32 to index
        %909 = arith.index_cast %907 : i32 to index
        %c0_556 = arith.constant 0 : index
        %c0_557 = arith.constant 0 : index
        %c0_558 = arith.constant 0 : index
        %910 = vector.load %arg5[%908, %909, %c0_556, %c0_557, %c0_558] : memref<14x14x1x8x128xf32, #tpu.memory_space<vmem>>, vector<1x1x1x8x128xf32>
        %911 = vector.shape_cast %910 : vector<1x1x1x8x128xf32> to vector<1x8x128xf32>
        %912 = vector.shape_cast %894 : vector<8x128xf32> to vector<1x8x128xf32>
        %913 = arith.mulf %911, %912 : vector<1x8x128xf32>
        %914 = arith.addf %868, %913 : vector<1x8x128xf32>
        %915 = arith.index_cast %7 : i32 to index
        %c39 = arith.constant 39 : index
        %c0_559 = arith.constant 0 : index
        %c0_560 = arith.constant 0 : index
        %916 = vector.load %arg2[%915, %c39, %c0_559, %c0_560] : memref<2x49x8x128xf32, #tpu.memory_space<vmem>>, vector<1x1x8x128xf32>
        %917 = vector.shape_cast %916 : vector<1x1x8x128xf32> to vector<8x128xf32>
        %c8_i32_561 = arith.constant 8 : i32
        %918 = arith.addi %c8_i32_561, %7 : i32
        %c0_i32_562 = arith.constant 0 : i32
        %919 = arith.addi %15, %c0_i32_562 : i32
        %c5_i32_563 = arith.constant 5 : i32
        %920 = arith.addi %919, %c5_i32_563 : i32
        %921 = arith.index_cast %918 : i32 to index
        %922 = arith.index_cast %920 : i32 to index
        %c0_564 = arith.constant 0 : index
        %c0_565 = arith.constant 0 : index
        %c0_566 = arith.constant 0 : index
        %923 = vector.load %arg5[%921, %922, %c0_564, %c0_565, %c0_566] : memref<14x14x1x8x128xf32, #tpu.memory_space<vmem>>, vector<1x1x1x8x128xf32>
        %924 = vector.shape_cast %923 : vector<1x1x1x8x128xf32> to vector<1x8x128xf32>
        %925 = vector.shape_cast %917 : vector<8x128xf32> to vector<1x8x128xf32>
        %926 = arith.mulf %924, %925 : vector<1x8x128xf32>
        %927 = arith.addf %881, %926 : vector<1x8x128xf32>
        %c8_i32_567 = arith.constant 8 : i32
        %928 = arith.addi %c8_i32_567, %7 : i32
        %c1_i32_568 = arith.constant 1 : i32
        %929 = arith.addi %15, %c1_i32_568 : i32
        %c5_i32_569 = arith.constant 5 : i32
        %930 = arith.addi %929, %c5_i32_569 : i32
        %931 = arith.index_cast %928 : i32 to index
        %932 = arith.index_cast %930 : i32 to index
        %c0_570 = arith.constant 0 : index
        %c0_571 = arith.constant 0 : index
        %c0_572 = arith.constant 0 : index
        %933 = vector.load %arg5[%931, %932, %c0_570, %c0_571, %c0_572] : memref<14x14x1x8x128xf32, #tpu.memory_space<vmem>>, vector<1x1x1x8x128xf32>
        %934 = vector.shape_cast %933 : vector<1x1x1x8x128xf32> to vector<1x8x128xf32>
        %935 = vector.shape_cast %917 : vector<8x128xf32> to vector<1x8x128xf32>
        %936 = arith.mulf %934, %935 : vector<1x8x128xf32>
        %937 = arith.addf %891, %936 : vector<1x8x128xf32>
        %938 = arith.index_cast %7 : i32 to index
        %c40 = arith.constant 40 : index
        %c0_573 = arith.constant 0 : index
        %c0_574 = arith.constant 0 : index
        %939 = vector.load %arg2[%938, %c40, %c0_573, %c0_574] : memref<2x49x8x128xf32, #tpu.memory_space<vmem>>, vector<1x1x8x128xf32>
        %940 = vector.shape_cast %939 : vector<1x1x8x128xf32> to vector<8x128xf32>
        %c10_i32_575 = arith.constant 10 : i32
        %941 = arith.addi %c10_i32_575, %7 : i32
        %c0_i32_576 = arith.constant 0 : i32
        %942 = arith.addi %15, %c0_i32_576 : i32
        %c5_i32_577 = arith.constant 5 : i32
        %943 = arith.addi %942, %c5_i32_577 : i32
        %944 = arith.index_cast %941 : i32 to index
        %945 = arith.index_cast %943 : i32 to index
        %c0_578 = arith.constant 0 : index
        %c0_579 = arith.constant 0 : index
        %c0_580 = arith.constant 0 : index
        %946 = vector.load %arg5[%944, %945, %c0_578, %c0_579, %c0_580] : memref<14x14x1x8x128xf32, #tpu.memory_space<vmem>>, vector<1x1x1x8x128xf32>
        %947 = vector.shape_cast %946 : vector<1x1x1x8x128xf32> to vector<1x8x128xf32>
        %948 = vector.shape_cast %940 : vector<8x128xf32> to vector<1x8x128xf32>
        %949 = arith.mulf %947, %948 : vector<1x8x128xf32>
        %950 = arith.addf %904, %949 : vector<1x8x128xf32>
        %c10_i32_581 = arith.constant 10 : i32
        %951 = arith.addi %c10_i32_581, %7 : i32
        %c1_i32_582 = arith.constant 1 : i32
        %952 = arith.addi %15, %c1_i32_582 : i32
        %c5_i32_583 = arith.constant 5 : i32
        %953 = arith.addi %952, %c5_i32_583 : i32
        %954 = arith.index_cast %951 : i32 to index
        %955 = arith.index_cast %953 : i32 to index
        %c0_584 = arith.constant 0 : index
        %c0_585 = arith.constant 0 : index
        %c0_586 = arith.constant 0 : index
        %956 = vector.load %arg5[%954, %955, %c0_584, %c0_585, %c0_586] : memref<14x14x1x8x128xf32, #tpu.memory_space<vmem>>, vector<1x1x1x8x128xf32>
        %957 = vector.shape_cast %956 : vector<1x1x1x8x128xf32> to vector<1x8x128xf32>
        %958 = vector.shape_cast %940 : vector<8x128xf32> to vector<1x8x128xf32>
        %959 = arith.mulf %957, %958 : vector<1x8x128xf32>
        %960 = arith.addf %914, %959 : vector<1x8x128xf32>
        %961 = arith.index_cast %7 : i32 to index
        %c41 = arith.constant 41 : index
        %c0_587 = arith.constant 0 : index
        %c0_588 = arith.constant 0 : index
        %962 = vector.load %arg2[%961, %c41, %c0_587, %c0_588] : memref<2x49x8x128xf32, #tpu.memory_space<vmem>>, vector<1x1x8x128xf32>
        %963 = vector.shape_cast %962 : vector<1x1x8x128xf32> to vector<8x128xf32>
        %c12_i32_589 = arith.constant 12 : i32
        %964 = arith.addi %c12_i32_589, %7 : i32
        %c0_i32_590 = arith.constant 0 : i32
        %965 = arith.addi %15, %c0_i32_590 : i32
        %c5_i32_591 = arith.constant 5 : i32
        %966 = arith.addi %965, %c5_i32_591 : i32
        %967 = arith.index_cast %964 : i32 to index
        %968 = arith.index_cast %966 : i32 to index
        %c0_592 = arith.constant 0 : index
        %c0_593 = arith.constant 0 : index
        %c0_594 = arith.constant 0 : index
        %969 = vector.load %arg5[%967, %968, %c0_592, %c0_593, %c0_594] : memref<14x14x1x8x128xf32, #tpu.memory_space<vmem>>, vector<1x1x1x8x128xf32>
        %970 = vector.shape_cast %969 : vector<1x1x1x8x128xf32> to vector<1x8x128xf32>
        %971 = vector.shape_cast %963 : vector<8x128xf32> to vector<1x8x128xf32>
        %972 = arith.mulf %970, %971 : vector<1x8x128xf32>
        %973 = arith.addf %927, %972 : vector<1x8x128xf32>
        %c12_i32_595 = arith.constant 12 : i32
        %974 = arith.addi %c12_i32_595, %7 : i32
        %c1_i32_596 = arith.constant 1 : i32
        %975 = arith.addi %15, %c1_i32_596 : i32
        %c5_i32_597 = arith.constant 5 : i32
        %976 = arith.addi %975, %c5_i32_597 : i32
        %977 = arith.index_cast %974 : i32 to index
        %978 = arith.index_cast %976 : i32 to index
        %c0_598 = arith.constant 0 : index
        %c0_599 = arith.constant 0 : index
        %c0_600 = arith.constant 0 : index
        %979 = vector.load %arg5[%977, %978, %c0_598, %c0_599, %c0_600] : memref<14x14x1x8x128xf32, #tpu.memory_space<vmem>>, vector<1x1x1x8x128xf32>
        %980 = vector.shape_cast %979 : vector<1x1x1x8x128xf32> to vector<1x8x128xf32>
        %981 = vector.shape_cast %963 : vector<8x128xf32> to vector<1x8x128xf32>
        %982 = arith.mulf %980, %981 : vector<1x8x128xf32>
        %983 = arith.addf %937, %982 : vector<1x8x128xf32>
        %984 = arith.index_cast %7 : i32 to index
        %c42 = arith.constant 42 : index
        %c0_601 = arith.constant 0 : index
        %c0_602 = arith.constant 0 : index
        %985 = vector.load %arg2[%984, %c42, %c0_601, %c0_602] : memref<2x49x8x128xf32, #tpu.memory_space<vmem>>, vector<1x1x8x128xf32>
        %986 = vector.shape_cast %985 : vector<1x1x8x128xf32> to vector<8x128xf32>
        %c0_i32_603 = arith.constant 0 : i32
        %987 = arith.addi %c0_i32_603, %7 : i32
        %c0_i32_604 = arith.constant 0 : i32
        %988 = arith.addi %15, %c0_i32_604 : i32
        %c6_i32_605 = arith.constant 6 : i32
        %989 = arith.addi %988, %c6_i32_605 : i32
        %990 = arith.index_cast %987 : i32 to index
        %991 = arith.index_cast %989 : i32 to index
        %c0_606 = arith.constant 0 : index
        %c0_607 = arith.constant 0 : index
        %c0_608 = arith.constant 0 : index
        %992 = vector.load %arg5[%990, %991, %c0_606, %c0_607, %c0_608] : memref<14x14x1x8x128xf32, #tpu.memory_space<vmem>>, vector<1x1x1x8x128xf32>
        %993 = vector.shape_cast %992 : vector<1x1x1x8x128xf32> to vector<1x8x128xf32>
        %994 = vector.shape_cast %986 : vector<8x128xf32> to vector<1x8x128xf32>
        %995 = arith.mulf %993, %994 : vector<1x8x128xf32>
        %996 = arith.addf %973, %995 : vector<1x8x128xf32>
        %c0_i32_609 = arith.constant 0 : i32
        %997 = arith.addi %c0_i32_609, %7 : i32
        %c1_i32_610 = arith.constant 1 : i32
        %998 = arith.addi %15, %c1_i32_610 : i32
        %c6_i32_611 = arith.constant 6 : i32
        %999 = arith.addi %998, %c6_i32_611 : i32
        %1000 = arith.index_cast %997 : i32 to index
        %1001 = arith.index_cast %999 : i32 to index
        %c0_612 = arith.constant 0 : index
        %c0_613 = arith.constant 0 : index
        %c0_614 = arith.constant 0 : index
        %1002 = vector.load %arg5[%1000, %1001, %c0_612, %c0_613, %c0_614] : memref<14x14x1x8x128xf32, #tpu.memory_space<vmem>>, vector<1x1x1x8x128xf32>
        %1003 = vector.shape_cast %1002 : vector<1x1x1x8x128xf32> to vector<1x8x128xf32>
        %1004 = vector.shape_cast %986 : vector<8x128xf32> to vector<1x8x128xf32>
        %1005 = arith.mulf %1003, %1004 : vector<1x8x128xf32>
        %1006 = arith.addf %983, %1005 : vector<1x8x128xf32>
        %1007 = arith.index_cast %7 : i32 to index
        %c43 = arith.constant 43 : index
        %c0_615 = arith.constant 0 : index
        %c0_616 = arith.constant 0 : index
        %1008 = vector.load %arg2[%1007, %c43, %c0_615, %c0_616] : memref<2x49x8x128xf32, #tpu.memory_space<vmem>>, vector<1x1x8x128xf32>
        %1009 = vector.shape_cast %1008 : vector<1x1x8x128xf32> to vector<8x128xf32>
        %c2_i32_617 = arith.constant 2 : i32
        %1010 = arith.addi %c2_i32_617, %7 : i32
        %c0_i32_618 = arith.constant 0 : i32
        %1011 = arith.addi %15, %c0_i32_618 : i32
        %c6_i32_619 = arith.constant 6 : i32
        %1012 = arith.addi %1011, %c6_i32_619 : i32
        %1013 = arith.index_cast %1010 : i32 to index
        %1014 = arith.index_cast %1012 : i32 to index
        %c0_620 = arith.constant 0 : index
        %c0_621 = arith.constant 0 : index
        %c0_622 = arith.constant 0 : index
        %1015 = vector.load %arg5[%1013, %1014, %c0_620, %c0_621, %c0_622] : memref<14x14x1x8x128xf32, #tpu.memory_space<vmem>>, vector<1x1x1x8x128xf32>
        %1016 = vector.shape_cast %1015 : vector<1x1x1x8x128xf32> to vector<1x8x128xf32>
        %1017 = vector.shape_cast %1009 : vector<8x128xf32> to vector<1x8x128xf32>
        %1018 = arith.mulf %1016, %1017 : vector<1x8x128xf32>
        %1019 = arith.addf %950, %1018 : vector<1x8x128xf32>
        %c2_i32_623 = arith.constant 2 : i32
        %1020 = arith.addi %c2_i32_623, %7 : i32
        %c1_i32_624 = arith.constant 1 : i32
        %1021 = arith.addi %15, %c1_i32_624 : i32
        %c6_i32_625 = arith.constant 6 : i32
        %1022 = arith.addi %1021, %c6_i32_625 : i32
        %1023 = arith.index_cast %1020 : i32 to index
        %1024 = arith.index_cast %1022 : i32 to index
        %c0_626 = arith.constant 0 : index
        %c0_627 = arith.constant 0 : index
        %c0_628 = arith.constant 0 : index
        %1025 = vector.load %arg5[%1023, %1024, %c0_626, %c0_627, %c0_628] : memref<14x14x1x8x128xf32, #tpu.memory_space<vmem>>, vector<1x1x1x8x128xf32>
        %1026 = vector.shape_cast %1025 : vector<1x1x1x8x128xf32> to vector<1x8x128xf32>
        %1027 = vector.shape_cast %1009 : vector<8x128xf32> to vector<1x8x128xf32>
        %1028 = arith.mulf %1026, %1027 : vector<1x8x128xf32>
        %1029 = arith.addf %960, %1028 : vector<1x8x128xf32>
        %1030 = arith.index_cast %7 : i32 to index
        %c44 = arith.constant 44 : index
        %c0_629 = arith.constant 0 : index
        %c0_630 = arith.constant 0 : index
        %1031 = vector.load %arg2[%1030, %c44, %c0_629, %c0_630] : memref<2x49x8x128xf32, #tpu.memory_space<vmem>>, vector<1x1x8x128xf32>
        %1032 = vector.shape_cast %1031 : vector<1x1x8x128xf32> to vector<8x128xf32>
        %c4_i32_631 = arith.constant 4 : i32
        %1033 = arith.addi %c4_i32_631, %7 : i32
        %c0_i32_632 = arith.constant 0 : i32
        %1034 = arith.addi %15, %c0_i32_632 : i32
        %c6_i32_633 = arith.constant 6 : i32
        %1035 = arith.addi %1034, %c6_i32_633 : i32
        %1036 = arith.index_cast %1033 : i32 to index
        %1037 = arith.index_cast %1035 : i32 to index
        %c0_634 = arith.constant 0 : index
        %c0_635 = arith.constant 0 : index
        %c0_636 = arith.constant 0 : index
        %1038 = vector.load %arg5[%1036, %1037, %c0_634, %c0_635, %c0_636] : memref<14x14x1x8x128xf32, #tpu.memory_space<vmem>>, vector<1x1x1x8x128xf32>
        %1039 = vector.shape_cast %1038 : vector<1x1x1x8x128xf32> to vector<1x8x128xf32>
        %1040 = vector.shape_cast %1032 : vector<8x128xf32> to vector<1x8x128xf32>
        %1041 = arith.mulf %1039, %1040 : vector<1x8x128xf32>
        %1042 = arith.addf %996, %1041 : vector<1x8x128xf32>
        %c4_i32_637 = arith.constant 4 : i32
        %1043 = arith.addi %c4_i32_637, %7 : i32
        %c1_i32_638 = arith.constant 1 : i32
        %1044 = arith.addi %15, %c1_i32_638 : i32
        %c6_i32_639 = arith.constant 6 : i32
        %1045 = arith.addi %1044, %c6_i32_639 : i32
        %1046 = arith.index_cast %1043 : i32 to index
        %1047 = arith.index_cast %1045 : i32 to index
        %c0_640 = arith.constant 0 : index
        %c0_641 = arith.constant 0 : index
        %c0_642 = arith.constant 0 : index
        %1048 = vector.load %arg5[%1046, %1047, %c0_640, %c0_641, %c0_642] : memref<14x14x1x8x128xf32, #tpu.memory_space<vmem>>, vector<1x1x1x8x128xf32>
        %1049 = vector.shape_cast %1048 : vector<1x1x1x8x128xf32> to vector<1x8x128xf32>
        %1050 = vector.shape_cast %1032 : vector<8x128xf32> to vector<1x8x128xf32>
        %1051 = arith.mulf %1049, %1050 : vector<1x8x128xf32>
        %1052 = arith.addf %1006, %1051 : vector<1x8x128xf32>
        %1053 = arith.index_cast %7 : i32 to index
        %c45 = arith.constant 45 : index
        %c0_643 = arith.constant 0 : index
        %c0_644 = arith.constant 0 : index
        %1054 = vector.load %arg2[%1053, %c45, %c0_643, %c0_644] : memref<2x49x8x128xf32, #tpu.memory_space<vmem>>, vector<1x1x8x128xf32>
        %1055 = vector.shape_cast %1054 : vector<1x1x8x128xf32> to vector<8x128xf32>
        %c6_i32_645 = arith.constant 6 : i32
        %1056 = arith.addi %c6_i32_645, %7 : i32
        %c0_i32_646 = arith.constant 0 : i32
        %1057 = arith.addi %15, %c0_i32_646 : i32
        %c6_i32_647 = arith.constant 6 : i32
        %1058 = arith.addi %1057, %c6_i32_647 : i32
        %1059 = arith.index_cast %1056 : i32 to index
        %1060 = arith.index_cast %1058 : i32 to index
        %c0_648 = arith.constant 0 : index
        %c0_649 = arith.constant 0 : index
        %c0_650 = arith.constant 0 : index
        %1061 = vector.load %arg5[%1059, %1060, %c0_648, %c0_649, %c0_650] : memref<14x14x1x8x128xf32, #tpu.memory_space<vmem>>, vector<1x1x1x8x128xf32>
        %1062 = vector.shape_cast %1061 : vector<1x1x1x8x128xf32> to vector<1x8x128xf32>
        %1063 = vector.shape_cast %1055 : vector<8x128xf32> to vector<1x8x128xf32>
        %1064 = arith.mulf %1062, %1063 : vector<1x8x128xf32>
        %1065 = arith.addf %1019, %1064 : vector<1x8x128xf32>
        %c6_i32_651 = arith.constant 6 : i32
        %1066 = arith.addi %c6_i32_651, %7 : i32
        %c1_i32_652 = arith.constant 1 : i32
        %1067 = arith.addi %15, %c1_i32_652 : i32
        %c6_i32_653 = arith.constant 6 : i32
        %1068 = arith.addi %1067, %c6_i32_653 : i32
        %1069 = arith.index_cast %1066 : i32 to index
        %1070 = arith.index_cast %1068 : i32 to index
        %c0_654 = arith.constant 0 : index
        %c0_655 = arith.constant 0 : index
        %c0_656 = arith.constant 0 : index
        %1071 = vector.load %arg5[%1069, %1070, %c0_654, %c0_655, %c0_656] : memref<14x14x1x8x128xf32, #tpu.memory_space<vmem>>, vector<1x1x1x8x128xf32>
        %1072 = vector.shape_cast %1071 : vector<1x1x1x8x128xf32> to vector<1x8x128xf32>
        %1073 = vector.shape_cast %1055 : vector<8x128xf32> to vector<1x8x128xf32>
        %1074 = arith.mulf %1072, %1073 : vector<1x8x128xf32>
        %1075 = arith.addf %1029, %1074 : vector<1x8x128xf32>
        %1076 = arith.index_cast %7 : i32 to index
        %c46 = arith.constant 46 : index
        %c0_657 = arith.constant 0 : index
        %c0_658 = arith.constant 0 : index
        %1077 = vector.load %arg2[%1076, %c46, %c0_657, %c0_658] : memref<2x49x8x128xf32, #tpu.memory_space<vmem>>, vector<1x1x8x128xf32>
        %1078 = vector.shape_cast %1077 : vector<1x1x8x128xf32> to vector<8x128xf32>
        %c8_i32_659 = arith.constant 8 : i32
        %1079 = arith.addi %c8_i32_659, %7 : i32
        %c0_i32_660 = arith.constant 0 : i32
        %1080 = arith.addi %15, %c0_i32_660 : i32
        %c6_i32_661 = arith.constant 6 : i32
        %1081 = arith.addi %1080, %c6_i32_661 : i32
        %1082 = arith.index_cast %1079 : i32 to index
        %1083 = arith.index_cast %1081 : i32 to index
        %c0_662 = arith.constant 0 : index
        %c0_663 = arith.constant 0 : index
        %c0_664 = arith.constant 0 : index
        %1084 = vector.load %arg5[%1082, %1083, %c0_662, %c0_663, %c0_664] : memref<14x14x1x8x128xf32, #tpu.memory_space<vmem>>, vector<1x1x1x8x128xf32>
        %1085 = vector.shape_cast %1084 : vector<1x1x1x8x128xf32> to vector<1x8x128xf32>
        %1086 = vector.shape_cast %1078 : vector<8x128xf32> to vector<1x8x128xf32>
        %1087 = arith.mulf %1085, %1086 : vector<1x8x128xf32>
        %1088 = arith.addf %1042, %1087 : vector<1x8x128xf32>
        %c8_i32_665 = arith.constant 8 : i32
        %1089 = arith.addi %c8_i32_665, %7 : i32
        %c1_i32_666 = arith.constant 1 : i32
        %1090 = arith.addi %15, %c1_i32_666 : i32
        %c6_i32_667 = arith.constant 6 : i32
        %1091 = arith.addi %1090, %c6_i32_667 : i32
        %1092 = arith.index_cast %1089 : i32 to index
        %1093 = arith.index_cast %1091 : i32 to index
        %c0_668 = arith.constant 0 : index
        %c0_669 = arith.constant 0 : index
        %c0_670 = arith.constant 0 : index
        %1094 = vector.load %arg5[%1092, %1093, %c0_668, %c0_669, %c0_670] : memref<14x14x1x8x128xf32, #tpu.memory_space<vmem>>, vector<1x1x1x8x128xf32>
        %1095 = vector.shape_cast %1094 : vector<1x1x1x8x128xf32> to vector<1x8x128xf32>
        %1096 = vector.shape_cast %1078 : vector<8x128xf32> to vector<1x8x128xf32>
        %1097 = arith.mulf %1095, %1096 : vector<1x8x128xf32>
        %1098 = arith.addf %1052, %1097 : vector<1x8x128xf32>
        %1099 = arith.index_cast %7 : i32 to index
        %c47 = arith.constant 47 : index
        %c0_671 = arith.constant 0 : index
        %c0_672 = arith.constant 0 : index
        %1100 = vector.load %arg2[%1099, %c47, %c0_671, %c0_672] : memref<2x49x8x128xf32, #tpu.memory_space<vmem>>, vector<1x1x8x128xf32>
        %1101 = vector.shape_cast %1100 : vector<1x1x8x128xf32> to vector<8x128xf32>
        %c10_i32_673 = arith.constant 10 : i32
        %1102 = arith.addi %c10_i32_673, %7 : i32
        %c0_i32_674 = arith.constant 0 : i32
        %1103 = arith.addi %15, %c0_i32_674 : i32
        %c6_i32_675 = arith.constant 6 : i32
        %1104 = arith.addi %1103, %c6_i32_675 : i32
        %1105 = arith.index_cast %1102 : i32 to index
        %1106 = arith.index_cast %1104 : i32 to index
        %c0_676 = arith.constant 0 : index
        %c0_677 = arith.constant 0 : index
        %c0_678 = arith.constant 0 : index
        %1107 = vector.load %arg5[%1105, %1106, %c0_676, %c0_677, %c0_678] : memref<14x14x1x8x128xf32, #tpu.memory_space<vmem>>, vector<1x1x1x8x128xf32>
        %1108 = vector.shape_cast %1107 : vector<1x1x1x8x128xf32> to vector<1x8x128xf32>
        %1109 = vector.shape_cast %1101 : vector<8x128xf32> to vector<1x8x128xf32>
        %1110 = arith.mulf %1108, %1109 : vector<1x8x128xf32>
        %1111 = arith.addf %1065, %1110 : vector<1x8x128xf32>
        %c10_i32_679 = arith.constant 10 : i32
        %1112 = arith.addi %c10_i32_679, %7 : i32
        %c1_i32_680 = arith.constant 1 : i32
        %1113 = arith.addi %15, %c1_i32_680 : i32
        %c6_i32_681 = arith.constant 6 : i32
        %1114 = arith.addi %1113, %c6_i32_681 : i32
        %1115 = arith.index_cast %1112 : i32 to index
        %1116 = arith.index_cast %1114 : i32 to index
        %c0_682 = arith.constant 0 : index
        %c0_683 = arith.constant 0 : index
        %c0_684 = arith.constant 0 : index
        %1117 = vector.load %arg5[%1115, %1116, %c0_682, %c0_683, %c0_684] : memref<14x14x1x8x128xf32, #tpu.memory_space<vmem>>, vector<1x1x1x8x128xf32>
        %1118 = vector.shape_cast %1117 : vector<1x1x1x8x128xf32> to vector<1x8x128xf32>
        %1119 = vector.shape_cast %1101 : vector<8x128xf32> to vector<1x8x128xf32>
        %1120 = arith.mulf %1118, %1119 : vector<1x8x128xf32>
        %1121 = arith.addf %1075, %1120 : vector<1x8x128xf32>
        %1122 = arith.index_cast %7 : i32 to index
        %c48 = arith.constant 48 : index
        %c0_685 = arith.constant 0 : index
        %c0_686 = arith.constant 0 : index
        %1123 = vector.load %arg2[%1122, %c48, %c0_685, %c0_686] : memref<2x49x8x128xf32, #tpu.memory_space<vmem>>, vector<1x1x8x128xf32>
        %1124 = vector.shape_cast %1123 : vector<1x1x8x128xf32> to vector<8x128xf32>
        %c12_i32_687 = arith.constant 12 : i32
        %1125 = arith.addi %c12_i32_687, %7 : i32
        %c0_i32_688 = arith.constant 0 : i32
        %1126 = arith.addi %15, %c0_i32_688 : i32
        %c6_i32_689 = arith.constant 6 : i32
        %1127 = arith.addi %1126, %c6_i32_689 : i32
        %1128 = arith.index_cast %1125 : i32 to index
        %1129 = arith.index_cast %1127 : i32 to index
        %c0_690 = arith.constant 0 : index
        %c0_691 = arith.constant 0 : index
        %c0_692 = arith.constant 0 : index
        %1130 = vector.load %arg5[%1128, %1129, %c0_690, %c0_691, %c0_692] : memref<14x14x1x8x128xf32, #tpu.memory_space<vmem>>, vector<1x1x1x8x128xf32>
        %1131 = vector.shape_cast %1130 : vector<1x1x1x8x128xf32> to vector<1x8x128xf32>
        %1132 = vector.shape_cast %1124 : vector<8x128xf32> to vector<1x8x128xf32>
        %1133 = arith.mulf %1131, %1132 : vector<1x8x128xf32>
        %1134 = arith.addf %1088, %1133 : vector<1x8x128xf32>
        %c12_i32_693 = arith.constant 12 : i32
        %1135 = arith.addi %c12_i32_693, %7 : i32
        %c1_i32_694 = arith.constant 1 : i32
        %1136 = arith.addi %15, %c1_i32_694 : i32
        %c6_i32_695 = arith.constant 6 : i32
        %1137 = arith.addi %1136, %c6_i32_695 : i32
        %1138 = arith.index_cast %1135 : i32 to index
        %1139 = arith.index_cast %1137 : i32 to index
        %c0_696 = arith.constant 0 : index
        %c0_697 = arith.constant 0 : index
        %c0_698 = arith.constant 0 : index
        %1140 = vector.load %arg5[%1138, %1139, %c0_696, %c0_697, %c0_698] : memref<14x14x1x8x128xf32, #tpu.memory_space<vmem>>, vector<1x1x1x8x128xf32>
        %1141 = vector.shape_cast %1140 : vector<1x1x1x8x128xf32> to vector<1x8x128xf32>
        %1142 = vector.shape_cast %1124 : vector<8x128xf32> to vector<1x8x128xf32>
        %1143 = arith.mulf %1141, %1142 : vector<1x8x128xf32>
        %1144 = arith.addf %1098, %1143 : vector<1x8x128xf32>
        %1145 = arith.addf %1134, %1111 : vector<1x8x128xf32>
        %c0_i32_699 = arith.constant 0 : i32
        %1146 = arith.addi %15, %c0_i32_699 : i32
        %1147 = arith.index_cast %7 : i32 to index
        %1148 = arith.index_cast %1146 : i32 to index
        %c0_700 = arith.constant 0 : index
        %c0_701 = arith.constant 0 : index
        %c0_702 = arith.constant 0 : index
        %1149 = vector.load %arg4[%1147, %1148, %c0_700, %c0_701, %c0_702] : memref<2x8x1x8x128xf32, #tpu.memory_space<vmem>>, vector<1x1x1x8x128xf32>
        %1150 = vector.shape_cast %1149 : vector<1x1x1x8x128xf32> to vector<1x8x128xf32>
        %1151 = vector.shape_cast %1145 : vector<1x8x128xf32> to vector<1x1x1x8x128xf32>
        tpu.vector_store %arg4[%1147, %1148, %c0_700, %c0_701, %c0_702], %1151 {strides = array<i32>} : memref<2x8x1x8x128xf32, #tpu.memory_space<vmem>>, vector<1x1x1x8x128xf32>,
        %1152 = arith.addf %1144, %1121 : vector<1x8x128xf32>
        %c1_i32_703 = arith.constant 1 : i32
        %1153 = arith.addi %15, %c1_i32_703 : i32
        %1154 = arith.index_cast %7 : i32 to index
        %1155 = arith.index_cast %1153 : i32 to index
        %c0_704 = arith.constant 0 : index
        %c0_705 = arith.constant 0 : index
        %c0_706 = arith.constant 0 : index
        %1156 = vector.load %arg4[%1154, %1155, %c0_704, %c0_705, %c0_706] : memref<2x8x1x8x128xf32, #tpu.memory_space<vmem>>, vector<1x1x1x8x128xf32>
        %1157 = vector.shape_cast %1156 : vector<1x1x1x8x128xf32> to vector<1x8x128xf32>
        %1158 = vector.shape_cast %1152 : vector<1x8x128xf32> to vector<1x1x1x8x128xf32>
        tpu.vector_store %arg4[%1154, %1155, %c0_704, %c0_705, %c0_706], %1158 {strides = array<i32>} : memref<2x8x1x8x128xf32, #tpu.memory_space<vmem>>, vector<1x1x1x8x128xf32>,
      }
      %c4_i32_12 = arith.constant 4 : i32
    }
    %c2_i32_6 = arith.constant 2 : i32
    return
  }
  func.func @transform_0(%arg0: i32) -> (i32, i32, i32, i32) {
    %c0_i32 = arith.constant 0 : i32
    %c0_i32_0 = arith.constant 0 : i32
    %c0_i32_1 = arith.constant 0 : i32
    %c0_i32_2 = arith.constant 0 : i32
    return %arg0, %c0_i32, %c0_i32_0, %c0_i32_1 : i32, i32, i32, i32
  }
  func.func @transform_1(%arg0: i32) -> (i32, i32, i32, i32) {
    %c0_i32 = arith.constant 0 : i32
    %c0_i32_0 = arith.constant 0 : i32
    %c0_i32_1 = arith.constant 0 : i32
    %c0_i32_2 = arith.constant 0 : i32
    return %arg0, %c0_i32, %c0_i32_0, %c0_i32_1 : i32, i32, i32, i32
  }
  func.func @transform_2(%arg0: i32) -> (i32, i32, i32) {
    %c0_i32 = arith.constant 0 : i32
    %c0_i32_0 = arith.constant 0 : i32
    %c0_i32_1 = arith.constant 0 : i32
    return %arg0, %c0_i32, %c0_i32_0 : i32, i32, i32
  }
  func.func @transform_3(%arg0: i32) -> (i32, i32, i32, i32, i32) {
    %c0_i32 = arith.constant 0 : i32
    %c0_i32_0 = arith.constant 0 : i32
    %c0_i32_1 = arith.constant 0 : i32
    %c0_i32_2 = arith.constant 0 : i32
    %c0_i32_3 = arith.constant 0 : i32
    return %arg0, %c0_i32, %c0_i32_0, %c0_i32_1, %c0_i32_2 : i32, i32, i32, i32, i32
  }
}

</mosaic_0001>

<bundles_post_ra>
// kernel: tpu_custom_call.1
= control target key start
LH: loop header
LB: loop body
LE: loop exit
PB: predicated region body
PF: predicated region fallthrough
CT: control target
= control target key end

     0   :  { %s2770_s0 = inlined_call_operand.hbm [shape: f32[4,8,8,128], index: 0, kind: input, shape index: {}]   ;;  %s2771_s1 = inlined_call_operand.hbm [shape: f32[4,49,8,128], index: 1, kind: input, shape index: {}]   ;;  %s2772_s2 = inlined_call_operand.hbm [shape: f32[4,8,128], index: 2, kind: input, shape index: {}]   ;;  %s2773_s3 = inlined_call_operand.hbm [shape: f32[4,8,1,8,128], index: 3, kind: output, shape index: {}]  }
   0x1   :  { %2775 = sst [smem:[#allocation15_spill]] %s2771_s1 }
   0x2   :  { %8 = vsyncpa [#allocation4], 0 }
   0x3   :  { %10 = vsyncpa [#allocation4 + $0x1], 0 }
   0x4   :  { %11 = vsyncpa [#allocation7], 0 }
   0x5   :  { %13 = vsyncpa [#allocation7 + $0x1], 0 }
   0x6   :  { %14 = vsyncpa [#allocation5], 0 }
   0x7   :  { %16 = vsyncpa [#allocation5 + $0x1], 0  ;;  %s2308_s12 = smov 0   ;;  %s2310_s13 = smov 0  }
   0x8   :  { %s2312_s14 = smov 0   ;;  %s2314_s15 = smov 0  }
   0x9 LB: > { %2776 = sst [smem:[#allocation13_spill]] %s2261_s14  ;;  %s2329_s16 = sadd.s32 4294967295, %s2265_s15   ;;  %s2265_s15 = sphi %s2314_s15, %s2788_s15   ;;  %s2261_s14 = sphi %s2312_s14, %s2785_s14   ;;  %s2257_s13 = sphi %s2310_s13, %s2787_s13   ;;  %s2253_s12 = sphi %s2308_s12, %s2786_s12  }
   0xa   : > { %s1682_s17 = sadd.s32 4294967294, %s2265_s15   ;;  %s2333_s18 = sadd.s32 1, %s2265_s15  }
   0xb   : > { %s29_s19 = sadd.s32 1, %s2261_s14  ;;  %s26_s20 = ssub.s32 %s2265_s15, %s2333_s18 }
   0xc   : > { %p36_p0 = scmp.ne.s32.totalorder %s2261_s14, %s2257_s13  ;;  %p27_p1 = scmp.eq.s32.totalorder %s26_s20, 0 }
   0xd   : > { %p37_p2 = scmp.eq.s32.totalorder %s2265_s15, 0  ;;  %p42_p3 = scmp.ne.s32.totalorder %s2257_s13, %s2253_s12 }
   0xe   : > { %p43_p4 = scmp.eq.s32.totalorder %s2329_s16, 0  ;;  %p118_p7 = scmp.eq.s32.totalorder %s2329_s16, 1 }
   0xf   : > { %s2345_s21 = scalar_select %p27_p1, %s2261_s14, %s29_s19  }
  0x10   : > { %p38_p5 = por %p37_p2, %p36_p0  ;;  %p2347_p6 = por %p43_p4, %p42_p3 }
  0x11   : > { %2777 = sst [smem:[#allocation14_spill]] %s2345_s21  ;;  %p124_p8 = scmp.eq.s32.totalorder %s1682_s17, 1 }
  0x12   : > { %p1684_p9 = scmp.ge.s32.totalorder %s2265_s15, 2  ;;  %p2018_p10 = scmp.lt.s32.totalorder %s2265_s15, 2 }
  0x13   : > { %p2354_p11 = por %p118_p7, %p36_p0  ;;  %p2358_p12 = por %p124_p8, %p42_p3 }
  0x14   : > { %s2363_s25 = sand.u32 1, %s2261_s14   ;;  %p2365_p13 = pnand %p2018_p10, %p38_p5 }
  0x15   : > { %s167_s27 = sand.u32 1, %s2265_s15   ;;  %s1993_s28 = smul.u32 784, %s2363_s25 }
  0x16   : > { %s1994_s29 = smul.u32 784, %s2265_s15  ;;  %p1695_p0 = scmp.ge.s32.totalorder %s2265_s15, 1 }
  0x17   : > { %p210_p1 = scmp.lt.s32.totalorder %s2265_s15, 3  ;;  %s2782_s1 = sld [smem:[#allocation15_spill]] }
  0x18   : > { %s171_s6 = scalar_lea.vmem [#allocation6], %s1993_s28  ;;  %s2381_s10 = scalar_lea.sflag [#allocation7], %s167_s27 }
  0x19   : > { %s180_s7 = sshll.u32 %s171_s6, 4  ;;  %p2377_p2 = pnand %p1695_p0, %p210_p1  ;;  %s181_s7 = int_to_ptr.vmem [resolvable:$true] %s180_s7 }
  0x1a   : > { %p2093_p4 = pneg %p2365_p13 }
  0x1d   : > { %s177_s5 = scalar_lea.hbm %s2782_s1, %s1994_s29  ;;  %s2096_s28 = scalar_lea.hbm %s2782_s1, 1568 }
  0x1e   : > { %s178_s8 = sshll.u32 %s177_s5, 4  ;;  %s179_s8 = int_to_ptr.hbm [resolvable:$true] %s178_s8 }
  0x1f   : > { %s2089_s11 = sshra.s32 %s179_s8, 4  ;;  %s2090_s11 = int_to_ptr.hbm [resolvable:$true] %s2089_s11 }
  0x20   : > { %s2091_s17 = scalar_lea.hbm %s2090_s11, 784  ;;  %p2097_p8 = scmp.lt.s32.totalorder %s2090_s11, %s2782_s1 }
  0x21   : > { %p2092_p3 = scmp.ne.s32.totalorder %s2090_s11, %s2091_s17  ;;  %p2098_p10 = scmp.lt.s32.totalorder %s2096_s28, %s2091_s17 }
  0x23   : > { %p2094_p5 = pnand %p2093_p4, %p2092_p3  ;;  %p2099_p0 = por %p2098_p10, %p2097_p8 }
  0x25   : > { %p2095_p7 = pneg %p2094_p5 }
  0x27   : > { %p2100_p1 = pnand %p2099_p0, %p2095_p7 }
  0x29   : > { %2103 = shalt.err (!%p2100_p1)
}
  0x2a   : > { %s2283_s27 = smov 128   ;;  %s2284_s4 = smov 8  }
  0x2b   : > { %2010 = dma.hbm_to_vmem [thread:$0]  (!%p2365_p13), %s179_s8, 12544, %s181_s7, %s2381_s10, %s2283_s27, %s2283_s27, %s2284_s4  }
  0x2c   : > { %s1685_s5 = sshll.u32 %s2363_s25, 7  ;;  %s1938_s6 = sshll.u32 %s2265_s15, 7 }
  0x2d   : > { %s154_s19 = scalar_lea.hbm %s2770_s0, %s1938_s6  ;;  %s148_s20 = scalar_lea.vmem [#allocation3], %s1685_s5 }
  0x2e   : > { %s157_s28 = sshll.u32 %s148_s20, 4  ;;  %s155_s29 = sshll.u32 %s154_s19, 4  ;;  %s158_s28 = int_to_ptr.vmem [resolvable:$true] %s157_s28  ;;  %s156_s29 = int_to_ptr.hbm [resolvable:$true] %s155_s29 }
  0x2f   : > { %s1692_s30 = sshll.u32 %s2363_s25, 4  ;;  %s145_s1 = scalar_lea.sflag [#allocation4], %s2363_s25 }
  0x30   : > { %s2119_s21 = sshra.s32 %s156_s29, 4  ;;  %s2126_s11 = scalar_lea.hbm %s2770_s0, 256  ;;  %s2120_s21 = int_to_ptr.hbm [resolvable:$true] %s2119_s21 }
  0x31   : > { %s2121_s14 = scalar_lea.hbm %s2120_s21, 128  ;;  %p2127_p8 = scmp.lt.s32.totalorder %s2120_s21, %s2770_s0 }
  0x32   : > { %p2122_p3 = scmp.ne.s32.totalorder %s2120_s21, %s2121_s14  ;;  %p2128_p10 = scmp.lt.s32.totalorder %s2126_s11, %s2121_s14 }
  0x34   : > { %p2124_p5 = pnand %p2122_p3, %p2093_p4  ;;  %p2129_p0 = por %p2128_p10, %p2127_p8 }
  0x36   : > { %p2125_p7 = pneg %p2124_p5 }
  0x38   : > { %p2130_p1 = pnand %p2129_p0, %p2125_p7 }
  0x3a   : > { %2133 = shalt.err (!%p2130_p1)
}
  0x3b   : > { %2007 = dma.hbm_to_vmem [thread:$0]  (!%p2365_p13), %s156_s29, 2048, %s158_s28, %s145_s1, %s2283_s27, %s2283_s27, %s2284_s4  }
  0x3c   : > { %s1939_s25 = sshll.u32 %s2265_s15, 4  ;;  %s194_s7 = scalar_lea.vmem [#allocation8], %s1692_s30 }
  0x3d   : > { %s199_s20 = scalar_lea.hbm %s2772_s2, %s1939_s25  ;;  %s202_s8 = sshll.u32 %s194_s7, 4  ;;  %s203_s8 = int_to_ptr.vmem [resolvable:$true] %s202_s8 }
  0x3e   : > { %s200_s21 = sshll.u32 %s199_s20, 4  ;;  %s2156_s28 = scalar_lea.hbm %s2772_s2, 32  ;;  %s201_s21 = int_to_ptr.hbm [resolvable:$true] %s200_s21 }
  0x3f   : > { %s2149_s14 = sshra.s32 %s201_s21, 4  ;;  %s2150_s14 = int_to_ptr.hbm [resolvable:$true] %s2149_s14 }
  0x40   : > { %s2151_s11 = scalar_lea.hbm %s2150_s14, 16  ;;  %p2157_p8 = scmp.lt.s32.totalorder %s2150_s14, %s2772_s2 }
  0x41   : > { %p2152_p3 = scmp.ne.s32.totalorder %s2150_s14, %s2151_s11  ;;  %p2158_p10 = scmp.lt.s32.totalorder %s2156_s28, %s2151_s11 }
  0x43   : > { %p2154_p5 = pnand %p2152_p3, %p2093_p4  ;;  %p2159_p0 = por %p2158_p10, %p2157_p8 }
  0x45   : > { %p2155_p7 = pneg %p2154_p5 }
  0x47   : > { %p2160_p1 = pnand %p2159_p0, %p2155_p7 }
  0x49   : > { %2163 = shalt.err (!%p2160_p1)
}
  0x4a   : > { %2013 = dma.hbm_to_vmem [thread:$0]  (!%p2365_p13), %s201_s21, 256, %s203_s8, %s2381_s10, %s2283_s27, %s2283_s27, %s2284_s4  }
  0x4b   : > { %214 = sbr.rel (%p2377_p2) target bundleno = 286 (0x11e), region = 32  ;;  %s2443_s30 = sand.u32 (!%p2377_p2), 1, %s2257_s13  }
  0x4c   : > { %s1696_s25 = sshll.u32 (!%p2377_p2), %s2443_s30, 7  ;;  %s217_s17 = scalar_lea.sflag (!%p2377_p2), [#allocation4], %s2443_s30 }
  0x4d   : > { %s2447_s19 = scalar_lea.vmem (!%p2377_p2), [#allocation3], %s1696_s25 }
  0x50   : > { %2240 = dma.done.wait (%p2347_p6), %s217_s17, 2048  }
  0x51   : > { %2242 = vsyncadd (%p2347_p6), %s217_s17, 4294965248  ;;  %s226_s26 = sand.u32 1, %s2329_s16   ;;  %s1995_s9 = smul.u32 784, %s2443_s30 }
  0x52   : > { %s227_s10 = scalar_lea.sflag [#allocation7], %s226_s26 }
  0x53   : > { %s2455_s27 = scalar_lea.vmem [#allocation6], %s1995_s9 }
  0x54   : > { %2244 = dma.done.wait (%p2347_p6), %s227_s10, 12800  }
  0x55   : > { %2246 = vsyncadd (%p2347_p6), %s227_s10, 4294954496  ;;  %s1697_s4 = sshll.u32 %s2443_s30, 4  ;;  %s2464_s7 = scalar_lea.vmem [#allocation9], %s1696_s25 }
  0x56   : > { %s2462_s20 = scalar_lea.vmem [#allocation8], %s1697_s4  ;;  %p1699_p13 = scmp.ne.s32.totalorder %s2329_s16, 0 }
  0x58   : > { %281 = sbr.rel (%p1699_p13) target bundleno = 178 (0xb2), region = 48 }
  0x5d   : > { %v2285_v0 = vmov 0.0  }
  0x5e   : > { %282 = vst [vmem:[#allocation2] sm:$0xff] %v2285_v0 }
  0x5f   : > { %283 = vst [vmem:[#allocation2 + $0x8] sm:$0xff] %v2285_v0 }
  0x60   : > { %284 = vst [vmem:[#allocation2 + $0x10] sm:$0xff] %v2285_v0 }
  0x61   : > { %285 = vst [vmem:[#allocation2 + $0x70] sm:$0xff] %v2285_v0 }
  0x62   : > { %286 = vst [vmem:[#allocation2 + $0x78] sm:$0xff] %v2285_v0 }
  0x63   : > { %287 = vst [vmem:[#allocation2 + $0x80] sm:$0xff] %v2285_v0 }
  0x64   : > { %288 = vst [vmem:[#allocation2 + $0xe0] sm:$0xff] %v2285_v0 }
  0x65   : > { %289 = vst [vmem:[#allocation2 + $0xe8] sm:$0xff] %v2285_v0 }
  0x66   : > { %290 = vst [vmem:[#allocation2 + $0xf0] sm:$0xff] %v2285_v0 }
  0x67   : > { %291 = vst [vmem:[#allocation2 + $0x150] sm:$0xff] %v2285_v0 }
  0x68   : > { %292 = vst [vmem:[#allocation2 + $0x158] sm:$0xff] %v2285_v0 }
  0x69   : > { %293 = vst [vmem:[#allocation2 + $0x160] sm:$0xff] %v2285_v0 }
  0x6a   : > { %294 = vst [vmem:[#allocation2 + $0x1c0] sm:$0xff] %v2285_v0 }
  0x6b   : > { %295 = vst [vmem:[#allocation2 + $0x1c8] sm:$0xff] %v2285_v0 }
  0x6c   : > { %296 = vst [vmem:[#allocation2 + $0x1d0] sm:$0xff] %v2285_v0 }
  0x6d   : > { %297 = vst [vmem:[#allocation2 + $0x230] sm:$0xff] %v2285_v0 }
  0x6e   : > { %298 = vst [vmem:[#allocation2 + $0x238] sm:$0xff] %v2285_v0 }
  0x6f   : > { %299 = vst [vmem:[#allocation2 + $0x240] sm:$0xff] %v2285_v0 }
  0x70   : > { %300 = vst [vmem:[#allocation2 + $0x2a0] sm:$0xff] %v2285_v0 }
  0x71   : > { %301 = vst [vmem:[#allocation2 + $0x2a8] sm:$0xff] %v2285_v0 }
  0x72   : > { %302 = vst [vmem:[#allocation2 + $0x2b0] sm:$0xff] %v2285_v0 }
  0x73   : > { %303 = vst [vmem:[#allocation2 + $0x310] sm:$0xff] %v2285_v0 }
  0x74   : > { %304 = vst [vmem:[#allocation2 + $0x318] sm:$0xff] %v2285_v0 }
  0x75   : > { %305 = vst [vmem:[#allocation2 + $0x320] sm:$0xff] %v2285_v0 }
  0x76   : > { %306 = vst [vmem:[#allocation2 + $0x380] sm:$0xff] %v2285_v0 }
  0x77   : > { %307 = vst [vmem:[#allocation2 + $0x388] sm:$0xff] %v2285_v0 }
  0x78   : > { %308 = vst [vmem:[#allocation2 + $0x390] sm:$0xff] %v2285_v0 }
  0x79   : > { %309 = vst [vmem:[#allocation2 + $0x3f0] sm:$0xff] %v2285_v0 }
  0x7a   : > { %310 = vst [vmem:[#allocation2 + $0x3f8] sm:$0xff] %v2285_v0 }
  0x7b   : > { %311 = vst [vmem:[#allocation2 + $0x400] sm:$0xff] %v2285_v0 }
  0x7c   : > { %312 = vst [vmem:[#allocation2 + $0x460] sm:$0xff] %v2285_v0 }
  0x7d   : > { %313 = vst [vmem:[#allocation2 + $0x468] sm:$0xff] %v2285_v0 }
  0x7e   : > { %314 = vst [vmem:[#allocation2 + $0x470] sm:$0xff] %v2285_v0 }
  0x7f   : > { %315 = vst [vmem:[#allocation2 + $0x4d0] sm:$0xff] %v2285_v0 }
  0x80   : > { %316 = vst [vmem:[#allocation2 + $0x4d8] sm:$0xff] %v2285_v0 }
  0x81   : > { %317 = vst [vmem:[#allocation2 + $0x4e0] sm:$0xff] %v2285_v0 }
  0x82   : > { %318 = vst [vmem:[#allocation2 + $0x540] sm:$0xff] %v2285_v0 }
  0x83   : > { %319 = vst [vmem:[#allocation2 + $0x548] sm:$0xff] %v2285_v0 }
  0x84   : > { %320 = vst [vmem:[#allocation2 + $0x550] sm:$0xff] %v2285_v0 }
  0x85   : > { %321 = vst [vmem:[#allocation2 + $0x5b0] sm:$0xff] %v2285_v0 }
  0x86   : > { %322 = vst [vmem:[#allocation2 + $0x5b8] sm:$0xff] %v2285_v0 }
  0x87   : > { %323 = vst [vmem:[#allocation2 + $0x5c0] sm:$0xff] %v2285_v0 }
  0x88   : > { %325 = vst [vmem:[#allocation2 + $0x58] sm:$0xff] %v2285_v0 }
  0x89   : > { %326 = vst [vmem:[#allocation2 + $0x60] sm:$0xff] %v2285_v0 }
  0x8a   : > { %327 = vst [vmem:[#allocation2 + $0x68] sm:$0xff] %v2285_v0 }
  0x8b   : > { %328 = vst [vmem:[#allocation2 + $0xc8] sm:$0xff] %v2285_v0 }
  0x8c   : > { %329 = vst [vmem:[#allocation2 + $0xd0] sm:$0xff] %v2285_v0 }
  0x8d   : > { %330 = vst [vmem:[#allocation2 + $0xd8] sm:$0xff] %v2285_v0 }
  0x8e   : > { %331 = vst [vmem:[#allocation2 + $0x138] sm:$0xff] %v2285_v0 }
  0x8f   : > { %332 = vst [vmem:[#allocation2 + $0x140] sm:$0xff] %v2285_v0 }
  0x90   : > { %333 = vst [vmem:[#allocation2 + $0x148] sm:$0xff] %v2285_v0 }
  0x91   : > { %334 = vst [vmem:[#allocation2 + $0x1a8] sm:$0xff] %v2285_v0 }
  0x92   : > { %335 = vst [vmem:[#allocation2 + $0x1b0] sm:$0xff] %v2285_v0 }
  0x93   : > { %336 = vst [vmem:[#allocation2 + $0x1b8] sm:$0xff] %v2285_v0 }
  0x94   : > { %337 = vst [vmem:[#allocation2 + $0x218] sm:$0xff] %v2285_v0 }
  0x95   : > { %338 = vst [vmem:[#allocation2 + $0x220] sm:$0xff] %v2285_v0 }
  0x96   : > { %339 = vst [vmem:[#allocation2 + $0x228] sm:$0xff] %v2285_v0 }
  0x97   : > { %340 = vst [vmem:[#allocation2 + $0x288] sm:$0xff] %v2285_v0 }
  0x98   : > { %341 = vst [vmem:[#allocation2 + $0x290] sm:$0xff] %v2285_v0 }
  0x99   : > { %342 = vst [vmem:[#allocation2 + $0x298] sm:$0xff] %v2285_v0 }
  0x9a   : > { %343 = vst [vmem:[#allocation2 + $0x2f8] sm:$0xff] %v2285_v0 }
  0x9b   : > { %344 = vst [vmem:[#allocation2 + $0x300] sm:$0xff] %v2285_v0 }
  0x9c   : > { %345 = vst [vmem:[#allocation2 + $0x308] sm:$0xff] %v2285_v0 }
  0x9d   : > { %346 = vst [vmem:[#allocation2 + $0x368] sm:$0xff] %v2285_v0 }
  0x9e   : > { %347 = vst [vmem:[#allocation2 + $0x370] sm:$0xff] %v2285_v0 }
  0x9f   : > { %348 = vst [vmem:[#allocation2 + $0x378] sm:$0xff] %v2285_v0 }
  0xa0   : > { %349 = vst [vmem:[#allocation2 + $0x3d8] sm:$0xff] %v2285_v0 }
  0xa1   : > { %350 = vst [vmem:[#allocation2 + $0x3e0] sm:$0xff] %v2285_v0 }
  0xa2   : > { %351 = vst [vmem:[#allocation2 + $0x3e8] sm:$0xff] %v2285_v0 }
  0xa3   : > { %352 = vst [vmem:[#allocation2 + $0x448] sm:$0xff] %v2285_v0 }
  0xa4   : > { %353 = vst [vmem:[#allocation2 + $0x450] sm:$0xff] %v2285_v0 }
  0xa5   : > { %354 = vst [vmem:[#allocation2 + $0x458] sm:$0xff] %v2285_v0 }
  0xa6   : > { %355 = vst [vmem:[#allocation2 + $0x4b8] sm:$0xff] %v2285_v0 }
  0xa7   : > { %356 = vst [vmem:[#allocation2 + $0x4c0] sm:$0xff] %v2285_v0 }
  0xa8   : > { %357 = vst [vmem:[#allocation2 + $0x4c8] sm:$0xff] %v2285_v0 }
  0xa9   : > { %358 = vst [vmem:[#allocation2 + $0x528] sm:$0xff] %v2285_v0 }
  0xaa   : > { %359 = vst [vmem:[#allocation2 + $0x530] sm:$0xff] %v2285_v0 }
  0xab   : > { %360 = vst [vmem:[#allocation2 + $0x538] sm:$0xff] %v2285_v0 }
  0xac   : > { %361 = vst [vmem:[#allocation2 + $0x598] sm:$0xff] %v2285_v0 }
  0xad   : > { %362 = vst [vmem:[#allocation2 + $0x5a0] sm:$0xff] %v2285_v0 }
  0xae   : > { %363 = vst [vmem:[#allocation2 + $0x5a8] sm:$0xff] %v2285_v0 }
  0xaf   : > { %364 = vst [vmem:[#allocation2 + $0x608] sm:$0xff] %v2285_v0 }
  0xb0   : > { %365 = vst [vmem:[#allocation2 + $0x610] sm:$0xff] %v2285_v0 }
  0xb1   : > { %366 = vst [vmem:[#allocation2 + $0x618] sm:$0xff] %v2285_v0 }
  0xb2 PF: > { %s2551_s22 = smov 0  }
  0xb3 LB: >> { %s2556_s8 = smov 0   ;;  %s2269_s22 = sphi %s2551_s22, %s372_s22  }
  0xb4 LB: >>> { %s1701_s21 = sshll.u32 %s2269_s22, 6  ;;  %v385_v1 = vlaneseq  ;;  %s1092_s14 = smul.u32 112, %s2269_s22  ;;  %s2273_s8 = sphi %s2556_s8, %s378_s8  }
  0xb5   : >>> { %s1700_s11 = sshll.u32 %s2273_s8, 3  ;;  %s378_s8 = sadd.s32 1, %s2273_s8  }
  0xb6   : >>> { %v386_v2 = vshrl.u32 %v385_v1, 7  ;;  %s381_s6 = sadd.s32 %s1701_s21, %s1700_s11  ;;  %s1093_s1 = sadd.s32 %s1700_s11, %s1092_s14 }
  0xb7   : >>> { %s382_s28 = scalar_lea.vmem %s2447_s19, %s381_s6 [#allocation3]  ;;  %s1094_s29 = scalar_lea.vmem [#allocation2], %s1093_s1 }
  0xb8   : >>> { %v383_v3 = vld [vmem:[%s382_s28] sm:$0xff]  ;;  %vm387_vm0 = vcmp.lt.s32.totalorder %v386_v2, 3  ;;  %vm396_vm1 = vcmp.lt.s32.totalorder %v386_v2, 2  ;;  %vm404_vm2 = vcmp.lt.s32.totalorder %v386_v2, 1  ;;  %vm417_vm3 = vcmp.lt.s32.totalorder %v386_v2, 7  ;;  %p375_p6 = scmp.ge.s32.totalorder %s378_s8, 8  }
  0xb9   : >>> { %v384_v4 = vrot.slane %v383_v3, 5  ;;  %1709 = vst [vmem:[%s1094_s29 + $0x2b8] sm:$0xff] %v383_v3  ;;  %v395_v5 = vrot.slane %v383_v3, 6  ;;  %v403_v6 = vrot.slane %v383_v3, 7  ;;  %v416_v7 = vrot.slane %v383_v3, 1  ;;  %s372_s22 = sadd.s32 (%p375_p6), 1, %s2269_s22  }
  0xba   : >>> { %v424_v8 = vrot.slane %v383_v3, 2  ;;  %vm425_vm4 = vcmp.lt.s32.totalorder %v386_v2, 6  ;;  %v432_v9 = vrot.slane %v383_v3, 3  ;;  %vm433_vm5 = vcmp.lt.s32.totalorder %v386_v2, 5  ;;  %p369_p2 = scmp.ge.s32.totalorder (%p375_p6), %s372_s22, 2  }
  0xbb   : >>> { %v388_v10 = vsel %vm387_vm0, 0.0, %v384_v4  ;;  %v397_v11 = vsel %vm396_vm1, 0.0, %v395_v5  ;;  %v405_v12 = vsel %vm404_vm2, 0.0, %v403_v6  ;;  %v418_v13 = vsel %vm417_vm3, %v416_v7, 0.0 }
  0xbc   : >>> { %1703 = vst [vmem:[%s1094_s29 + $0x18] sm:$0xff] %v388_v10  ;;  %v426_v14 = vsel %vm425_vm4, %v424_v8, 0.0  ;;  %v434_v15 = vsel %vm433_vm5, %v432_v9, 0.0 }
  0xbd   : >>> { %1705 = vst [vmem:[%s1094_s29 + $0xf8] sm:$0xff] %v397_v11  ;;  %377 = sbr.rel (!%p375_p6) target bundleno = 180 (0xb4), region = 250 }
  0xbe   : >>> { %1707 = vst [vmem:[%s1094_s29 + $0x1d8] sm:$0xff] %v405_v12 }
  0xbf   : >>> { %1711 = vst [vmem:[%s1094_s29 + $0x398] sm:$0xff] %v418_v13 }
  0xc0   : >>> { %1713 = vst [vmem:[%s1094_s29 + $0x478] sm:$0xff] %v426_v14 }
  0xc1   : >>> { %1715 = vst [vmem:[%s1094_s29 + $0x558] sm:$0xff] %v434_v15 }
  0xc2   : > { %371 = sbr.rel (!%p369_p2) target bundleno = 179 (0xb3), region = 261  ;;  %s2571_s5 = smov (%p369_p2), 0  }
  0xc7 LB: >> { %s1716_s25 = sshll.u32 %s2277_s5, 3  ;;  %s2580_s26 = smov 0   ;;  %s2277_s5 = sphi %s2571_s5, %s445_s5  }
  0xc8   : >> { %s447_s17 = scalar_lea.vmem %s2462_s20, %s1716_s25 [#allocation8] }
  0xc9   : >> { %v2578_v16 = vld [vmem:[%s447_s17] sm:$0xff] }
  0xca LB: >>> { %s456_s19 = smul.u32 392, %s2277_s5  ;;  %s1940_s4 = sshll.u32 %s2281_s26, 4  ;;  %s2281_s26 = sphi %s2580_s26, %s454_s26  }
  0xcb   : >>> { %s460_s9 = smul.u32 112, %s2277_s5  ;;  %s1926_s21 = sshll.u32 %s2277_s5, 6 }
  0xcc   : >>> { %s2588_s10 = scalar_lea.vmem %s2455_s27, %s456_s19 [#allocation6]  ;;  %s997_s14 = sadd.s32 %s1940_s4, %s1926_s21 }
  0xcd   : >>> { %v458_v17 = vld [vmem:[%s2588_s10] sm:$0xff]  ;;  %s461_s22 = sadd.s32 %s1940_s4, %s460_s9  ;;  %v1722_v18 = vld [vmem:[%s2588_s10 + $0x8] sm:$0xff]  ;;  %v1728_v19 = vld [vmem:[%s2588_s10 + $0x10] sm:$0xff]  ;;  %s998_s11 = scalar_lea.vmem %s2464_s7, %s997_s14 [#allocation9] }
  0xce   : >>> { %v1734_v20 = vld [vmem:[%s2588_s10 + $0x18] sm:$0xff]  ;;  %v1740_v21 = vld [vmem:[%s2588_s10 + $0x20] sm:$0xff]  ;;  %v1746_v22 = vld [vmem:[%s2588_s10 + $0x28] sm:$0xff]  ;;  %s2599_s8 = scalar_lea.vmem [#allocation2], %s461_s22  ;;  %s454_s26 = sadd.s32 1, %s2281_s26  }
  0xcf   : >>> { %v463_v23 = vld [vmem:[%s2599_s8] sm:$0xff]  ;;  %v1721_v24 = vld [vmem:[%s2599_s8 + $0x8] sm:$0xff]  ;;  %v1752_v49 = vld [vmem:[%s2588_s10 + $0x30] sm:$0xff]  ;;  %p451_p4 = scmp.ge.s32.totalorder %s454_s26, 4  }
  0xd0   : >>> { %v1724_v25 = vld [vmem:[%s2599_s8 + $0xe0] sm:$0xff]  ;;  %v464_v26 = vmul.f32 %v463_v23, %v458_v17  ;;  %v471_v27 = vmul.f32 %v1721_v24, %v458_v17  ;;  %v1727_v29 = vld [vmem:[%s2599_s8 + $0xe8] sm:$0xff]  ;;  %v1758_v56 = vld [vmem:[%s2588_s10 + $0x38] sm:$0xff]  ;;  %s445_s5 = sadd.s32 (%p451_p4), 1, %s2277_s5  }
  0xd1   : >>> { %v481_v28 = vmul.f32 %v1724_v25, %v1722_v18  ;;  %v1730_v30 = vld [vmem:[%s2599_s8 + $0x1c0] sm:$0xff]  ;;  %v1733_v31 = vld [vmem:[%s2599_s8 + $0x1c8] sm:$0xff]  ;;  %v486_v32 = vmul.f32 %v1727_v29, %v1722_v18  ;;  %v1761_v57 = vld [vmem:[%s2599_s8 + $0x10] sm:$0xff]  ;;  %v566_v61 = vmul.f32 %v1758_v56, %v1721_v24  ;;  %p442_p3 = scmp.ge.s32.totalorder (%p451_p4), %s445_s5, 2  }
  0xd2   : >>> { %v496_v33 = vmul.f32 %v1730_v30, %v1728_v19  ;;  %v501_v34 = vmul.f32 %v1733_v31, %v1728_v19  ;;  %v1736_v35 = vld [vmem:[%s2599_s8 + $0x2a0] sm:$0xff]  ;;  %v1739_v36 = vld [vmem:[%s2599_s8 + $0x2a8] sm:$0xff]  ;;  %v465_v38 = vadd.f32 %v464_v26, %v2578_v16  ;;  %v472_v39 = vadd.f32 %v471_v27, %v2578_v16  ;;  %v1765_v63 = vld [vmem:[%s2599_s8 + $0xf0] sm:$0xff] }
  0xd3   : >>> { %v1742_v37 = vld [vmem:[%s2599_s8 + $0x380] sm:$0xff]  ;;  %v511_v40 = vmul.f32 %v1736_v35, %v1734_v20  ;;  %v516_v41 = vmul.f32 %v1739_v36, %v1734_v20  ;;  %v1745_v42 = vld [vmem:[%s2599_s8 + $0x388] sm:$0xff]  ;;  %v573_v62 = vmul.f32 %v1761_v57, %v1758_v56  ;;  %v1769_v1 = vld [vmem:[%s2599_s8 + $0x1d0] sm:$0xff] }
  0xd4   : >>> { %v1748_v43 = vld [vmem:[%s2599_s8 + $0x460] sm:$0xff]  ;;  %v1751_v44 = vld [vmem:[%s2599_s8 + $0x468] sm:$0xff]  ;;  %v526_v45 = vmul.f32 %v1742_v37, %v1740_v21  ;;  %v531_v46 = vmul.f32 %v1745_v42, %v1740_v21  ;;  %v497_v52 = vadd.f32 %v496_v33, %v465_v38  ;;  %v502_v53 = vadd.f32 %v501_v34, %v472_v39  ;;  %v1770_v6 = vld [vmem:[%s2588_s10 + $0x50] sm:$0xff] }
  0xd5   : >>> { %v541_v47 = vmul.f32 %v1748_v43, %v1746_v22  ;;  %v546_v48 = vmul.f32 %v1751_v44, %v1746_v22  ;;  %v1754_v50 = vld [vmem:[%s2599_s8 + $0x540] sm:$0xff]  ;;  %v1757_v51 = vld [vmem:[%s2599_s8 + $0x548] sm:$0xff]  ;;  %v512_v54 = vadd.f32 %v511_v40, %v481_v28  ;;  %v517_v55 = vadd.f32 %v516_v41, %v486_v32  ;;  %v1773_v7 = vld [vmem:[%s2599_s8 + $0x2b0] sm:$0xff] }
  0xd6   : >>> { %v1762_v58 = vld [vmem:[%s2588_s10 + $0x40] sm:$0xff]  ;;  %v556_v59 = vmul.f32 %v1754_v50, %v1752_v49  ;;  %v561_v60 = vmul.f32 %v1757_v51, %v1752_v49  ;;  %v1766_v0 = vld [vmem:[%s2588_s10 + $0x48] sm:$0xff]  ;;  %v527_v2 = vadd.f32 %v526_v45, %v497_v52  ;;  %v532_v3 = vadd.f32 %v531_v46, %v502_v53  ;;  %v1774_v8 = vld [vmem:[%s2588_s10 + $0x58] sm:$0xff] }
  0xd7   : >>> { %v542_v4 = vadd.f32 %v541_v47, %v512_v54  ;;  %v547_v5 = vadd.f32 %v546_v48, %v517_v55  ;;  %v578_v9 = vmul.f32 %v1762_v58, %v1727_v29  ;;  %v583_v10 = vmul.f32 %v1765_v63, %v1762_v58  ;;  %v1777_v13 = vld [vmem:[%s2599_s8 + $0x390] sm:$0xff]  ;;  %v1778_v14 = vld [vmem:[%s2588_s10 + $0x60] sm:$0xff]  ;;  %v1782_v25 = vld [vmem:[%s2588_s10 + $0x68] sm:$0xff] }
  0xd8   : >>> { %v588_v11 = vmul.f32 %v1766_v0, %v1733_v31  ;;  %v593_v12 = vmul.f32 %v1769_v1, %v1766_v0  ;;  %v1781_v15 = vld [vmem:[%s2599_s8 + $0x470] sm:$0xff]  ;;  %v557_v17 = vadd.f32 %v556_v59, %v527_v2  ;;  %v562_v18 = vadd.f32 %v561_v60, %v532_v3  ;;  %v1790_v31 = vld [vmem:[%s2588_s10 + $0x78] sm:$0xff]  ;;  %v1798_v41 = vld [vmem:[%s2588_s10 + $0x88] sm:$0xff] }
  0xd9   : >>> { %v598_v19 = vmul.f32 %v1770_v6, %v1739_v36  ;;  %v603_v20 = vmul.f32 %v1773_v7, %v1770_v6  ;;  %v579_v21 = vadd.f32 %v578_v9, %v542_v4  ;;  %v584_v22 = vadd.f32 %v583_v10, %v547_v5  ;;  %v1785_v26 = vld [vmem:[%s2599_s8 + $0x550] sm:$0xff]  ;;  %v1793_v32 = vld [vmem:[%s2599_s8 + $0xf8] sm:$0xff]  ;;  %v1794_v47 = vld [vmem:[%s2588_s10 + $0x80] sm:$0xff] }
  0xda   : >>> { %v608_v23 = vmul.f32 %v1774_v8, %v1745_v42  ;;  %v613_v24 = vmul.f32 %v1777_v13, %v1774_v8  ;;  %v567_v27 = vadd.f32 %v566_v61, %v557_v17  ;;  %v574_v28 = vadd.f32 %v573_v62, %v562_v18  ;;  %v1786_v35 = vld [vmem:[%s2588_s10 + $0x70] sm:$0xff]  ;;  %v1789_v36 = vld [vmem:[%s2599_s8 + $0x18] sm:$0xff]  ;;  %v1814_v9 = vld [vmem:[%s2588_s10 + $0xa8] sm:$0xff] }
  0xdb   : >>> { %v618_v29 = vmul.f32 %v1778_v14, %v1751_v44  ;;  %v623_v30 = vmul.f32 %v1781_v15, %v1778_v14  ;;  %v599_v33 = vadd.f32 %v598_v19, %v579_v21  ;;  %v604_v34 = vadd.f32 %v603_v20, %v584_v22  ;;  %v1801_v42 = vld [vmem:[%s2599_s8 + $0x2b8] sm:$0xff]  ;;  %v1802_v60 = vld [vmem:[%s2588_s10 + $0x90] sm:$0xff]  ;;  %v1821_v10 = vld [vmem:[%s2599_s8 + $0x100] sm:$0xff] }
  0xdc   : >>> { %v589_v37 = vadd.f32 %v588_v11, %v567_v27  ;;  %v594_v38 = vadd.f32 %v593_v12, %v574_v28  ;;  %v628_v39 = vmul.f32 %v1782_v25, %v1757_v51  ;;  %v633_v40 = vmul.f32 %v1785_v26, %v1782_v25  ;;  %v1797_v48 = vld [vmem:[%s2599_s8 + $0x1d8] sm:$0xff]  ;;  %v1817_v17 = vld [vmem:[%s2599_s8 + $0x20] sm:$0xff] }
  0xdd   : >>> { %v619_v43 = vadd.f32 %v618_v29, %v599_v33  ;;  %v624_v44 = vadd.f32 %v623_v30, %v604_v34  ;;  %v650_v45 = vmul.f32 %v1790_v31, %v1765_v63  ;;  %v655_v46 = vmul.f32 %v1793_v32, %v1790_v31  ;;  %v1806_v54 = vld [vmem:[%s2588_s10 + $0x98] sm:$0xff]  ;;  %v1826_v18 = vld [vmem:[%s2588_s10 + $0xc0] sm:$0xff]  ;;  %v1834_v30 = vld [vmem:[%s2588_s10 + $0xd0] sm:$0xff] }
  0xde   : >>> { %v609_v49 = vadd.f32 %v608_v23, %v589_v37  ;;  %v614_v50 = vadd.f32 %v613_v24, %v594_v38  ;;  %v638_v52 = vmul.f32 %v1786_v35, %v1761_v57  ;;  %v645_v53 = vmul.f32 %v1789_v36, %v1786_v35  ;;  %v1809_v55 = vld [vmem:[%s2599_s8 + $0x478] sm:$0xff]  ;;  %v1810_v57 = vld [vmem:[%s2588_s10 + $0xa0] sm:$0xff] }
  0xdf   : >>> { %v651_v51 = vadd.f32 %v650_v45, %v619_v43  ;;  %v656_v56 = vadd.f32 %v655_v46, %v624_v44  ;;  %v670_v58 = vmul.f32 %v1798_v41, %v1773_v7  ;;  %v675_v59 = vmul.f32 %v1801_v42, %v1798_v41  ;;  %v1805_v61 = vld [vmem:[%s2599_s8 + $0x398] sm:$0xff]  ;;  %v1818_v7 = vld [vmem:[%s2588_s10 + $0xb0] sm:$0xff]  ;;  %v1829_v19 = vld [vmem:[%s2599_s8 + $0x2c0] sm:$0xff] }
  0xe0   : >>> { %v629_v62 = vadd.f32 %v628_v39, %v609_v49  ;;  %v634_v63 = vadd.f32 %v633_v40, %v614_v50  ;;  %v660_v0 = vmul.f32 %v1794_v47, %v1769_v1  ;;  %v665_v2 = vmul.f32 %v1797_v48, %v1794_v47  ;;  %v1813_v3 = vld [vmem:[%s2599_s8 + $0x558] sm:$0xff]  ;;  %v2654_v29 = vld [vmem:[%s2599_s8 + $0x1e0] sm:$0xff]  ;;  %v1830_v40 = vld [vmem:[%s2588_s10 + $0xc8] sm:$0xff] }
  0xe1   : >>> { %v671_v4 = vadd.f32 %v670_v58, %v651_v51  ;;  %v676_v5 = vadd.f32 %v675_v59, %v656_v56  ;;  %v690_v6 = vmul.f32 %v1806_v54, %v1781_v15  ;;  %v695_v8 = vmul.f32 %v1809_v55, %v1806_v54  ;;  %v1822_v15 = vld [vmem:[%s2588_s10 + $0xb8] sm:$0xff]  ;;  %v2665_v50 = vld [vmem:[%s2599_s8 + $0x560] sm:$0xff]  ;;  %v1857_v56 = vld [vmem:[%s2599_s8 + $0x2c8] sm:$0xff] }
  0xe2   : >>> { %v639_v11 = vadd.f32 %v638_v52, %v629_v62  ;;  %v646_v12 = vadd.f32 %v645_v53, %v634_v63  ;;  %v680_v14 = vmul.f32 %v1802_v60, %v1777_v13  ;;  %v685_v1 = vmul.f32 %v1805_v61, %v1802_v60  ;;  %v1837_v13 = vld [vmem:[%s2599_s8 + $0x480] sm:$0xff]  ;;  %v1838_v45 = vld [vmem:[%s2588_s10 + $0xd8] sm:$0xff]  ;;  %v1846_v52 = vld [vmem:[%s2588_s10 + $0xe8] sm:$0xff] }
  0xe3   : >>> { %v691_v20 = vadd.f32 %v690_v6, %v671_v4  ;;  %v696_v21 = vadd.f32 %v695_v8, %v676_v5  ;;  %v700_v22 = vmul.f32 %v1810_v57, %v1785_v26  ;;  %v705_v23 = vmul.f32 %v1813_v3, %v1810_v57  ;;  %v1849_v53 = vld [vmem:[%s2599_s8 + $0x108] sm:$0xff]  ;;  %v1854_v51 = vld [vmem:[%s2588_s10 + $0xf8] sm:$0xff]  ;;  %v1842_v62 = vld [vmem:[%s2588_s10 + $0xe0] sm:$0xff] }
  0xe4   : >>> { %v661_v24 = vadd.f32 %v660_v0, %v639_v11  ;;  %v666_v25 = vadd.f32 %v665_v2, %v646_v12  ;;  %v722_v27 = vmul.f32 %v1818_v7, %v1793_v32  ;;  %v727_v28 = vmul.f32 %v1821_v10, %v1818_v7  ;;  %v2660_v32 = vld [vmem:[%s2599_s8 + $0x3a0] sm:$0xff]  ;;  %v2674_v63 = vld [vmem:[%s2599_s8 + $0x28] sm:$0xff] }
  0xe5   : >>> { %v710_v31 = vmul.f32 %v1814_v9, %v1789_v36  ;;  %v717_v33 = vmul.f32 %v1817_v17, %v1814_v9  ;;  %v742_v34 = vmul.f32 %v1826_v18, %v1801_v42  ;;  %v747_v35 = vmul.f32 %v1829_v19, %v1826_v18  ;;  %v1862_v5 = vld [vmem:[%s2588_s10 + $0x108] sm:$0xff] }
  0xe6   : >>> { %v681_v37 = vadd.f32 %v680_v14, %v661_v24  ;;  %v686_v26 = vadd.f32 %v685_v1, %v666_v25  ;;  %v723_v38 = vadd.f32 %v722_v27, %v691_v20  ;;  %v728_v39 = vadd.f32 %v727_v28, %v696_v21  ;;  %v1853_v18 = vld [vmem:[%s2599_s8 + $0x1e8] sm:$0xff]  ;;  %v1858_v25 = vld [vmem:[%s2588_s10 + $0x100] sm:$0xff] }
  0xe7   : >>> { %v732_v41 = vmul.f32 %v1822_v15, %v1797_v48  ;;  %v737_v43 = vmul.f32 %v2654_v29, %v1822_v15  ;;  %v762_v44 = vmul.f32 %v1834_v30, %v1809_v55  ;;  %v767_v36 = vmul.f32 %v1837_v13, %v1834_v30 }
  0xe8   : >>> { %v701_v42 = vadd.f32 %v700_v22, %v681_v37  ;;  %v706_v46 = vadd.f32 %v705_v23, %v686_v26  ;;  %v743_v47 = vadd.f32 %v742_v34, %v723_v38  ;;  %v748_v49 = vadd.f32 %v747_v35, %v728_v39  ;;  %v1874_v23 = vld [vmem:[%s2588_s10 + $0x120] sm:$0xff]  ;;  %v1866_v37 = vld [vmem:[%s2588_s10 + $0x110] sm:$0xff]  ;;  %v1869_v26 = vld [vmem:[%s2599_s8 + $0x568] sm:$0xff] }
  0xe9   : >>> { %v752_v54 = vmul.f32 %v1830_v40, %v1805_v61  ;;  %v757_v48 = vmul.f32 %v2660_v32, %v1830_v40  ;;  %v772_v0 = vmul.f32 %v1838_v45, %v1813_v3  ;;  %v777_v2 = vmul.f32 %v2665_v50, %v1838_v45  ;;  %v1865_v61 = vld [vmem:[%s2599_s8 + $0x488] sm:$0xff]  ;;  %v1850_v3 = vld [vmem:[%s2588_s10 + $0xf0] sm:$0xff]  ;;  %v1870_v45 = vld [vmem:[%s2588_s10 + $0x118] sm:$0xff] }
  0xea   : >>> { %v711_v55 = vadd.f32 %v710_v31, %v701_v42  ;;  %v718_v58 = vadd.f32 %v717_v33, %v706_v46  ;;  %v763_v59 = vadd.f32 %v762_v44, %v743_v47  ;;  %v768_v60 = vadd.f32 %v767_v36, %v748_v49  ;;  %v1882_v33 = vld [vmem:[%s2588_s10 + $0x130] sm:$0xff] }
  0xeb   : >>> { %v794_v57 = vmul.f32 %v1846_v52, %v1821_v10  ;;  %v799_v4 = vmul.f32 %v1849_v53, %v1846_v52  ;;  %v814_v9 = vmul.f32 %v1854_v51, %v1829_v19  ;;  %v819_v7 = vmul.f32 %v1857_v56, %v1854_v51  ;;  %v1877_v19 = vld [vmem:[%s2599_s8 + $0x110] sm:$0xff]  ;;  %v1878_v51 = vld [vmem:[%s2588_s10 + $0x128] sm:$0xff] }
  0xec   : >>> { %v733_v6 = vadd.f32 %v732_v41, %v711_v55  ;;  %v738_v8 = vadd.f32 %v737_v43, %v718_v58  ;;  %v782_v11 = vmul.f32 %v1842_v62, %v1817_v17  ;;  %v789_v12 = vmul.f32 %v2674_v63, %v1842_v62  ;;  %v1861_v17 = vld [vmem:[%s2599_s8 + $0x3a8] sm:$0xff]  ;;  %v2696_v36 = vld [vmem:[%s2599_s8 + $0x490] sm:$0xff] }
  0xed   : >>> { %v795_v14 = vadd.f32 %v794_v57, %v763_v59  ;;  %v800_v1 = vadd.f32 %v799_v4, %v768_v60  ;;  %v834_v21 = vmul.f32 %v1862_v5, %v1837_v13  ;;  %v839_v22 = vmul.f32 %v1865_v61, %v1862_v5  ;;  %v2689_v13 = vld [vmem:[%s2599_s8 + $0x2d0] sm:$0xff]  ;;  %v1886_v4 = vld [vmem:[%s2588_s10 + $0x138] sm:$0xff] }
  0xee   : >>> { %v753_v10 = vadd.f32 %v752_v54, %v733_v6  ;;  %v758_v20 = vadd.f32 %v757_v48, %v738_v8  ;;  %v804_v30 = vmul.f32 %v1850_v3, %v2654_v29  ;;  %v809_v31 = vmul.f32 %v1853_v18, %v1850_v3  ;;  %v1890_v29 = vld [vmem:[%s2588_s10 + $0x140] sm:$0xff]  ;;  %v1873_v42 = vld [vmem:[%s2599_s8 + $0x30] sm:$0xff]  ;;  %v1905_v6 = vld [vmem:[%s2599_s8 + $0x118] sm:$0xff] }
  0xef   : >>> { %v815_v15 = vadd.f32 %v814_v9, %v795_v14  ;;  %v820_v24 = vadd.f32 %v819_v7, %v800_v1  ;;  %v866_v38 = vmul.f32 %v1874_v23, %v1849_v53  ;;  %v871_v39 = vmul.f32 %v1877_v19, %v1874_v23  ;;  %v1881_v55 = vld [vmem:[%s2599_s8 + $0x1f0] sm:$0xff]  ;;  %v1894_v3 = vld [vmem:[%s2588_s10 + $0x148] sm:$0xff] }
  0xf0   : >>> { %v773_v27 = vadd.f32 %v772_v0, %v753_v10  ;;  %v778_v28 = vadd.f32 %v777_v2, %v758_v20  ;;  %v824_v43 = vmul.f32 %v1858_v25, %v2660_v32  ;;  %v829_v44 = vmul.f32 %v1861_v17, %v1858_v25  ;;  %v1889_v5 = vld [vmem:[%s2599_s8 + $0x3b0] sm:$0xff]  ;;  %v1913_v25 = vld [vmem:[%s2599_s8 + $0x2d8] sm:$0xff] }
  0xf1   : >>> { %v835_v34 = vadd.f32 %v834_v21, %v815_v15  ;;  %v840_v35 = vadd.f32 %v839_v22, %v820_v24  ;;  %v886_v49 = vmul.f32 %v1882_v33, %v1857_v56  ;;  %v891_v52 = vmul.f32 %v2689_v13, %v1882_v33  ;;  %v1898_v10 = vld [vmem:[%s2588_s10 + $0x150] sm:$0xff]  ;;  %v1901_v22 = vld [vmem:[%s2599_s8 + $0x38] sm:$0xff]  ;;  %v1910_v24 = vld [vmem:[%s2588_s10 + $0x168] sm:$0xff] }
  0xf2   : >>> { %v783_v40 = vadd.f32 %v782_v11, %v773_v27  ;;  %v790_v41 = vadd.f32 %v789_v12, %v778_v28  ;;  %v844_v48 = vmul.f32 %v1866_v37, %v2665_v50  ;;  %v849_v32 = vmul.f32 %v1869_v26, %v1866_v37  ;;  %v1902_v50 = vld [vmem:[%s2588_s10 + $0x158] sm:$0xff]  ;;  %v1906_v33 = vld [vmem:[%s2588_s10 + $0x160] sm:$0xff] }
  0xf3   : >>> { %v867_v46 = vadd.f32 %v866_v38, %v835_v34  ;;  %v872_v47 = vadd.f32 %v871_v39, %v840_v35  ;;  %v906_v60 = vmul.f32 %v1890_v29, %v1865_v61  ;;  %v911_v62 = vmul.f32 %v2696_v36, %v1890_v29  ;;  %v1909_v34 = vld [vmem:[%s2599_s8 + $0x1f8] sm:$0xff]  ;;  %v1914_v38 = vld [vmem:[%s2588_s10 + $0x170] sm:$0xff] }
  0xf4   : >>> { %v805_v53 = vadd.f32 %v804_v30, %v783_v40  ;;  %v810_v54 = vadd.f32 %v809_v31, %v790_v41  ;;  %v854_v2 = vmul.f32 %v1870_v45, %v2674_v63  ;;  %v861_v57 = vmul.f32 %v1873_v42, %v1870_v45  ;;  %v1897_v63 = vld [vmem:[%s2599_s8 + $0x570] sm:$0xff]  ;;  %v1921_v29 = vld [vmem:[%s2599_s8 + $0x498] sm:$0xff] }
  0xf5   : >>> { %v887_v58 = vadd.f32 %v886_v49, %v867_v46  ;;  %v892_v59 = vadd.f32 %v891_v52, %v872_v47  ;;  %v876_v61 = vmul.f32 %v1878_v51, %v1853_v18  ;;  %v881_v7 = vmul.f32 %v1881_v55, %v1878_v51 }
  0xf6   : >>> { %v825_v0 = vadd.f32 %v824_v43, %v805_v53  ;;  %v830_v56 = vadd.f32 %v829_v44, %v810_v54  ;;  %v896_v11 = vmul.f32 %v1886_v4, %v1861_v17  ;;  %v901_v12 = vmul.f32 %v1889_v5, %v1886_v4  ;;  %v1917_v43 = vld [vmem:[%s2599_s8 + $0x3b8] sm:$0xff]  ;;  %v1922_v53 = vld [vmem:[%s2588_s10 + $0x180] sm:$0xff] }
  0xf7   : >>> { %v907_v14 = vadd.f32 %v906_v60, %v887_v58  ;;  %v912_v1 = vadd.f32 %v911_v62, %v892_v59  ;;  %v938_v23 = vmul.f32 %v1902_v50, %v1877_v19  ;;  %v943_v15 = vmul.f32 %v1905_v6, %v1902_v50  ;;  %v1918_v44 = vld [vmem:[%s2588_s10 + $0x178] sm:$0xff] }
  0xf8   : >>> { %v845_v8 = vadd.f32 %v844_v48, %v825_v0  ;;  %v850_v9 = vadd.f32 %v849_v32, %v830_v56  ;;  %v916_v27 = vmul.f32 %v1894_v3, %v1869_v26  ;;  %v921_v28 = vmul.f32 %v1897_v63, %v1894_v3  ;;  %v1925_v54 = vld [vmem:[%s2599_s8 + $0x578] sm:$0xff] }
  0xf9   : >>> { %v926_v30 = vmul.f32 %v1898_v10, %v1873_v42  ;;  %v933_v31 = vmul.f32 %v1901_v22, %v1898_v10  ;;  %v958_v35 = vmul.f32 %v1910_v24, %v2689_v13  ;;  %v963_v37 = vmul.f32 %v1913_v25, %v1910_v24 }
  0xfa   : >>> { %v855_v20 = vadd.f32 %v854_v2, %v845_v8  ;;  %v862_v21 = vadd.f32 %v861_v57, %v850_v9  ;;  %v939_v40 = vadd.f32 %v938_v23, %v907_v14  ;;  %v944_v41 = vadd.f32 %v943_v15, %v912_v1 }
  0xfb   : >>> { %v948_v42 = vmul.f32 %v1906_v33, %v1881_v55  ;;  %v953_v46 = vmul.f32 %v1909_v34, %v1906_v33  ;;  %v968_v47 = vmul.f32 %v1914_v38, %v1889_v5  ;;  %v973_v49 = vmul.f32 %v1917_v43, %v1914_v38 }
  0xfc   : >>> { %v877_v18 = vadd.f32 %v876_v61, %v855_v20  ;;  %v882_v17 = vadd.f32 %v881_v7, %v862_v21  ;;  %v978_v13 = vmul.f32 %v1918_v44, %v2696_v36  ;;  %v983_v52 = vmul.f32 %v1921_v29, %v1918_v44 }
  0xfd   : >>> { %v959_v51 = vadd.f32 %v958_v35, %v939_v40  ;;  %v964_v58 = vadd.f32 %v963_v37, %v944_v41  ;;  %v988_v62 = vmul.f32 %v1922_v53, %v1897_v63  ;;  %v993_v0 = vmul.f32 %v1925_v54, %v1922_v53 }
  0xfe   : >>> { %v897_v19 = vadd.f32 %v896_v11, %v877_v18  ;;  %v902_v39 = vadd.f32 %v901_v12, %v882_v17 }
  0xff   : >>> { %v979_v2 = vadd.f32 %v978_v13, %v959_v51  ;;  %v984_v57 = vadd.f32 %v983_v52, %v964_v58 }
 0x100   : >>> { %v917_v26 = vadd.f32 %v916_v27, %v897_v19  ;;  %v922_v45 = vadd.f32 %v921_v28, %v902_v39 }
 0x102   : >>> { %v927_v48 = vadd.f32 %v926_v30, %v917_v26  ;;  %v934_v32 = vadd.f32 %v933_v31, %v922_v45 }
 0x104   : >>> { %v949_v59 = vadd.f32 %v948_v42, %v927_v48  ;;  %v954_v60 = vadd.f32 %v953_v46, %v934_v32 }
 0x106   : >>> { %v969_v55 = vadd.f32 %v968_v47, %v949_v59  ;;  %v974_v56 = vadd.f32 %v973_v49, %v954_v60 }
 0x108   : >>> { %v989_v36 = vadd.f32 %v988_v62, %v969_v55  ;;  %v994_v4 = vadd.f32 %v993_v0, %v974_v56 }
 0x109   : >> { %453 = sbr.rel (!%p451_p4) target bundleno = 202 (0xca), region = 272 }
 0x10a   : >>> { %v995_v5 = vadd.f32 %v989_v36, %v979_v2  ;;  %v1000_v50 = vadd.f32 %v994_v4, %v984_v57 }
 0x10c   : >>> { %999 = vst [vmem:[%s998_s11] sm:$0xff] %v995_v5 }
 0x10d   : >>> { %1930 = vst [vmem:[%s998_s11 + $0x8] sm:$0xff] %v1000_v50 }
 0x10e   : > { %444 = sbr.rel (!%p442_p3) target bundleno = 199 (0xc7), region = 283  ;;  %s1992_s6 = sshll.u32 (%p442_p3), %s2329_s16, 7 }
 0x10f   : > { %s1017_s29 = scalar_lea.hbm (%p442_p3), %s2773_s3, %s1992_s6  ;;  %s1018_s25 = sshll.u32 (%p442_p3), %s2464_s7, 4  ;;  %s1019_s25 = int_to_ptr.vmem [resolvable:$true] %s1018_s25 }
 0x110   : > { %s1020_s17 = sshll.u32 (%p442_p3), %s1017_s29, 4  ;;  %s1005_s26 = scalar_lea.sflag (%p442_p3), [#allocation5], %s2443_s30  ;;  %s1021_s17 = int_to_ptr.hbm [resolvable:$true] %s1020_s17 }
 0x111   : > { %s2193_s19 = sshra.s32 (%p442_p3), %s1021_s17, 4  ;;  %s2199_s16 = scalar_lea.hbm (%p442_p3), %s2773_s3, 256  ;;  %s2194_s19 = int_to_ptr.hbm [resolvable:$true] %s2193_s19 }
 0x112   : > { %s2195_s9 = scalar_lea.hbm (%p442_p3), %s2194_s19, 128  ;;  %p2200_p10 = scmp.lt.s32.totalorder (%p442_p3), %s2194_s19, %s2773_s3 }
 0x113   : > { %p2196_p5 = scmp.ne.s32.totalorder %s2194_s19, %s2195_s9  ;;  %p2201_p0 = scmp.lt.s32.totalorder %s2199_s16, %s2195_s9 }
 0x115   : > { %p2197_p7 = pnand %p2196_p5, %p2354_p11  ;;  %p2202_p1 = por %p2201_p0, %p2200_p10 }
 0x117   : > { %p2198_p8 = pneg %p2197_p7 }
 0x119   : > { %p2203_p13 = pnand %p2202_p1, %p2198_p8 }
 0x11b   : > { %2206 = shalt.err (!%p2203_p13)
}
 0x11c   : > { %s2286_s30 = smov 128   ;;  %s2287_s7 = smov 8  }
 0x11d   : > { %2002 = dma.vmem_to_hbm [thread:$0]  (%p2354_p11), %s1019_s25, 2048, %s1021_s17, %s1005_s26, %s2286_s30, %s2286_s30, %s2287_s7  }
 0x11e PF: > { %s1035_s4 = sand.u32 1, %s2253_s12   ;;  %p2015_p6 = pnand %p1684_p9, %p2358_p12 }
 0x11f   : > { %s1036_s22 = scalar_lea.sflag [#allocation5], %s1035_s4 }
 0x120   : > { %p2016_p2 = pneg %p2015_p6 }
 0x122   : > { %2248 = dma.done.wait (%p2016_p2), %s1036_s22, 2048  }
 0x123   : > { %2250 = vsyncadd (%p2016_p2), %s1036_s22, 4294965248  ;;  %s2784_s8 = sld [smem:[#allocation13_spill]]  ;;  %p19_p4 = scmp.ge.s32.totalorder %s2333_s18, 4  }
 0x124   : > { %s2785_s14 = sld [smem:[#allocation14_spill]]  ;;  %s2786_s12 = smov %s2257_s13 }
 0x125   : > { %s2788_s15 = smov %s2333_s18  ;;  %21 = sbr.rel (!%p19_p4) target bundleno = 9 (0x9), region = 294 }
 0x129   : > { %s2787_s13 = smov %s2784_s8 }
 0x12a   :  { %1042 = vsyncpa [#allocation4], 1 }
 0x12b   :  { %1044 = vsyncpa [#allocation4 + $0x1], 1 }
 0x12c   :  { %1045 = vsyncpa [#allocation7], 1 }
 0x12d   :  { %1047 = vsyncpa [#allocation7 + $0x1], 1 }
 0x12e   :  { %1048 = vsyncpa [#allocation5], 1 }
 0x12f   :  { %1050 = vsyncpa [#allocation5 + $0x1], 1 }

</bundles_post_ra>
